<compile_context>
chip_gen: v7x
topology: tpu7x:2x2x1
jax: 0.10.0
libtpu: 0.0.40
codegen_flags: <defaults>
</compile_context>

<pallas_src>
import functools

import jax
import jax.numpy as jnp
from jax import lax
from jax.experimental import pallas as pl
from jax.experimental.pallas import tpu as pltpu

EPS = 1e-5
LANE = 128


def _round_up(x, m):
    return ((x + m - 1) // m) * m


def _arm_kernel(x_ref, mask_ref, w3_ref, b3_ref, w1_ref, b1_ref, out_ref,
                xpad_ref, acc_ref, *, H, W, wp, lout):
    """One batch image per grid step.

    x_ref:    (1, H, W, Cin)   input activations (producer dtype; cast to bf16 here)
    mask_ref: (1, lout)        f32   1/(H*W) on valid flat columns, 0 on pad cols
    w3_ref:   (9, Cin, Cp)     bf16  folded conv3x3 weight, tap-major (dy*3+dx)
    b3_ref:   (1, Cp)          f32   folded BN1 bias
    w1_ref:   (Cp, Cp)         f32   folded 1x1 attention conv weight
    b1_ref:   (1, Cp)          f32   folded conv bias + BN2 bias
    out_ref:  (1, H, W, Cp)    bf16  feature * attention
    xpad_ref: ((H+3)*wp, Cin)  bf16  scratch: zero-padded, flattened image
    acc_ref:  (lout, Cp)       f32   scratch: conv accumulator / feat
    """
    # ---- In-kernel halo: build the zero-padded flattened image in VMEM. ----
    # Re-zeroed every step (scratch is per-core; halo must be valid for every
    # grid index a core happens to own).
    xpad_ref[...] = jnp.zeros_like(xpad_ref)
    for h in range(H):
        base = (h + 1) * wp + 1                              # static offset
        xpad_ref[base:base + W, :] = x_ref[0, h].astype(xpad_ref.dtype)

    # ---- conv3x3 + BN (folded): 9 shifted contiguous-slab MXU matmuls. ----
    # Tap (dy,dx) of the flattened padded image is a contiguous row slab at
    # static offset dy*wp + dx; f32 accumulation in VMEM scratch.
    for t in range(9):
        dy, dx = divmod(t, 3)
        off = dy * wp + dx
        contrib = jnp.dot(xpad_ref[off:off + lout, :], w3_ref[t],
                          preferred_element_type=jnp.float32)
        if t == 0:
            acc_ref[...] = contrib
        else:
            acc_ref[...] += contrib

    # Folded BN bias + ReLU in place; `feat` lives in acc_ref from here on.
    acc_ref[...] = jnp.maximum(acc_ref[...] + b3_ref[...], 0.0)

    # ---- channel attention: masked global avg pool (MXU) + 1x1 + BN + sigmoid.
    pooled = jnp.dot(mask_ref[...], acc_ref[...],
                     preferred_element_type=jnp.float32)     # (1, Cp)
    att = jax.nn.sigmoid(
        jnp.dot(pooled, w1_ref[...], preferred_element_type=jnp.float32)
        + b1_ref[...])                                       # (1, Cp) f32

    # ---- out = feat * attention; pad-column drop + bf16 cast fused in store.
    for h in range(H):
        row = acc_ref[h * wp:h * wp + W, :] * att            # (W, Cp) f32
        out_ref[0, h] = row.astype(out_ref.dtype)


def attention_refinement_module_nhwc(x_nhwc, params):
    """Forward pass (eval-mode BN), channels-last. Returns (N, H, W, Cout) bf16.

    When Cout is already a multiple of 128 the trailing channel slice is a
    no-op and the kernel output is returned without any post-kernel copy.
    """
    N, H, W, Cin = x_nhwc.shape
    Cout = params["out_channels"]
    Cp = params["w3_taps"].shape[-1]

    wp = _round_up(W + 2, 8)          # padded row width, sublane-aligned
    lout = H * wp                     # flattened conv/pool length

    # Pooling row-vector: 1/(H*W) on the W valid columns of each flattened row.
    col = jnp.arange(lout, dtype=jnp.int32) % wp
    mask = jnp.where(col < W, 1.0 / (H * W), 0.0).astype(jnp.float32)
    mask = mask.reshape(1, lout)

    kernel = functools.partial(_arm_kernel, H=H, W=W, wp=wp, lout=lout)
    out = pl.pallas_call(
        kernel,
        out_shape=jax.ShapeDtypeStruct((N, H, W, Cp), jnp.bfloat16),
        grid_spec=pltpu.PrefetchScalarGridSpec(
            num_scalar_prefetch=0,
            grid=(N,),
            in_specs=[
                pl.BlockSpec((1, H, W, Cin), lambda n: (n, 0, 0, 0)),
                pl.BlockSpec((1, lout), lambda n: (0, 0)),
                pl.BlockSpec((9, Cin, Cp), lambda n: (0, 0, 0)),
                pl.BlockSpec((1, Cp), lambda n: (0, 0)),
                pl.BlockSpec((Cp, Cp), lambda n: (0, 0)),
                pl.BlockSpec((1, Cp), lambda n: (0, 0)),
            ],
            out_specs=pl.BlockSpec((1, H, W, Cp), lambda n: (n, 0, 0, 0)),
            scratch_shapes=[
                pltpu.VMEM(((H + 3) * wp, Cin), jnp.bfloat16),  # padded image
                pltpu.VMEM((lout, Cp), jnp.float32),            # conv acc / feat
            ],
        ),
        compiler_params=pltpu.CompilerParams(
            dimension_semantics=("parallel",),
            vmem_limit_bytes=48 * 1024 * 1024),
    )(x_nhwc, mask, params["w3_taps"], params["b3"], params["w1"], params["b1"])

    # Drop the Cout -> Cp lane padding (no-op when Cout == Cp).
    return out[..., :Cout]


def attention_refinement_module(x_nchw, params):
    """NCHW / f32 shim for PyTorch parity. Production callers should use the
    NHWC bf16 entry point directly and skip these layout transposes / casts."""
    x_nhwc = jnp.transpose(x_nchw, (0, 2, 3, 1))
    out = attention_refinement_module_nhwc(x_nhwc, params)
    return jnp.transpose(out.astype(jnp.float32), (0, 3, 1, 2))


def init_params(key, Cin, Cout):
    """Deterministic synthetic parameters; fold eval-mode BN into conv scale/bias
    and pad the output-channel axis to a lane-dense multiple of 128."""
    keys = jax.random.split(key, 10)
    raw = dict(
        w3=jax.random.normal(keys[0], (3, 3, Cin, Cout), jnp.float32) * 0.2,  # HWIO
        bn1_gamma=1.0 + 0.1 * jax.random.normal(keys[1], (Cout,), jnp.float32),
        bn1_beta=0.1 * jax.random.normal(keys[2], (Cout,), jnp.float32),
        bn1_mean=0.1 * jax.random.normal(keys[3], (Cout,), jnp.float32),
        bn1_var=jnp.abs(1.0 + 0.1 * jax.random.normal(keys[4], (Cout,), jnp.float32)),
        w1=jax.random.normal(keys[5], (Cout, Cout), jnp.float32) * 0.2,        # (Cin, Cout)
        b1_conv=0.1 * jax.random.normal(keys[6], (Cout,), jnp.float32),
        bn2_gamma=1.0 + 0.1 * jax.random.normal(keys[7], (Cout,), jnp.float32),
        bn2_beta=0.1 * jax.random.normal(keys[8], (Cout,), jnp.float32),
        bn2_mean=0.1 * jax.random.normal(keys[9], (Cout,), jnp.float32),
        bn2_var=jnp.ones((Cout,), jnp.float32),
    )
    Cp = _round_up(max(Cout, LANE), LANE)

    s1 = raw["bn1_gamma"] / jnp.sqrt(raw["bn1_var"] + EPS)
    w3_fold = (raw["w3"] * s1).reshape(9, Cin, Cout)              # tap-major: dy*3+dx
    w3_taps = jnp.zeros((9, Cin, Cp), jnp.float32).at[:, :, :Cout].set(w3_fold)
    b3 = jnp.zeros((1, Cp), jnp.float32).at[0, :Cout].set(
        raw["bn1_beta"] - raw["bn1_mean"] * s1)

    s2 = raw["bn2_gamma"] / jnp.sqrt(raw["bn2_var"] + EPS)
    w1 = jnp.zeros((Cp, Cp), jnp.float32).at[:Cout, :Cout].set(raw["w1"] * s2)
    b1 = jnp.zeros((1, Cp), jnp.float32).at[0, :Cout].set(
        raw["b1_conv"] * s2 + raw["bn2_beta"] - raw["bn2_mean"] * s2)

    folded = dict(
        w3_taps=w3_taps.astype(jnp.bfloat16),   # large MXU operand -> bf16
        b3=b3, w1=w1, b1=b1,                    # small epilogue params stay f32
        out_channels=Cout,
    )
    return raw, folded


def reference(x_nchw, raw):
    """Pure-JAX f32 reference (same eval-mode BN semantics), for correctness check."""
    x = jnp.transpose(x_nchw, (0, 2, 3, 1)).astype(jnp.float32)
    y = lax.conv_general_dilated(x, raw["w3"], (1, 1), "SAME",
                                 dimension_numbers=("NHWC", "HWIO", "NHWC"))
    s1 = raw["bn1_gamma"] / jnp.sqrt(raw["bn1_var"] + EPS)
    feat = jnp.maximum(y * s1 + (raw["bn1_beta"] - raw["bn1_mean"] * s1), 0.0)
    pooled = jnp.mean(feat, axis=(1, 2))                             # (N, Cout)
    a = pooled @ raw["w1"] + raw["b1_conv"]
    s2 = raw["bn2_gamma"] / jnp.sqrt(raw["bn2_var"] + EPS)
    a = jax.nn.sigmoid(a * s2 + (raw["bn2_beta"] - raw["bn2_mean"] * s2))
    out = feat * a[:, None, None, :]
    return jnp.transpose(out, (0, 3, 1, 2))


if __name__ == "__main__":
    key = jax.random.PRNGKey(0)
    kx, kp = jax.random.split(key)

    N, Cin, Cout, H, W = 2, 4, 8, 16, 16
    x = jax.random.normal(kx, (N, Cin, H, W), jnp.float32)           # NCHW input
    raw, folded = init_params(kp, Cin, Cout)

    out = attention_refinement_module(x, folded)
    out = jax.block_until_ready(out)

    ref = reference(x, raw)
    assert out.shape == (N, Cout, H, W)
    max_err = float(jnp.max(jnp.abs(out - ref)))
    # bf16 activations/weights feed the MXU (f32 accumulation) and the output
    # is stored in bf16; the reference stays f32 -> loosened tolerance.
    assert jnp.allclose(out, ref, atol=5e-2, rtol=5e-2), f"max abs err {max_err}"

    print("KERNEL_OK")
</pallas_src>

<mosaic_0001>
module attributes {stable_mosaic.version = 11 : i64} {
  func.func @_arm_kernel(%arg0: i32, %arg1: memref<1x16x16x4xf32, #tpu.memory_space<vmem>>, %arg2: memref<1x384xf32, #tpu.memory_space<vmem>>, %arg3: memref<9x4x128xbf16, #tpu.memory_space<vmem>>, %arg4: memref<1x128xf32, #tpu.memory_space<vmem>>, %arg5: memref<128x128xf32, #tpu.memory_space<vmem>>, %arg6: memref<1x128xf32, #tpu.memory_space<vmem>>, %arg7: memref<1x16x16x128xbf16, #tpu.memory_space<vmem>>, %arg8: memref<456x4xbf16, #tpu.memory_space<vmem>>, %arg9: memref<384x128xf32, #tpu.memory_space<vmem>>) attributes {dimension_semantics = [#tpu.dimension_semantics<parallel>], iteration_bounds = array<i64: 2>, scalar_prefetch = 0 : i64, scratch_operands = 2 : i64, tpu.core_type = #tpu.core_type<tc>, window_params = [{transform_indices = @transform_0, window_bounds = array<i64: 1, 16, 16, 4>}, {pipeline_mode = #tpu.pipeline_mode<synchronous>, transform_indices = @transform_1, window_bounds = array<i64: 1, 384>}, {pipeline_mode = #tpu.pipeline_mode<synchronous>, transform_indices = @transform_2, window_bounds = array<i64: 9, 4, 128>}, {pipeline_mode = #tpu.pipeline_mode<synchronous>, transform_indices = @transform_3, window_bounds = array<i64: 1, 128>}, {pipeline_mode = #tpu.pipeline_mode<synchronous>, transform_indices = @transform_4, window_bounds = array<i64: 128, 128>}, {pipeline_mode = #tpu.pipeline_mode<synchronous>, transform_indices = @transform_5, window_bounds = array<i64: 1, 128>}, {transform_indices = @transform_6, window_bounds = array<i64: 1, 16, 16, 128>}]} {
    %cst = arith.constant 0.000000e+00 : bf16
    %0 = vector.broadcast %cst : bf16 to vector<456x4xbf16>
    %c0 = arith.constant 0 : index
    %c0_0 = arith.constant 0 : index
    %1 = vector.load %arg8[%c0, %c0_0] : memref<456x4xbf16, #tpu.memory_space<vmem>>, vector<456x4xbf16>
    tpu.vector_store %arg8[%c0, %c0_0], %0 {strides = array<i32>} : memref<456x4xbf16, #tpu.memory_space<vmem>>, vector<456x4xbf16>,
    %c0_1 = arith.constant 0 : index
    %c0_2 = arith.constant 0 : index
    %c0_3 = arith.constant 0 : index
    %c0_4 = arith.constant 0 : index
    %2 = vector.load %arg1[%c0_1, %c0_2, %c0_3, %c0_4] : memref<1x16x16x4xf32, #tpu.memory_space<vmem>>, vector<1x1x16x4xf32>
    %3 = vector.shape_cast %2 : vector<1x1x16x4xf32> to vector<16x4xf32>
    %4 = arith.truncf %3 : vector<16x4xf32> to vector<16x4xbf16>
    %c25 = arith.constant 25 : index
    %c0_5 = arith.constant 0 : index
    %5 = vector.load %arg8[%c25, %c0_5] : memref<456x4xbf16, #tpu.memory_space<vmem>>, vector<16x4xbf16>
    tpu.vector_store %arg8[%c25, %c0_5], %4 {strides = array<i32>} : memref<456x4xbf16, #tpu.memory_space<vmem>>, vector<16x4xbf16>,
    %c0_6 = arith.constant 0 : index
    %c1 = arith.constant 1 : index
    %c0_7 = arith.constant 0 : index
    %c0_8 = arith.constant 0 : index
    %6 = vector.load %arg1[%c0_6, %c1, %c0_7, %c0_8] : memref<1x16x16x4xf32, #tpu.memory_space<vmem>>, vector<1x1x16x4xf32>
    %7 = vector.shape_cast %6 : vector<1x1x16x4xf32> to vector<16x4xf32>
    %8 = arith.truncf %7 : vector<16x4xf32> to vector<16x4xbf16>
    %c49 = arith.constant 49 : index
    %c0_9 = arith.constant 0 : index
    %9 = vector.load %arg8[%c49, %c0_9] : memref<456x4xbf16, #tpu.memory_space<vmem>>, vector<16x4xbf16>
    tpu.vector_store %arg8[%c49, %c0_9], %8 {strides = array<i32>} : memref<456x4xbf16, #tpu.memory_space<vmem>>, vector<16x4xbf16>,
    %c0_10 = arith.constant 0 : index
    %c2 = arith.constant 2 : index
    %c0_11 = arith.constant 0 : index
    %c0_12 = arith.constant 0 : index
    %10 = vector.load %arg1[%c0_10, %c2, %c0_11, %c0_12] : memref<1x16x16x4xf32, #tpu.memory_space<vmem>>, vector<1x1x16x4xf32>
    %11 = vector.shape_cast %10 : vector<1x1x16x4xf32> to vector<16x4xf32>
    %12 = arith.truncf %11 : vector<16x4xf32> to vector<16x4xbf16>
    %c73 = arith.constant 73 : index
    %c0_13 = arith.constant 0 : index
    %13 = vector.load %arg8[%c73, %c0_13] : memref<456x4xbf16, #tpu.memory_space<vmem>>, vector<16x4xbf16>
    tpu.vector_store %arg8[%c73, %c0_13], %12 {strides = array<i32>} : memref<456x4xbf16, #tpu.memory_space<vmem>>, vector<16x4xbf16>,
    %c0_14 = arith.constant 0 : index
    %c3 = arith.constant 3 : index
    %c0_15 = arith.constant 0 : index
    %c0_16 = arith.constant 0 : index
    %14 = vector.load %arg1[%c0_14, %c3, %c0_15, %c0_16] : memref<1x16x16x4xf32, #tpu.memory_space<vmem>>, vector<1x1x16x4xf32>
    %15 = vector.shape_cast %14 : vector<1x1x16x4xf32> to vector<16x4xf32>
    %16 = arith.truncf %15 : vector<16x4xf32> to vector<16x4xbf16>
    %c97 = arith.constant 97 : index
    %c0_17 = arith.constant 0 : index
    %17 = vector.load %arg8[%c97, %c0_17] : memref<456x4xbf16, #tpu.memory_space<vmem>>, vector<16x4xbf16>
    tpu.vector_store %arg8[%c97, %c0_17], %16 {strides = array<i32>} : memref<456x4xbf16, #tpu.memory_space<vmem>>, vector<16x4xbf16>,
    %c0_18 = arith.constant 0 : index
    %c4 = arith.constant 4 : index
    %c0_19 = arith.constant 0 : index
    %c0_20 = arith.constant 0 : index
    %18 = vector.load %arg1[%c0_18, %c4, %c0_19, %c0_20] : memref<1x16x16x4xf32, #tpu.memory_space<vmem>>, vector<1x1x16x4xf32>
    %19 = vector.shape_cast %18 : vector<1x1x16x4xf32> to vector<16x4xf32>
    %20 = arith.truncf %19 : vector<16x4xf32> to vector<16x4xbf16>
    %c121 = arith.constant 121 : index
    %c0_21 = arith.constant 0 : index
    %21 = vector.load %arg8[%c121, %c0_21] : memref<456x4xbf16, #tpu.memory_space<vmem>>, vector<16x4xbf16>
    tpu.vector_store %arg8[%c121, %c0_21], %20 {strides = array<i32>} : memref<456x4xbf16, #tpu.memory_space<vmem>>, vector<16x4xbf16>,
    %c0_22 = arith.constant 0 : index
    %c5 = arith.constant 5 : index
    %c0_23 = arith.constant 0 : index
    %c0_24 = arith.constant 0 : index
    %22 = vector.load %arg1[%c0_22, %c5, %c0_23, %c0_24] : memref<1x16x16x4xf32, #tpu.memory_space<vmem>>, vector<1x1x16x4xf32>
    %23 = vector.shape_cast %22 : vector<1x1x16x4xf32> to vector<16x4xf32>
    %24 = arith.truncf %23 : vector<16x4xf32> to vector<16x4xbf16>
    %c145 = arith.constant 145 : index
    %c0_25 = arith.constant 0 : index
    %25 = vector.load %arg8[%c145, %c0_25] : memref<456x4xbf16, #tpu.memory_space<vmem>>, vector<16x4xbf16>
    tpu.vector_store %arg8[%c145, %c0_25], %24 {strides = array<i32>} : memref<456x4xbf16, #tpu.memory_space<vmem>>, vector<16x4xbf16>,
    %c0_26 = arith.constant 0 : index
    %c6 = arith.constant 6 : index
    %c0_27 = arith.constant 0 : index
    %c0_28 = arith.constant 0 : index
    %26 = vector.load %arg1[%c0_26, %c6, %c0_27, %c0_28] : memref<1x16x16x4xf32, #tpu.memory_space<vmem>>, vector<1x1x16x4xf32>
    %27 = vector.shape_cast %26 : vector<1x1x16x4xf32> to vector<16x4xf32>
    %28 = arith.truncf %27 : vector<16x4xf32> to vector<16x4xbf16>
    %c169 = arith.constant 169 : index
    %c0_29 = arith.constant 0 : index
    %29 = vector.load %arg8[%c169, %c0_29] : memref<456x4xbf16, #tpu.memory_space<vmem>>, vector<16x4xbf16>
    tpu.vector_store %arg8[%c169, %c0_29], %28 {strides = array<i32>} : memref<456x4xbf16, #tpu.memory_space<vmem>>, vector<16x4xbf16>,
    %c0_30 = arith.constant 0 : index
    %c7 = arith.constant 7 : index
    %c0_31 = arith.constant 0 : index
    %c0_32 = arith.constant 0 : index
    %30 = vector.load %arg1[%c0_30, %c7, %c0_31, %c0_32] : memref<1x16x16x4xf32, #tpu.memory_space<vmem>>, vector<1x1x16x4xf32>
    %31 = vector.shape_cast %30 : vector<1x1x16x4xf32> to vector<16x4xf32>
    %32 = arith.truncf %31 : vector<16x4xf32> to vector<16x4xbf16>
    %c193 = arith.constant 193 : index
    %c0_33 = arith.constant 0 : index
    %33 = vector.load %arg8[%c193, %c0_33] : memref<456x4xbf16, #tpu.memory_space<vmem>>, vector<16x4xbf16>
    tpu.vector_store %arg8[%c193, %c0_33], %32 {strides = array<i32>} : memref<456x4xbf16, #tpu.memory_space<vmem>>, vector<16x4xbf16>,
    %c0_34 = arith.constant 0 : index
    %c8 = arith.constant 8 : index
    %c0_35 = arith.constant 0 : index
    %c0_36 = arith.constant 0 : index
    %34 = vector.load %arg1[%c0_34, %c8, %c0_35, %c0_36] : memref<1x16x16x4xf32, #tpu.memory_space<vmem>>, vector<1x1x16x4xf32>
    %35 = vector.shape_cast %34 : vector<1x1x16x4xf32> to vector<16x4xf32>
    %36 = arith.truncf %35 : vector<16x4xf32> to vector<16x4xbf16>
    %c217 = arith.constant 217 : index
    %c0_37 = arith.constant 0 : index
    %37 = vector.load %arg8[%c217, %c0_37] : memref<456x4xbf16, #tpu.memory_space<vmem>>, vector<16x4xbf16>
    tpu.vector_store %arg8[%c217, %c0_37], %36 {strides = array<i32>} : memref<456x4xbf16, #tpu.memory_space<vmem>>, vector<16x4xbf16>,
    %c0_38 = arith.constant 0 : index
    %c9 = arith.constant 9 : index
    %c0_39 = arith.constant 0 : index
    %c0_40 = arith.constant 0 : index
    %38 = vector.load %arg1[%c0_38, %c9, %c0_39, %c0_40] : memref<1x16x16x4xf32, #tpu.memory_space<vmem>>, vector<1x1x16x4xf32>
    %39 = vector.shape_cast %38 : vector<1x1x16x4xf32> to vector<16x4xf32>
    %40 = arith.truncf %39 : vector<16x4xf32> to vector<16x4xbf16>
    %c241 = arith.constant 241 : index
    %c0_41 = arith.constant 0 : index
    %41 = vector.load %arg8[%c241, %c0_41] : memref<456x4xbf16, #tpu.memory_space<vmem>>, vector<16x4xbf16>
    tpu.vector_store %arg8[%c241, %c0_41], %40 {strides = array<i32>} : memref<456x4xbf16, #tpu.memory_space<vmem>>, vector<16x4xbf16>,
    %c0_42 = arith.constant 0 : index
    %c10 = arith.constant 10 : index
    %c0_43 = arith.constant 0 : index
    %c0_44 = arith.constant 0 : index
    %42 = vector.load %arg1[%c0_42, %c10, %c0_43, %c0_44] : memref<1x16x16x4xf32, #tpu.memory_space<vmem>>, vector<1x1x16x4xf32>
    %43 = vector.shape_cast %42 : vector<1x1x16x4xf32> to vector<16x4xf32>
    %44 = arith.truncf %43 : vector<16x4xf32> to vector<16x4xbf16>
    %c265 = arith.constant 265 : index
    %c0_45 = arith.constant 0 : index
    %45 = vector.load %arg8[%c265, %c0_45] : memref<456x4xbf16, #tpu.memory_space<vmem>>, vector<16x4xbf16>
    tpu.vector_store %arg8[%c265, %c0_45], %44 {strides = array<i32>} : memref<456x4xbf16, #tpu.memory_space<vmem>>, vector<16x4xbf16>,
    %c0_46 = arith.constant 0 : index
    %c11 = arith.constant 11 : index
    %c0_47 = arith.constant 0 : index
    %c0_48 = arith.constant 0 : index
    %46 = vector.load %arg1[%c0_46, %c11, %c0_47, %c0_48] : memref<1x16x16x4xf32, #tpu.memory_space<vmem>>, vector<1x1x16x4xf32>
    %47 = vector.shape_cast %46 : vector<1x1x16x4xf32> to vector<16x4xf32>
    %48 = arith.truncf %47 : vector<16x4xf32> to vector<16x4xbf16>
    %c289 = arith.constant 289 : index
    %c0_49 = arith.constant 0 : index
    %49 = vector.load %arg8[%c289, %c0_49] : memref<456x4xbf16, #tpu.memory_space<vmem>>, vector<16x4xbf16>
    tpu.vector_store %arg8[%c289, %c0_49], %48 {strides = array<i32>} : memref<456x4xbf16, #tpu.memory_space<vmem>>, vector<16x4xbf16>,
    %c0_50 = arith.constant 0 : index
    %c12 = arith.constant 12 : index
    %c0_51 = arith.constant 0 : index
    %c0_52 = arith.constant 0 : index
    %50 = vector.load %arg1[%c0_50, %c12, %c0_51, %c0_52] : memref<1x16x16x4xf32, #tpu.memory_space<vmem>>, vector<1x1x16x4xf32>
    %51 = vector.shape_cast %50 : vector<1x1x16x4xf32> to vector<16x4xf32>
    %52 = arith.truncf %51 : vector<16x4xf32> to vector<16x4xbf16>
    %c313 = arith.constant 313 : index
    %c0_53 = arith.constant 0 : index
    %53 = vector.load %arg8[%c313, %c0_53] : memref<456x4xbf16, #tpu.memory_space<vmem>>, vector<16x4xbf16>
    tpu.vector_store %arg8[%c313, %c0_53], %52 {strides = array<i32>} : memref<456x4xbf16, #tpu.memory_space<vmem>>, vector<16x4xbf16>,
    %c0_54 = arith.constant 0 : index
    %c13 = arith.constant 13 : index
    %c0_55 = arith.constant 0 : index
    %c0_56 = arith.constant 0 : index
    %54 = vector.load %arg1[%c0_54, %c13, %c0_55, %c0_56] : memref<1x16x16x4xf32, #tpu.memory_space<vmem>>, vector<1x1x16x4xf32>
    %55 = vector.shape_cast %54 : vector<1x1x16x4xf32> to vector<16x4xf32>
    %56 = arith.truncf %55 : vector<16x4xf32> to vector<16x4xbf16>
    %c337 = arith.constant 337 : index
    %c0_57 = arith.constant 0 : index
    %57 = vector.load %arg8[%c337, %c0_57] : memref<456x4xbf16, #tpu.memory_space<vmem>>, vector<16x4xbf16>
    tpu.vector_store %arg8[%c337, %c0_57], %56 {strides = array<i32>} : memref<456x4xbf16, #tpu.memory_space<vmem>>, vector<16x4xbf16>,
    %c0_58 = arith.constant 0 : index
    %c14 = arith.constant 14 : index
    %c0_59 = arith.constant 0 : index
    %c0_60 = arith.constant 0 : index
    %58 = vector.load %arg1[%c0_58, %c14, %c0_59, %c0_60] : memref<1x16x16x4xf32, #tpu.memory_space<vmem>>, vector<1x1x16x4xf32>
    %59 = vector.shape_cast %58 : vector<1x1x16x4xf32> to vector<16x4xf32>
    %60 = arith.truncf %59 : vector<16x4xf32> to vector<16x4xbf16>
    %c361 = arith.constant 361 : index
    %c0_61 = arith.constant 0 : index
    %61 = vector.load %arg8[%c361, %c0_61] : memref<456x4xbf16, #tpu.memory_space<vmem>>, vector<16x4xbf16>
    tpu.vector_store %arg8[%c361, %c0_61], %60 {strides = array<i32>} : memref<456x4xbf16, #tpu.memory_space<vmem>>, vector<16x4xbf16>,
    %c0_62 = arith.constant 0 : index
    %c15 = arith.constant 15 : index
    %c0_63 = arith.constant 0 : index
    %c0_64 = arith.constant 0 : index
    %62 = vector.load %arg1[%c0_62, %c15, %c0_63, %c0_64] : memref<1x16x16x4xf32, #tpu.memory_space<vmem>>, vector<1x1x16x4xf32>
    %63 = vector.shape_cast %62 : vector<1x1x16x4xf32> to vector<16x4xf32>
    %64 = arith.truncf %63 : vector<16x4xf32> to vector<16x4xbf16>
    %c385 = arith.constant 385 : index
    %c0_65 = arith.constant 0 : index
    %65 = vector.load %arg8[%c385, %c0_65] : memref<456x4xbf16, #tpu.memory_space<vmem>>, vector<16x4xbf16>
    tpu.vector_store %arg8[%c385, %c0_65], %64 {strides = array<i32>} : memref<456x4xbf16, #tpu.memory_space<vmem>>, vector<16x4xbf16>,
    %c0_66 = arith.constant 0 : index
    %c0_67 = arith.constant 0 : index
    %66 = vector.load %arg8[%c0_66, %c0_67] : memref<456x4xbf16, #tpu.memory_space<vmem>>, vector<384x4xbf16>
    %c0_68 = arith.constant 0 : index
    %c0_69 = arith.constant 0 : index
    %c0_70 = arith.constant 0 : index
    %67 = vector.load %arg3[%c0_68, %c0_69, %c0_70] : memref<9x4x128xbf16, #tpu.memory_space<vmem>>, vector<1x4x128xbf16>
    %68 = vector.shape_cast %67 : vector<1x4x128xbf16> to vector<4x128xbf16>
    %cst_71 = arith.constant dense<0.000000e+00> : vector<384x128xf32>
    %69 = tpu.matmul %66, %68, %cst_71 {dimension_numbers = #tpu.dot_dimension_numbers<[1], [0], [0], [1], [0, 0, 1, 1], [], []>} : vector<384x4xbf16>, vector<4x128xbf16>, vector<384x128xf32> -> vector<384x128xf32>
    %c0_72 = arith.constant 0 : index
    %c0_73 = arith.constant 0 : index
    %70 = vector.load %arg9[%c0_72, %c0_73] : memref<384x128xf32, #tpu.memory_space<vmem>>, vector<384x128xf32>
    tpu.vector_store %arg9[%c0_72, %c0_73], %69 {strides = array<i32>} : memref<384x128xf32, #tpu.memory_space<vmem>>, vector<384x128xf32>,
    %c1_74 = arith.constant 1 : index
    %c0_75 = arith.constant 0 : index
    %71 = vector.load %arg8[%c1_74, %c0_75] : memref<456x4xbf16, #tpu.memory_space<vmem>>, vector<384x4xbf16>
    %c1_76 = arith.constant 1 : index
    %c0_77 = arith.constant 0 : index
    %c0_78 = arith.constant 0 : index
    %72 = vector.load %arg3[%c1_76, %c0_77, %c0_78] : memref<9x4x128xbf16, #tpu.memory_space<vmem>>, vector<1x4x128xbf16>
    %73 = vector.shape_cast %72 : vector<1x4x128xbf16> to vector<4x128xbf16>
    %cst_79 = arith.constant dense<0.000000e+00> : vector<384x128xf32>
    %74 = tpu.matmul %71, %73, %cst_79 {dimension_numbers = #tpu.dot_dimension_numbers<[1], [0], [0], [1], [0, 0, 1, 1], [], []>} : vector<384x4xbf16>, vector<4x128xbf16>, vector<384x128xf32> -> vector<384x128xf32>
    %c0_80 = arith.constant 0 : index
    %c0_81 = arith.constant 0 : index
    %75 = vector.load %arg9[%c0_80, %c0_81] : memref<384x128xf32, #tpu.memory_space<vmem>>, vector<384x128xf32>
    %76 = arith.addf %75, %74 : vector<384x128xf32>
    %c0_82 = arith.constant 0 : index
    %c0_83 = arith.constant 0 : index
    %77 = vector.load %arg9[%c0_82, %c0_83] : memref<384x128xf32, #tpu.memory_space<vmem>>, vector<384x128xf32>
    tpu.vector_store %arg9[%c0_82, %c0_83], %76 {strides = array<i32>} : memref<384x128xf32, #tpu.memory_space<vmem>>, vector<384x128xf32>,
    %c2_84 = arith.constant 2 : index
    %c0_85 = arith.constant 0 : index
    %78 = vector.load %arg8[%c2_84, %c0_85] : memref<456x4xbf16, #tpu.memory_space<vmem>>, vector<384x4xbf16>
    %c2_86 = arith.constant 2 : index
    %c0_87 = arith.constant 0 : index
    %c0_88 = arith.constant 0 : index
    %79 = vector.load %arg3[%c2_86, %c0_87, %c0_88] : memref<9x4x128xbf16, #tpu.memory_space<vmem>>, vector<1x4x128xbf16>
    %80 = vector.shape_cast %79 : vector<1x4x128xbf16> to vector<4x128xbf16>
    %cst_89 = arith.constant dense<0.000000e+00> : vector<384x128xf32>
    %81 = tpu.matmul %78, %80, %cst_89 {dimension_numbers = #tpu.dot_dimension_numbers<[1], [0], [0], [1], [0, 0, 1, 1], [], []>} : vector<384x4xbf16>, vector<4x128xbf16>, vector<384x128xf32> -> vector<384x128xf32>
    %c0_90 = arith.constant 0 : index
    %c0_91 = arith.constant 0 : index
    %82 = vector.load %arg9[%c0_90, %c0_91] : memref<384x128xf32, #tpu.memory_space<vmem>>, vector<384x128xf32>
    %83 = arith.addf %82, %81 : vector<384x128xf32>
    %c0_92 = arith.constant 0 : index
    %c0_93 = arith.constant 0 : index
    %84 = vector.load %arg9[%c0_92, %c0_93] : memref<384x128xf32, #tpu.memory_space<vmem>>, vector<384x128xf32>
    tpu.vector_store %arg9[%c0_92, %c0_93], %83 {strides = array<i32>} : memref<384x128xf32, #tpu.memory_space<vmem>>, vector<384x128xf32>,
    %c24 = arith.constant 24 : index
    %c0_94 = arith.constant 0 : index
    %85 = vector.load %arg8[%c24, %c0_94] : memref<456x4xbf16, #tpu.memory_space<vmem>>, vector<384x4xbf16>
    %c3_95 = arith.constant 3 : index
    %c0_96 = arith.constant 0 : index
    %c0_97 = arith.constant 0 : index
    %86 = vector.load %arg3[%c3_95, %c0_96, %c0_97] : memref<9x4x128xbf16, #tpu.memory_space<vmem>>, vector<1x4x128xbf16>
    %87 = vector.shape_cast %86 : vector<1x4x128xbf16> to vector<4x128xbf16>
    %cst_98 = arith.constant dense<0.000000e+00> : vector<384x128xf32>
    %88 = tpu.matmul %85, %87, %cst_98 {dimension_numbers = #tpu.dot_dimension_numbers<[1], [0], [0], [1], [0, 0, 1, 1], [], []>} : vector<384x4xbf16>, vector<4x128xbf16>, vector<384x128xf32> -> vector<384x128xf32>
    %c0_99 = arith.constant 0 : index
    %c0_100 = arith.constant 0 : index
    %89 = vector.load %arg9[%c0_99, %c0_100] : memref<384x128xf32, #tpu.memory_space<vmem>>, vector<384x128xf32>
    %90 = arith.addf %89, %88 : vector<384x128xf32>
    %c0_101 = arith.constant 0 : index
    %c0_102 = arith.constant 0 : index
    %91 = vector.load %arg9[%c0_101, %c0_102] : memref<384x128xf32, #tpu.memory_space<vmem>>, vector<384x128xf32>
    tpu.vector_store %arg9[%c0_101, %c0_102], %90 {strides = array<i32>} : memref<384x128xf32, #tpu.memory_space<vmem>>, vector<384x128xf32>,
    %c25_103 = arith.constant 25 : index
    %c0_104 = arith.constant 0 : index
    %92 = vector.load %arg8[%c25_103, %c0_104] : memref<456x4xbf16, #tpu.memory_space<vmem>>, vector<384x4xbf16>
    %c4_105 = arith.constant 4 : index
    %c0_106 = arith.constant 0 : index
    %c0_107 = arith.constant 0 : index
    %93 = vector.load %arg3[%c4_105, %c0_106, %c0_107] : memref<9x4x128xbf16, #tpu.memory_space<vmem>>, vector<1x4x128xbf16>
    %94 = vector.shape_cast %93 : vector<1x4x128xbf16> to vector<4x128xbf16>
    %cst_108 = arith.constant dense<0.000000e+00> : vector<384x128xf32>
    %95 = tpu.matmul %92, %94, %cst_108 {dimension_numbers = #tpu.dot_dimension_numbers<[1], [0], [0], [1], [0, 0, 1, 1], [], []>} : vector<384x4xbf16>, vector<4x128xbf16>, vector<384x128xf32> -> vector<384x128xf32>
    %c0_109 = arith.constant 0 : index
    %c0_110 = arith.constant 0 : index
    %96 = vector.load %arg9[%c0_109, %c0_110] : memref<384x128xf32, #tpu.memory_space<vmem>>, vector<384x128xf32>
    %97 = arith.addf %96, %95 : vector<384x128xf32>
    %c0_111 = arith.constant 0 : index
    %c0_112 = arith.constant 0 : index
    %98 = vector.load %arg9[%c0_111, %c0_112] : memref<384x128xf32, #tpu.memory_space<vmem>>, vector<384x128xf32>
    tpu.vector_store %arg9[%c0_111, %c0_112], %97 {strides = array<i32>} : memref<384x128xf32, #tpu.memory_space<vmem>>, vector<384x128xf32>,
    %c26 = arith.constant 26 : index
    %c0_113 = arith.constant 0 : index
    %99 = vector.load %arg8[%c26, %c0_113] : memref<456x4xbf16, #tpu.memory_space<vmem>>, vector<384x4xbf16>
    %c5_114 = arith.constant 5 : index
    %c0_115 = arith.constant 0 : index
    %c0_116 = arith.constant 0 : index
    %100 = vector.load %arg3[%c5_114, %c0_115, %c0_116] : memref<9x4x128xbf16, #tpu.memory_space<vmem>>, vector<1x4x128xbf16>
    %101 = vector.shape_cast %100 : vector<1x4x128xbf16> to vector<4x128xbf16>
    %cst_117 = arith.constant dense<0.000000e+00> : vector<384x128xf32>
    %102 = tpu.matmul %99, %101, %cst_117 {dimension_numbers = #tpu.dot_dimension_numbers<[1], [0], [0], [1], [0, 0, 1, 1], [], []>} : vector<384x4xbf16>, vector<4x128xbf16>, vector<384x128xf32> -> vector<384x128xf32>
    %c0_118 = arith.constant 0 : index
    %c0_119 = arith.constant 0 : index
    %103 = vector.load %arg9[%c0_118, %c0_119] : memref<384x128xf32, #tpu.memory_space<vmem>>, vector<384x128xf32>
    %104 = arith.addf %103, %102 : vector<384x128xf32>
    %c0_120 = arith.constant 0 : index
    %c0_121 = arith.constant 0 : index
    %105 = vector.load %arg9[%c0_120, %c0_121] : memref<384x128xf32, #tpu.memory_space<vmem>>, vector<384x128xf32>
    tpu.vector_store %arg9[%c0_120, %c0_121], %104 {strides = array<i32>} : memref<384x128xf32, #tpu.memory_space<vmem>>, vector<384x128xf32>,
    %c48 = arith.constant 48 : index
    %c0_122 = arith.constant 0 : index
    %106 = vector.load %arg8[%c48, %c0_122] : memref<456x4xbf16, #tpu.memory_space<vmem>>, vector<384x4xbf16>
    %c6_123 = arith.constant 6 : index
    %c0_124 = arith.constant 0 : index
    %c0_125 = arith.constant 0 : index
    %107 = vector.load %arg3[%c6_123, %c0_124, %c0_125] : memref<9x4x128xbf16, #tpu.memory_space<vmem>>, vector<1x4x128xbf16>
    %108 = vector.shape_cast %107 : vector<1x4x128xbf16> to vector<4x128xbf16>
    %cst_126 = arith.constant dense<0.000000e+00> : vector<384x128xf32>
    %109 = tpu.matmul %106, %108, %cst_126 {dimension_numbers = #tpu.dot_dimension_numbers<[1], [0], [0], [1], [0, 0, 1, 1], [], []>} : vector<384x4xbf16>, vector<4x128xbf16>, vector<384x128xf32> -> vector<384x128xf32>
    %c0_127 = arith.constant 0 : index
    %c0_128 = arith.constant 0 : index
    %110 = vector.load %arg9[%c0_127, %c0_128] : memref<384x128xf32, #tpu.memory_space<vmem>>, vector<384x128xf32>
    %111 = arith.addf %110, %109 : vector<384x128xf32>
    %c0_129 = arith.constant 0 : index
    %c0_130 = arith.constant 0 : index
    %112 = vector.load %arg9[%c0_129, %c0_130] : memref<384x128xf32, #tpu.memory_space<vmem>>, vector<384x128xf32>
    tpu.vector_store %arg9[%c0_129, %c0_130], %111 {strides = array<i32>} : memref<384x128xf32, #tpu.memory_space<vmem>>, vector<384x128xf32>,
    %c49_131 = arith.constant 49 : index
    %c0_132 = arith.constant 0 : index
    %113 = vector.load %arg8[%c49_131, %c0_132] : memref<456x4xbf16, #tpu.memory_space<vmem>>, vector<384x4xbf16>
    %c7_133 = arith.constant 7 : index
    %c0_134 = arith.constant 0 : index
    %c0_135 = arith.constant 0 : index
    %114 = vector.load %arg3[%c7_133, %c0_134, %c0_135] : memref<9x4x128xbf16, #tpu.memory_space<vmem>>, vector<1x4x128xbf16>
    %115 = vector.shape_cast %114 : vector<1x4x128xbf16> to vector<4x128xbf16>
    %cst_136 = arith.constant dense<0.000000e+00> : vector<384x128xf32>
    %116 = tpu.matmul %113, %115, %cst_136 {dimension_numbers = #tpu.dot_dimension_numbers<[1], [0], [0], [1], [0, 0, 1, 1], [], []>} : vector<384x4xbf16>, vector<4x128xbf16>, vector<384x128xf32> -> vector<384x128xf32>
    %c0_137 = arith.constant 0 : index
    %c0_138 = arith.constant 0 : index
    %117 = vector.load %arg9[%c0_137, %c0_138] : memref<384x128xf32, #tpu.memory_space<vmem>>, vector<384x128xf32>
    %118 = arith.addf %117, %116 : vector<384x128xf32>
    %c0_139 = arith.constant 0 : index
    %c0_140 = arith.constant 0 : index
    %119 = vector.load %arg9[%c0_139, %c0_140] : memref<384x128xf32, #tpu.memory_space<vmem>>, vector<384x128xf32>
    tpu.vector_store %arg9[%c0_139, %c0_140], %118 {strides = array<i32>} : memref<384x128xf32, #tpu.memory_space<vmem>>, vector<384x128xf32>,
    %c50 = arith.constant 50 : index
    %c0_141 = arith.constant 0 : index
    %120 = vector.load %arg8[%c50, %c0_141] : memref<456x4xbf16, #tpu.memory_space<vmem>>, vector<384x4xbf16>
    %c8_142 = arith.constant 8 : index
    %c0_143 = arith.constant 0 : index
    %c0_144 = arith.constant 0 : index
    %121 = vector.load %arg3[%c8_142, %c0_143, %c0_144] : memref<9x4x128xbf16, #tpu.memory_space<vmem>>, vector<1x4x128xbf16>
    %122 = vector.shape_cast %121 : vector<1x4x128xbf16> to vector<4x128xbf16>
    %cst_145 = arith.constant dense<0.000000e+00> : vector<384x128xf32>
    %123 = tpu.matmul %120, %122, %cst_145 {dimension_numbers = #tpu.dot_dimension_numbers<[1], [0], [0], [1], [0, 0, 1, 1], [], []>} : vector<384x4xbf16>, vector<4x128xbf16>, vector<384x128xf32> -> vector<384x128xf32>
    %c0_146 = arith.constant 0 : index
    %c0_147 = arith.constant 0 : index
    %124 = vector.load %arg9[%c0_146, %c0_147] : memref<384x128xf32, #tpu.memory_space<vmem>>, vector<384x128xf32>
    %125 = arith.addf %124, %123 : vector<384x128xf32>
    %c0_148 = arith.constant 0 : index
    %c0_149 = arith.constant 0 : index
    %126 = vector.load %arg9[%c0_148, %c0_149] : memref<384x128xf32, #tpu.memory_space<vmem>>, vector<384x128xf32>
    tpu.vector_store %arg9[%c0_148, %c0_149], %125 {strides = array<i32>} : memref<384x128xf32, #tpu.memory_space<vmem>>, vector<384x128xf32>,
    %c0_150 = arith.constant 0 : index
    %c0_151 = arith.constant 0 : index
    %127 = vector.load %arg9[%c0_150, %c0_151] : memref<384x128xf32, #tpu.memory_space<vmem>>, vector<384x128xf32>
    %c0_152 = arith.constant 0 : index
    %c0_153 = arith.constant 0 : index
    %128 = vector.load %arg4[%c0_152, %c0_153] : memref<1x128xf32, #tpu.memory_space<vmem>>, vector<1x128xf32>
    %129 = vector.broadcast %128 : vector<1x128xf32> to vector<384x128xf32>
    %130 = arith.addf %127, %129 : vector<384x128xf32>
    %cst_154 = arith.constant 0.000000e+00 : f32
    %131 = vector.broadcast %cst_154 : f32 to vector<384x128xf32>
    %132 = arith.maximumf %130, %131 : vector<384x128xf32>
    %c0_155 = arith.constant 0 : index
    %c0_156 = arith.constant 0 : index
    %133 = vector.load %arg9[%c0_155, %c0_156] : memref<384x128xf32, #tpu.memory_space<vmem>>, vector<384x128xf32>
    tpu.vector_store %arg9[%c0_155, %c0_156], %132 {strides = array<i32>} : memref<384x128xf32, #tpu.memory_space<vmem>>, vector<384x128xf32>,
    %c0_157 = arith.constant 0 : index
    %c0_158 = arith.constant 0 : index
    %134 = vector.load %arg2[%c0_157, %c0_158] : memref<1x384xf32, #tpu.memory_space<vmem>>, vector<1x384xf32>
    %c0_159 = arith.constant 0 : index
    %c0_160 = arith.constant 0 : index
    %135 = vector.load %arg9[%c0_159, %c0_160] : memref<384x128xf32, #tpu.memory_space<vmem>>, vector<384x128xf32>
    %cst_161 = arith.constant dense<0.000000e+00> : vector<1x128xf32>
    %136 = tpu.matmul %134, %135, %cst_161 {dimension_numbers = #tpu.dot_dimension_numbers<[1], [0], [0], [1], [0, 0, 1, 1], [], []>} : vector<1x384xf32>, vector<384x128xf32>, vector<1x128xf32> -> vector<1x128xf32>
    %c0_162 = arith.constant 0 : index
    %c0_163 = arith.constant 0 : index
    %137 = vector.load %arg5[%c0_162, %c0_163] : memref<128x128xf32, #tpu.memory_space<vmem>>, vector<128x128xf32>
    %cst_164 = arith.constant dense<0.000000e+00> : vector<1x128xf32>
    %138 = tpu.matmul %136, %137, %cst_164 {dimension_numbers = #tpu.dot_dimension_numbers<[1], [0], [0], [1], [0, 0, 1, 1], [], []>} : vector<1x128xf32>, vector<128x128xf32>, vector<1x128xf32> -> vector<1x128xf32>
    %c0_165 = arith.constant 0 : index
    %c0_166 = arith.constant 0 : index
    %139 = vector.load %arg6[%c0_165, %c0_166] : memref<1x128xf32, #tpu.memory_space<vmem>>, vector<1x128xf32>
    %140 = arith.addf %138, %139 : vector<1x128xf32>
    %141 = arith.negf %140 : vector<1x128xf32>
    %142 = math.exp %141 : vector<1x128xf32>
    %cst_167 = arith.constant 1.000000e+00 : f32
    %143 = vector.broadcast %cst_167 : f32 to vector<1x128xf32>
    %144 = arith.addf %143, %142 : vector<1x128xf32>
    %145 = arith.divf %143, %144 : vector<1x128xf32>
    %c0_168 = arith.constant 0 : index
    %c0_169 = arith.constant 0 : index
    %146 = vector.load %arg9[%c0_168, %c0_169] : memref<384x128xf32, #tpu.memory_space<vmem>>, vector<16x128xf32>
    %147 = vector.broadcast %145 : vector<1x128xf32> to vector<16x128xf32>
    %148 = arith.mulf %146, %147 : vector<16x128xf32>
    %149 = arith.truncf %148 : vector<16x128xf32> to vector<16x128xbf16>
    %c0_170 = arith.constant 0 : index
    %c0_171 = arith.constant 0 : index
    %c0_172 = arith.constant 0 : index
    %c0_173 = arith.constant 0 : index
    %150 = vector.load %arg7[%c0_170, %c0_171, %c0_172, %c0_173] : memref<1x16x16x128xbf16, #tpu.memory_space<vmem>>, vector<1x1x16x128xbf16>
    %151 = vector.shape_cast %150 : vector<1x1x16x128xbf16> to vector<16x128xbf16>
    %152 = vector.shape_cast %149 : vector<16x128xbf16> to vector<1x1x16x128xbf16>
    tpu.vector_store %arg7[%c0_170, %c0_171, %c0_172, %c0_173], %152 {strides = array<i32>} : memref<1x16x16x128xbf16, #tpu.memory_space<vmem>>, vector<1x1x16x128xbf16>,
    %c24_174 = arith.constant 24 : index
    %c0_175 = arith.constant 0 : index
    %153 = vector.load %arg9[%c24_174, %c0_175] : memref<384x128xf32, #tpu.memory_space<vmem>>, vector<16x128xf32>
    %154 = vector.broadcast %145 : vector<1x128xf32> to vector<16x128xf32>
    %155 = arith.mulf %153, %154 : vector<16x128xf32>
    %156 = arith.truncf %155 : vector<16x128xf32> to vector<16x128xbf16>
    %c0_176 = arith.constant 0 : index
    %c1_177 = arith.constant 1 : index
    %c0_178 = arith.constant 0 : index
    %c0_179 = arith.constant 0 : index
    %157 = vector.load %arg7[%c0_176, %c1_177, %c0_178, %c0_179] : memref<1x16x16x128xbf16, #tpu.memory_space<vmem>>, vector<1x1x16x128xbf16>
    %158 = vector.shape_cast %157 : vector<1x1x16x128xbf16> to vector<16x128xbf16>
    %159 = vector.shape_cast %156 : vector<16x128xbf16> to vector<1x1x16x128xbf16>
    tpu.vector_store %arg7[%c0_176, %c1_177, %c0_178, %c0_179], %159 {strides = array<i32>} : memref<1x16x16x128xbf16, #tpu.memory_space<vmem>>, vector<1x1x16x128xbf16>,
    %c48_180 = arith.constant 48 : index
    %c0_181 = arith.constant 0 : index
    %160 = vector.load %arg9[%c48_180, %c0_181] : memref<384x128xf32, #tpu.memory_space<vmem>>, vector<16x128xf32>
    %161 = vector.broadcast %145 : vector<1x128xf32> to vector<16x128xf32>
    %162 = arith.mulf %160, %161 : vector<16x128xf32>
    %163 = arith.truncf %162 : vector<16x128xf32> to vector<16x128xbf16>
    %c0_182 = arith.constant 0 : index
    %c2_183 = arith.constant 2 : index
    %c0_184 = arith.constant 0 : index
    %c0_185 = arith.constant 0 : index
    %164 = vector.load %arg7[%c0_182, %c2_183, %c0_184, %c0_185] : memref<1x16x16x128xbf16, #tpu.memory_space<vmem>>, vector<1x1x16x128xbf16>
    %165 = vector.shape_cast %164 : vector<1x1x16x128xbf16> to vector<16x128xbf16>
    %166 = vector.shape_cast %163 : vector<16x128xbf16> to vector<1x1x16x128xbf16>
    tpu.vector_store %arg7[%c0_182, %c2_183, %c0_184, %c0_185], %166 {strides = array<i32>} : memref<1x16x16x128xbf16, #tpu.memory_space<vmem>>, vector<1x1x16x128xbf16>,
    %c72 = arith.constant 72 : index
    %c0_186 = arith.constant 0 : index
    %167 = vector.load %arg9[%c72, %c0_186] : memref<384x128xf32, #tpu.memory_space<vmem>>, vector<16x128xf32>
    %168 = vector.broadcast %145 : vector<1x128xf32> to vector<16x128xf32>
    %169 = arith.mulf %167, %168 : vector<16x128xf32>
    %170 = arith.truncf %169 : vector<16x128xf32> to vector<16x128xbf16>
    %c0_187 = arith.constant 0 : index
    %c3_188 = arith.constant 3 : index
    %c0_189 = arith.constant 0 : index
    %c0_190 = arith.constant 0 : index
    %171 = vector.load %arg7[%c0_187, %c3_188, %c0_189, %c0_190] : memref<1x16x16x128xbf16, #tpu.memory_space<vmem>>, vector<1x1x16x128xbf16>
    %172 = vector.shape_cast %171 : vector<1x1x16x128xbf16> to vector<16x128xbf16>
    %173 = vector.shape_cast %170 : vector<16x128xbf16> to vector<1x1x16x128xbf16>
    tpu.vector_store %arg7[%c0_187, %c3_188, %c0_189, %c0_190], %173 {strides = array<i32>} : memref<1x16x16x128xbf16, #tpu.memory_space<vmem>>, vector<1x1x16x128xbf16>,
    %c96 = arith.constant 96 : index
    %c0_191 = arith.constant 0 : index
    %174 = vector.load %arg9[%c96, %c0_191] : memref<384x128xf32, #tpu.memory_space<vmem>>, vector<16x128xf32>
    %175 = vector.broadcast %145 : vector<1x128xf32> to vector<16x128xf32>
    %176 = arith.mulf %174, %175 : vector<16x128xf32>
    %177 = arith.truncf %176 : vector<16x128xf32> to vector<16x128xbf16>
    %c0_192 = arith.constant 0 : index
    %c4_193 = arith.constant 4 : index
    %c0_194 = arith.constant 0 : index
    %c0_195 = arith.constant 0 : index
    %178 = vector.load %arg7[%c0_192, %c4_193, %c0_194, %c0_195] : memref<1x16x16x128xbf16, #tpu.memory_space<vmem>>, vector<1x1x16x128xbf16>
    %179 = vector.shape_cast %178 : vector<1x1x16x128xbf16> to vector<16x128xbf16>
    %180 = vector.shape_cast %177 : vector<16x128xbf16> to vector<1x1x16x128xbf16>
    tpu.vector_store %arg7[%c0_192, %c4_193, %c0_194, %c0_195], %180 {strides = array<i32>} : memref<1x16x16x128xbf16, #tpu.memory_space<vmem>>, vector<1x1x16x128xbf16>,
    %c120 = arith.constant 120 : index
    %c0_196 = arith.constant 0 : index
    %181 = vector.load %arg9[%c120, %c0_196] : memref<384x128xf32, #tpu.memory_space<vmem>>, vector<16x128xf32>
    %182 = vector.broadcast %145 : vector<1x128xf32> to vector<16x128xf32>
    %183 = arith.mulf %181, %182 : vector<16x128xf32>
    %184 = arith.truncf %183 : vector<16x128xf32> to vector<16x128xbf16>
    %c0_197 = arith.constant 0 : index
    %c5_198 = arith.constant 5 : index
    %c0_199 = arith.constant 0 : index
    %c0_200 = arith.constant 0 : index
    %185 = vector.load %arg7[%c0_197, %c5_198, %c0_199, %c0_200] : memref<1x16x16x128xbf16, #tpu.memory_space<vmem>>, vector<1x1x16x128xbf16>
    %186 = vector.shape_cast %185 : vector<1x1x16x128xbf16> to vector<16x128xbf16>
    %187 = vector.shape_cast %184 : vector<16x128xbf16> to vector<1x1x16x128xbf16>
    tpu.vector_store %arg7[%c0_197, %c5_198, %c0_199, %c0_200], %187 {strides = array<i32>} : memref<1x16x16x128xbf16, #tpu.memory_space<vmem>>, vector<1x1x16x128xbf16>,
    %c144 = arith.constant 144 : index
    %c0_201 = arith.constant 0 : index
    %188 = vector.load %arg9[%c144, %c0_201] : memref<384x128xf32, #tpu.memory_space<vmem>>, vector<16x128xf32>
    %189 = vector.broadcast %145 : vector<1x128xf32> to vector<16x128xf32>
    %190 = arith.mulf %188, %189 : vector<16x128xf32>
    %191 = arith.truncf %190 : vector<16x128xf32> to vector<16x128xbf16>
    %c0_202 = arith.constant 0 : index
    %c6_203 = arith.constant 6 : index
    %c0_204 = arith.constant 0 : index
    %c0_205 = arith.constant 0 : index
    %192 = vector.load %arg7[%c0_202, %c6_203, %c0_204, %c0_205] : memref<1x16x16x128xbf16, #tpu.memory_space<vmem>>, vector<1x1x16x128xbf16>
    %193 = vector.shape_cast %192 : vector<1x1x16x128xbf16> to vector<16x128xbf16>
    %194 = vector.shape_cast %191 : vector<16x128xbf16> to vector<1x1x16x128xbf16>
    tpu.vector_store %arg7[%c0_202, %c6_203, %c0_204, %c0_205], %194 {strides = array<i32>} : memref<1x16x16x128xbf16, #tpu.memory_space<vmem>>, vector<1x1x16x128xbf16>,
    %c168 = arith.constant 168 : index
    %c0_206 = arith.constant 0 : index
    %195 = vector.load %arg9[%c168, %c0_206] : memref<384x128xf32, #tpu.memory_space<vmem>>, vector<16x128xf32>
    %196 = vector.broadcast %145 : vector<1x128xf32> to vector<16x128xf32>
    %197 = arith.mulf %195, %196 : vector<16x128xf32>
    %198 = arith.truncf %197 : vector<16x128xf32> to vector<16x128xbf16>
    %c0_207 = arith.constant 0 : index
    %c7_208 = arith.constant 7 : index
    %c0_209 = arith.constant 0 : index
    %c0_210 = arith.constant 0 : index
    %199 = vector.load %arg7[%c0_207, %c7_208, %c0_209, %c0_210] : memref<1x16x16x128xbf16, #tpu.memory_space<vmem>>, vector<1x1x16x128xbf16>
    %200 = vector.shape_cast %199 : vector<1x1x16x128xbf16> to vector<16x128xbf16>
    %201 = vector.shape_cast %198 : vector<16x128xbf16> to vector<1x1x16x128xbf16>
    tpu.vector_store %arg7[%c0_207, %c7_208, %c0_209, %c0_210], %201 {strides = array<i32>} : memref<1x16x16x128xbf16, #tpu.memory_space<vmem>>, vector<1x1x16x128xbf16>,
    %c192 = arith.constant 192 : index
    %c0_211 = arith.constant 0 : index
    %202 = vector.load %arg9[%c192, %c0_211] : memref<384x128xf32, #tpu.memory_space<vmem>>, vector<16x128xf32>
    %203 = vector.broadcast %145 : vector<1x128xf32> to vector<16x128xf32>
    %204 = arith.mulf %202, %203 : vector<16x128xf32>
    %205 = arith.truncf %204 : vector<16x128xf32> to vector<16x128xbf16>
    %c0_212 = arith.constant 0 : index
    %c8_213 = arith.constant 8 : index
    %c0_214 = arith.constant 0 : index
    %c0_215 = arith.constant 0 : index
    %206 = vector.load %arg7[%c0_212, %c8_213, %c0_214, %c0_215] : memref<1x16x16x128xbf16, #tpu.memory_space<vmem>>, vector<1x1x16x128xbf16>
    %207 = vector.shape_cast %206 : vector<1x1x16x128xbf16> to vector<16x128xbf16>
    %208 = vector.shape_cast %205 : vector<16x128xbf16> to vector<1x1x16x128xbf16>
    tpu.vector_store %arg7[%c0_212, %c8_213, %c0_214, %c0_215], %208 {strides = array<i32>} : memref<1x16x16x128xbf16, #tpu.memory_space<vmem>>, vector<1x1x16x128xbf16>,
    %c216 = arith.constant 216 : index
    %c0_216 = arith.constant 0 : index
    %209 = vector.load %arg9[%c216, %c0_216] : memref<384x128xf32, #tpu.memory_space<vmem>>, vector<16x128xf32>
    %210 = vector.broadcast %145 : vector<1x128xf32> to vector<16x128xf32>
    %211 = arith.mulf %209, %210 : vector<16x128xf32>
    %212 = arith.truncf %211 : vector<16x128xf32> to vector<16x128xbf16>
    %c0_217 = arith.constant 0 : index
    %c9_218 = arith.constant 9 : index
    %c0_219 = arith.constant 0 : index
    %c0_220 = arith.constant 0 : index
    %213 = vector.load %arg7[%c0_217, %c9_218, %c0_219, %c0_220] : memref<1x16x16x128xbf16, #tpu.memory_space<vmem>>, vector<1x1x16x128xbf16>
    %214 = vector.shape_cast %213 : vector<1x1x16x128xbf16> to vector<16x128xbf16>
    %215 = vector.shape_cast %212 : vector<16x128xbf16> to vector<1x1x16x128xbf16>
    tpu.vector_store %arg7[%c0_217, %c9_218, %c0_219, %c0_220], %215 {strides = array<i32>} : memref<1x16x16x128xbf16, #tpu.memory_space<vmem>>, vector<1x1x16x128xbf16>,
    %c240 = arith.constant 240 : index
    %c0_221 = arith.constant 0 : index
    %216 = vector.load %arg9[%c240, %c0_221] : memref<384x128xf32, #tpu.memory_space<vmem>>, vector<16x128xf32>
    %217 = vector.broadcast %145 : vector<1x128xf32> to vector<16x128xf32>
    %218 = arith.mulf %216, %217 : vector<16x128xf32>
    %219 = arith.truncf %218 : vector<16x128xf32> to vector<16x128xbf16>
    %c0_222 = arith.constant 0 : index
    %c10_223 = arith.constant 10 : index
    %c0_224 = arith.constant 0 : index
    %c0_225 = arith.constant 0 : index
    %220 = vector.load %arg7[%c0_222, %c10_223, %c0_224, %c0_225] : memref<1x16x16x128xbf16, #tpu.memory_space<vmem>>, vector<1x1x16x128xbf16>
    %221 = vector.shape_cast %220 : vector<1x1x16x128xbf16> to vector<16x128xbf16>
    %222 = vector.shape_cast %219 : vector<16x128xbf16> to vector<1x1x16x128xbf16>
    tpu.vector_store %arg7[%c0_222, %c10_223, %c0_224, %c0_225], %222 {strides = array<i32>} : memref<1x16x16x128xbf16, #tpu.memory_space<vmem>>, vector<1x1x16x128xbf16>,
    %c264 = arith.constant 264 : index
    %c0_226 = arith.constant 0 : index
    %223 = vector.load %arg9[%c264, %c0_226] : memref<384x128xf32, #tpu.memory_space<vmem>>, vector<16x128xf32>
    %224 = vector.broadcast %145 : vector<1x128xf32> to vector<16x128xf32>
    %225 = arith.mulf %223, %224 : vector<16x128xf32>
    %226 = arith.truncf %225 : vector<16x128xf32> to vector<16x128xbf16>
    %c0_227 = arith.constant 0 : index
    %c11_228 = arith.constant 11 : index
    %c0_229 = arith.constant 0 : index
    %c0_230 = arith.constant 0 : index
    %227 = vector.load %arg7[%c0_227, %c11_228, %c0_229, %c0_230] : memref<1x16x16x128xbf16, #tpu.memory_space<vmem>>, vector<1x1x16x128xbf16>
    %228 = vector.shape_cast %227 : vector<1x1x16x128xbf16> to vector<16x128xbf16>
    %229 = vector.shape_cast %226 : vector<16x128xbf16> to vector<1x1x16x128xbf16>
    tpu.vector_store %arg7[%c0_227, %c11_228, %c0_229, %c0_230], %229 {strides = array<i32>} : memref<1x16x16x128xbf16, #tpu.memory_space<vmem>>, vector<1x1x16x128xbf16>,
    %c288 = arith.constant 288 : index
    %c0_231 = arith.constant 0 : index
    %230 = vector.load %arg9[%c288, %c0_231] : memref<384x128xf32, #tpu.memory_space<vmem>>, vector<16x128xf32>
    %231 = vector.broadcast %145 : vector<1x128xf32> to vector<16x128xf32>
    %232 = arith.mulf %230, %231 : vector<16x128xf32>
    %233 = arith.truncf %232 : vector<16x128xf32> to vector<16x128xbf16>
    %c0_232 = arith.constant 0 : index
    %c12_233 = arith.constant 12 : index
    %c0_234 = arith.constant 0 : index
    %c0_235 = arith.constant 0 : index
    %234 = vector.load %arg7[%c0_232, %c12_233, %c0_234, %c0_235] : memref<1x16x16x128xbf16, #tpu.memory_space<vmem>>, vector<1x1x16x128xbf16>
    %235 = vector.shape_cast %234 : vector<1x1x16x128xbf16> to vector<16x128xbf16>
    %236 = vector.shape_cast %233 : vector<16x128xbf16> to vector<1x1x16x128xbf16>
    tpu.vector_store %arg7[%c0_232, %c12_233, %c0_234, %c0_235], %236 {strides = array<i32>} : memref<1x16x16x128xbf16, #tpu.memory_space<vmem>>, vector<1x1x16x128xbf16>,
    %c312 = arith.constant 312 : index
    %c0_236 = arith.constant 0 : index
    %237 = vector.load %arg9[%c312, %c0_236] : memref<384x128xf32, #tpu.memory_space<vmem>>, vector<16x128xf32>
    %238 = vector.broadcast %145 : vector<1x128xf32> to vector<16x128xf32>
    %239 = arith.mulf %237, %238 : vector<16x128xf32>
    %240 = arith.truncf %239 : vector<16x128xf32> to vector<16x128xbf16>
    %c0_237 = arith.constant 0 : index
    %c13_238 = arith.constant 13 : index
    %c0_239 = arith.constant 0 : index
    %c0_240 = arith.constant 0 : index
    %241 = vector.load %arg7[%c0_237, %c13_238, %c0_239, %c0_240] : memref<1x16x16x128xbf16, #tpu.memory_space<vmem>>, vector<1x1x16x128xbf16>
    %242 = vector.shape_cast %241 : vector<1x1x16x128xbf16> to vector<16x128xbf16>
    %243 = vector.shape_cast %240 : vector<16x128xbf16> to vector<1x1x16x128xbf16>
    tpu.vector_store %arg7[%c0_237, %c13_238, %c0_239, %c0_240], %243 {strides = array<i32>} : memref<1x16x16x128xbf16, #tpu.memory_space<vmem>>, vector<1x1x16x128xbf16>,
    %c336 = arith.constant 336 : index
    %c0_241 = arith.constant 0 : index
    %244 = vector.load %arg9[%c336, %c0_241] : memref<384x128xf32, #tpu.memory_space<vmem>>, vector<16x128xf32>
    %245 = vector.broadcast %145 : vector<1x128xf32> to vector<16x128xf32>
    %246 = arith.mulf %244, %245 : vector<16x128xf32>
    %247 = arith.truncf %246 : vector<16x128xf32> to vector<16x128xbf16>
    %c0_242 = arith.constant 0 : index
    %c14_243 = arith.constant 14 : index
    %c0_244 = arith.constant 0 : index
    %c0_245 = arith.constant 0 : index
    %248 = vector.load %arg7[%c0_242, %c14_243, %c0_244, %c0_245] : memref<1x16x16x128xbf16, #tpu.memory_space<vmem>>, vector<1x1x16x128xbf16>
    %249 = vector.shape_cast %248 : vector<1x1x16x128xbf16> to vector<16x128xbf16>
    %250 = vector.shape_cast %247 : vector<16x128xbf16> to vector<1x1x16x128xbf16>
    tpu.vector_store %arg7[%c0_242, %c14_243, %c0_244, %c0_245], %250 {strides = array<i32>} : memref<1x16x16x128xbf16, #tpu.memory_space<vmem>>, vector<1x1x16x128xbf16>,
    %c360 = arith.constant 360 : index
    %c0_246 = arith.constant 0 : index
    %251 = vector.load %arg9[%c360, %c0_246] : memref<384x128xf32, #tpu.memory_space<vmem>>, vector<16x128xf32>
    %252 = vector.broadcast %145 : vector<1x128xf32> to vector<16x128xf32>
    %253 = arith.mulf %251, %252 : vector<16x128xf32>
    %254 = arith.truncf %253 : vector<16x128xf32> to vector<16x128xbf16>
    %c0_247 = arith.constant 0 : index
    %c15_248 = arith.constant 15 : index
    %c0_249 = arith.constant 0 : index
    %c0_250 = arith.constant 0 : index
    %255 = vector.load %arg7[%c0_247, %c15_248, %c0_249, %c0_250] : memref<1x16x16x128xbf16, #tpu.memory_space<vmem>>, vector<1x1x16x128xbf16>
    %256 = vector.shape_cast %255 : vector<1x1x16x128xbf16> to vector<16x128xbf16>
    %257 = vector.shape_cast %254 : vector<16x128xbf16> to vector<1x1x16x128xbf16>
    tpu.vector_store %arg7[%c0_247, %c15_248, %c0_249, %c0_250], %257 {strides = array<i32>} : memref<1x16x16x128xbf16, #tpu.memory_space<vmem>>, vector<1x1x16x128xbf16>,
    return
  }
  func.func @transform_0(%arg0: i32) -> (i32, i32, i32, i32) {
    %c0_i32 = arith.constant 0 : i32
    %c0_i32_0 = arith.constant 0 : i32
    %c0_i32_1 = arith.constant 0 : i32
    %c0_i32_2 = arith.constant 0 : i32
    return %arg0, %c0_i32, %c0_i32_0, %c0_i32_1 : i32, i32, i32, i32
  }
  func.func @transform_1(%arg0: i32) -> (i32, i32) {
    %c0_i32 = arith.constant 0 : i32
    %c0_i32_0 = arith.constant 0 : i32
    %c0_i32_1 = arith.constant 0 : i32
    return %c0_i32, %c0_i32_0 : i32, i32
  }
  func.func @transform_2(%arg0: i32) -> (i32, i32, i32) {
    %c0_i32 = arith.constant 0 : i32
    %c0_i32_0 = arith.constant 0 : i32
    %c0_i32_1 = arith.constant 0 : i32
    %c0_i32_2 = arith.constant 0 : i32
    return %c0_i32, %c0_i32_0, %c0_i32_1 : i32, i32, i32
  }
  func.func @transform_3(%arg0: i32) -> (i32, i32) {
    %c0_i32 = arith.constant 0 : i32
    %c0_i32_0 = arith.constant 0 : i32
    %c0_i32_1 = arith.constant 0 : i32
    return %c0_i32, %c0_i32_0 : i32, i32
  }
  func.func @transform_4(%arg0: i32) -> (i32, i32) {
    %c0_i32 = arith.constant 0 : i32
    %c0_i32_0 = arith.constant 0 : i32
    %c0_i32_1 = arith.constant 0 : i32
    return %c0_i32, %c0_i32_0 : i32, i32
  }
  func.func @transform_5(%arg0: i32) -> (i32, i32) {
    %c0_i32 = arith.constant 0 : i32
    %c0_i32_0 = arith.constant 0 : i32
    %c0_i32_1 = arith.constant 0 : i32
    return %c0_i32, %c0_i32_0 : i32, i32
  }
  func.func @transform_6(%arg0: i32) -> (i32, i32, i32, i32) {
    %c0_i32 = arith.constant 0 : i32
    %c0_i32_0 = arith.constant 0 : i32
    %c0_i32_1 = arith.constant 0 : i32
    %c0_i32_2 = arith.constant 0 : i32
    return %arg0, %c0_i32, %c0_i32_0, %c0_i32_1 : i32, i32, i32, i32
  }
}

</mosaic_0001>

<bundles_post_ra>
// kernel: tpu_custom_call.1
= control target key start
LH: loop header
LB: loop body
LE: loop exit
PB: predicated region body
PF: predicated region fallthrough
CT: control target
= control target key end

     0   :  { %11 = vsyncpa [#allocation5], 0  ;;  %s11660_s0 = inlined_call_operand.vmem [shape: f32[2,16,16,4], index: 0, kind: input, shape index: {}]   ;;  %s11661_s1 = inlined_call_operand.vmem [shape: f32[1,384], index: 1, kind: input, shape index: {}]   ;;  %s11662_s2 = inlined_call_operand.vmem [shape: bf16[9,4,128], index: 2, kind: input, shape index: {}]   ;;  %s11663_s3 = inlined_call_operand.vmem [shape: f32[1,128], index: 3, kind: input, shape index: {}]   ;;  %s11664_s4 = inlined_call_operand.vmem [shape: f32[128,128], index: 4, kind: input, shape index: {}]   ;;  %s11665_s5 = inlined_call_operand.vmem [shape: f32[1,128], index: 5, kind: input, shape index: {}]   ;;  %s11666_s6 = inlined_call_operand.hbm [shape: bf16[2,16,16,128], index: 6, kind: output, shape index: {}]  }
   0x1   :  { %13 = vsyncpa [#allocation5 + $0x1], 0  ;;  %s10309_s21 = smov 0   ;;  %s10311_s22 = smov 0  }
   0x2   :  { %s10313_s23 = smov 0   ;;  %s10315_s24 = smov 0  }
   0x3 LB: > { %s10330_s25 = sadd.s32 4294967295, %s10265_s24   ;;  %s7900_s26 = sadd.s32 4294967294, %s10265_s24   ;;  %s10265_s24 = sphi %s10315_s24, %s11718_s24   ;;  %s10261_s23 = sphi %s10313_s23, %s11717_s23   ;;  %s10257_s22 = sphi %s10311_s22, %s11716_s22   ;;  %s10253_s21 = sphi %s10309_s21, %s11715_s21  }
   0x4   : > { %s10334_s27 = sadd.s32 1, %s10265_s24   ;;  %s157_s28 = sadd.s32 1, %s10261_s23 }
   0x5   : > { %s154_s29 = ssub.s32 %s10265_s24, %s10334_s27  ;;  %p167_p0 = scmp.ne.s32.totalorder %s10261_s23, %s10257_s22 }
   0x6   : > { %p155_p1 = scmp.eq.s32.totalorder %s154_s29, 0  ;;  %p168_p2 = scmp.eq.s32.totalorder %s10330_s25, 1 }
   0x7   : > { %p173_p3 = scmp.ne.s32.totalorder %s10257_s22, %s10253_s21  ;;  %p174_p4 = scmp.eq.s32.totalorder %s7900_s26, 1 }
   0x8   : > { %s10345_s30 = scalar_select %p155_p1, %s10261_s23, %s157_s28  }
   0x9   : > { %p10347_p5 = por %p168_p2, %p167_p0  ;;  %p10351_p6 = por %p174_p4, %p173_p3 }
   0xa   : > { %p7903_p7 = scmp.ge.s32.totalorder %s10265_s24, 1  ;;  %p215_p8 = scmp.lt.s32.totalorder %s10265_s24, 3 }
   0xc   : > { %p216_p9 = pnand %p7903_p7, %p215_p8 }
   0xe   : > { %219 = sbr.rel (%p216_p9) target bundleno = 1262 (0x4ee), region = 44 }
  0x15   : > { %v940_v0 = vld [vmem:[%s11662_s2] sm:$0x3]  ;;  %vm1134_vm0 = vcmask 1041408   ;;  %vm251_vm1 = vcmask 27648   ;;  %v10267_v2 = vmov 0   ;;  %p245_p10 = scmp.lt.s32.totalorder %s10330_s25, 1 }
  0x16   : > { %9923 = vmatprep.subr.msk.bf16.mxu1 %vm1134_vm0, %v940_v0  ;;  %v1136_v1 = vsel %vm1134_vm0, %v940_v0, 0  ;;  %252 = vst.msk [vmem:[#allocation2] sm:$0xf] %vm251_vm1, %v10267_v2  ;;  %253 = vst.msk [vmem:[#allocation2 + $0x4] sm:$0xf] %vm251_vm1, %v10267_v2  ;;  %vm1061_vm3 = vcmask 31744  }
  0x17   : > { %254 = vst.msk [vmem:[#allocation2 + $0x8] sm:$0xf] %vm251_vm1, %v10267_v2  ;;  %255 = vst.msk [vmem:[#allocation2 + $0xc] sm:$0xf] %vm251_vm1, %v10267_v2  ;;  %v8166_v3 = vld [vmem:[%s11662_s2 + $0x8] sm:$0x3]  ;;  %8940 = vmatpush3.bf16.msra.mxu1 %v1136_v1 }
  0x18   : > { %256 = vst.msk [vmem:[#allocation2 + $0x10] sm:$0xf] %vm251_vm1, %v10267_v2  ;;  %257 = vst.msk [vmem:[#allocation2 + $0x14] sm:$0xf] %vm251_vm1, %v10267_v2  ;;  %9927 = vmatprep.subr.msk.bf16.mxu0 %vm1134_vm0, %v8166_v3  ;;  %v3951_v4 = vsel %vm1134_vm0, %v8166_v3, 0  ;;  %s246_s13 = scalar_select %p245_p10, %s10330_s25, 1 }
  0x19   : > { %258 = vst.msk [vmem:[#allocation2 + $0x18] sm:$0xf] %vm251_vm1, %v10267_v2  ;;  %259 = vst.msk [vmem:[#allocation2 + $0x1c] sm:$0xf] %vm251_vm1, %v10267_v2  ;;  %9140 = vmatpush3.bf16.msra.mxu0 %v3951_v4  ;;  %v10427_v5 = vld [vmem:[%s11662_s2 + $0xa] sm:$0x3] }
  0x1a   : > { %260 = vst.msk [vmem:[#allocation2 + $0x20] sm:$0xf] %vm251_vm1, %v10267_v2  ;;  %261 = vst.msk [vmem:[#allocation2 + $0x24] sm:$0xf] %vm251_vm1, %v10267_v2  ;;  %9928 = vmatprep.subr.msk.bf16.mxu0 %vm1134_vm0, %v10427_v5  ;;  %v8017_v6 = vld [vmem:[%s11662_s2 + $0x2] sm:$0x3] }
  0x1b   : > { %262 = vst.msk [vmem:[#allocation2 + $0x28] sm:$0xf] %vm251_vm1, %v10267_v2  ;;  %263 = vst.msk [vmem:[#allocation2 + $0x2c] sm:$0xf] %vm251_vm1, %v10267_v2  ;;  %s8484_s18 = sshll.u32 %s246_s13, 8  ;;  %9924 = vmatprep.subr.msk.bf16.mxu1 %vm1134_vm0, %v8017_v6  ;;  %vm347_vm6 = vcmask 24576  }
  0x1c   : > { %264 = vst.msk [vmem:[#allocation2 + $0x30] sm:$0xf] %vm251_vm1, %v10267_v2  ;;  %265 = vst.msk [vmem:[#allocation2 + $0x34] sm:$0xf] %vm251_vm1, %v10267_v2  ;;  %s10438_s26 = scalar_lea.vmem %s11660_s0, %s8484_s18  ;;  %vm341_vm2 = vsmask.f32 7938 }
  0x1d   : > { %266 = vst.msk [vmem:[#allocation2 + $0x38] sm:$0xf] %vm251_vm1, %v10267_v2  ;;  %267 = vst.msk [vmem:[#allocation2 + $0x3c] sm:$0xf] %vm251_vm1, %v10267_v2  ;;  %v309_v7 = vld [vmem:[%s10438_s26] sm:$0xff]  ;;  %v310_v8 = vld [vmem:[%s10438_s26 + $0x8] sm:$0xff] }
  0x1e   : > { %268 = vst.msk [vmem:[#allocation2 + $0x40] sm:$0xf] %vm251_vm1, %v10267_v2  ;;  %269 = vst.msk [vmem:[#allocation2 + $0x44] sm:$0xf] %vm251_vm1, %v10267_v2  ;;  %vm317_vm4 = vsmask.f32 256  ;;  %v8485_v11 = vpack.c.bf16 %v309_v7, %v309_v7  ;;  %v8486_v12 = vpack.c.bf16 %v310_v8, %v310_v8 }
  0x1f   : > { %270 = vst.msk [vmem:[#allocation2 + $0x48] sm:$0xf] %vm251_vm1, %v10267_v2  ;;  %271 = vst.msk [vmem:[#allocation2 + $0x4c] sm:$0xf] %vm251_vm1, %v10267_v2  ;;  %v7909_v9 = vld [vmem:[%s10438_s26 + $0x10] sm:$0xff]  ;;  %v9977_v10 = vld [vmem:[#allocation2] sm:$0xff]  }
  0x20   : > { %272 = vst.msk [vmem:[#allocation2 + $0x50] sm:$0xf] %vm251_vm1, %v10267_v2  ;;  %273 = vst.msk [vmem:[#allocation2 + $0x54] sm:$0xf] %vm251_vm1, %v10267_v2  ;;  %v8487_v13 = vpack.c.bf16 %v7909_v9, %v7909_v9  ;;  %vm318_vm5 = vsmask.f32 4368  ;;  %8941 = vmatprep.mubr.msk.bf16.mxu1 %vm1061_vm3, %v9977_v10 }
  0x21   : > { %274 = vst.msk [vmem:[#allocation2 + $0x58] sm:$0xf] %vm251_vm1, %v10267_v2  ;;  %275 = vst.msk [vmem:[#allocation2 + $0x5c] sm:$0xf] %vm251_vm1, %v10267_v2  ;;  %v321_v14 = vshrl.u32 %v8485_v11, 16  ;;  %v324_v15 = vshll.u32 %v8485_v11, 16 }
  0x22   : > { %276 = vst.msk [vmem:[#allocation2 + $0x60] sm:$0xf] %vm251_vm1, %v10267_v2  ;;  %277 = vst.msk [vmem:[#allocation2 + $0x64] sm:$0xf] %vm251_vm1, %v10267_v2  ;;  %v329_v16 = vshrl.u32 %v8486_v12, 16  ;;  %v332_v17 = vshll.u32 %v8486_v12, 16 }
  0x23   : > { %278 = vst.msk [vmem:[#allocation2 + $0x68] sm:$0xf] %vm251_vm1, %v10267_v2  ;;  %279 = vst.msk [vmem:[#allocation2 + $0x6c] sm:$0xf] %vm251_vm1, %v10267_v2  ;;  %v362_v19 = vshrl.u32 %v8487_v13, 16  ;;  %v365_v20 = vshll.u32 %v8487_v13, 16 }
  0x24   : > { %280 = vst.msk [vmem:[#allocation2 + $0x70] sm:$0xf] %vm251_vm1, %v10267_v2  ;;  %281 = vst.msk [vmem:[#allocation2 + $0x74] sm:$0xf] %vm251_vm1, %v10267_v2  ;;  %v7910_v21 = vld [vmem:[%s10438_s26 + $0x18] sm:$0xff]  ;;  %v7913_v22 = vld [vmem:[%s10438_s26 + $0x20] sm:$0xff] }
  0x25   : > { %282 = vst.msk [vmem:[#allocation2 + $0x78] sm:$0xf] %vm251_vm1, %v10267_v2  ;;  %283 = vst.msk [vmem:[#allocation2 + $0x7c] sm:$0xf] %vm251_vm1, %v10267_v2  ;;  %v323_v23 = vrot.slane %v321_v14, 7  ;;  %v331_v25 = vrot.slane %v329_v16, 7  ;;  %v8488_v26 = vpack.c.bf16 %v7910_v21, %v7910_v21  ;;  %v8489_v27 = vpack.c.bf16 %v7913_v22, %v7913_v22 }
  0x26   : > { %284 = vst.msk [vmem:[#allocation2 + $0x80] sm:$0xf] %vm251_vm1, %v10267_v2  ;;  %285 = vst.msk [vmem:[#allocation2 + $0x84] sm:$0xf] %vm251_vm1, %v10267_v2  ;;  %v7914_v28 = vld [vmem:[%s10438_s26 + $0x28] sm:$0xff]  ;;  %v7917_v29 = vld [vmem:[%s10438_s26 + $0x30] sm:$0xff] }
  0x27   : > { %286 = vst.msk [vmem:[#allocation2 + $0x88] sm:$0xf] %vm251_vm1, %v10267_v2  ;;  %287 = vst.msk [vmem:[#allocation2 + $0x8c] sm:$0xf] %vm251_vm1, %v10267_v2  ;;  %v343_v30 = vld [vmem:[#allocation2 + $0xc] sm:$0xf]  ;;  %v8490_v34 = vpack.c.bf16 %v7914_v28, %v7914_v28  ;;  %v8491_v35 = vpack.c.bf16 %v7917_v29, %v7917_v29  ;;  %v326_v37 = vor.u32 %v324_v15, %v323_v23 }
  0x28   : > { %288 = vst.msk [vmem:[#allocation2 + $0x90] sm:$0xf] %vm251_vm1, %v10267_v2  ;;  %289 = vst.msk [vmem:[#allocation2 + $0x94] sm:$0xf] %vm251_vm1, %v10267_v2  ;;  %v349_v32 = vld [vmem:[#allocation2 + $0x14] sm:$0x1]  ;;  %v334_v39 = vor.u32 %v332_v17, %v331_v25 }
  0x29   : > { %290 = vst.msk [vmem:[#allocation2 + $0x98] sm:$0xf] %vm251_vm1, %v10267_v2  ;;  %291 = vst.msk [vmem:[#allocation2 + $0x9c] sm:$0xf] %vm251_vm1, %v10267_v2  ;;  %v364_v33 = vrot.slane %v362_v19, 7  ;;  %v10466_v36 = vsel %vm1134_vm0, %v8017_v6, 0 }
  0x2a   : > { %292 = vst.msk [vmem:[#allocation2 + $0xa0] sm:$0xf] %vm251_vm1, %v10267_v2  ;;  %293 = vst.msk [vmem:[#allocation2 + $0xa4] sm:$0xf] %vm251_vm1, %v10267_v2  ;;  %v327_v38 = vrot.slane %v323_v23, 4  ;;  %v336_v40 = vrot.slane %v331_v25, 4 }
  0x2b   : > { %294 = vst.msk [vmem:[#allocation2 + $0xa8] sm:$0xf] %vm251_vm1, %v10267_v2  ;;  %295 = vst.msk [vmem:[#allocation2 + $0xac] sm:$0xf] %vm251_vm1, %v10267_v2  ;;  %v381_v41 = vld [vmem:[#allocation2 + $0x18] sm:$0xf]  ;;  %v367_v42 = vor.u32 %v365_v20, %v364_v33 }
  0x2c   : > { %296 = vst.msk [vmem:[#allocation2 + $0xb0] sm:$0xf] %vm251_vm1, %v10267_v2  ;;  %297 = vst.msk [vmem:[#allocation2 + $0xb4] sm:$0xf] %vm251_vm1, %v10267_v2  ;;  %v368_v43 = vrot.slane %v364_v33, 4  ;;  %v370_v44 = vshrl.u32 %v8488_v26, 16 }
  0x2d   : > { %298 = vst.msk [vmem:[#allocation2 + $0xb8] sm:$0xf] %vm251_vm1, %v10267_v2  ;;  %299 = vst.msk [vmem:[#allocation2 + $0xbc] sm:$0xf] %vm251_vm1, %v10267_v2  ;;  %v373_v45 = vshll.u32 %v8488_v26, 16  ;;  %v398_v49 = vshrl.u32 %v8489_v27, 16 }
  0x2e   : > { %300 = vst.msk [vmem:[#allocation2 + $0xc0] sm:$0xf] %vm251_vm1, %v10267_v2  ;;  %301 = vst.msk [vmem:[#allocation2 + $0xc4] sm:$0xf] %vm251_vm1, %v10267_v2  ;;  %v7918_v50 = vld [vmem:[%s10438_s26 + $0x38] sm:$0xff]  ;;  %v372_v52 = vrot.slane %v370_v44, 7 }
  0x2f   : > { %302 = vst.msk [vmem:[#allocation2 + $0xc8] sm:$0xf] %vm251_vm1, %v10267_v2  ;;  %303 = vst.msk [vmem:[#allocation2 + $0xcc] sm:$0xf] %vm251_vm1, %v10267_v2  ;;  %v401_v53 = vshll.u32 %v8489_v27, 16  ;;  %v406_v54 = vshrl.u32 %v8490_v34, 16  ;;  %v8492_v1 = vpack.c.bf16 %v7918_v50, %v7918_v50 }
  0x30   : > { %304 = vst.msk [vmem:[#allocation2 + $0xd0] sm:$0xf] %vm251_vm1, %v10267_v2  ;;  %305 = vst.msk [vmem:[#allocation2 + $0xd4] sm:$0xf] %vm251_vm1, %v10267_v2  ;;  %v7921_v55 = vld [vmem:[%s10438_s26 + $0x40] sm:$0xff]  ;;  %v400_v57 = vrot.slane %v398_v49, 7  ;;  %v375_v61 = vor.u32 %v373_v45, %v372_v52 }
  0x31   : > { %306 = vst.msk [vmem:[#allocation2 + $0xd8] sm:$0xf] %vm251_vm1, %v10267_v2  ;;  %vm10446_vm7 = vmand %vm251_vm1, %vm341_vm2  ;;  %v385_v56 = vld [vmem:[#allocation2 + $0x20] sm:$0x1]  ;;  %v409_v58 = vshll.u32 %v8490_v34, 16  ;;  %v434_v59 = vshrl.u32 %v8491_v35, 16  ;;  %v8493_v7 = vpack.c.bf16 %v7921_v55, %v7921_v55 }
  0x32   : > { %vm10453_vm8 = vmor %vm317_vm4, %vm318_vm5  ;;  %v344_v46 = vsel %vm10446_vm7, %v326_v37, %v343_v30  ;;  %v382_v51 = vsel %vm10446_vm7, %v367_v42, %v381_v41  ;;  %v437_v60 = vshll.u32 %v8491_v35, 16  ;;  %v377_v62 = vrot.slane %v372_v52, 4  ;;  %v417_v63 = vld [vmem:[#allocation2 + $0x24] sm:$0xf]  ;;  %v421_v4 = vld [vmem:[#allocation2 + $0x2c] sm:$0x1] }
  0x33   : > { %vm10461_vm9 = vmand %vm347_vm6, %vm317_vm4  ;;  %v335_v47 = vsel %vm10453_vm8, %v327_v38, %v334_v39  ;;  %345 = vst [vmem:[#allocation2 + $0xc] sm:$0xf] %v344_v46  ;;  %v408_v0 = vrot.slane %v406_v54, 7  ;;  %v403_v2 = vor.u32 %v401_v53, %v400_v57  ;;  %v404_v3 = vrot.slane %v400_v57, 4  ;;  %v453_v12 = vld [vmem:[#allocation2 + $0x30] sm:$0xf] }
  0x34   : > { %v350_v48 = vsel %vm10461_vm9, %v336_v40, %v349_v32  ;;  %346 = vst.msk [vmem:[#allocation2 + $0x10] sm:$0xf] %vm251_vm1, %v335_v47  ;;  %383 = vst [vmem:[#allocation2 + $0x18] sm:$0xf] %v382_v51  ;;  %v436_v6 = vrot.slane %v434_v59, 7  ;;  %v376_v8 = vsel %vm10453_vm8, %v368_v43, %v375_v61  ;;  %v386_v9 = vsel %vm10461_vm9, %v377_v62, %v385_v56  ;;  %v7922_v13 = vld [vmem:[%s10438_s26 + $0x48] sm:$0xff] }
  0x35   : > { %351 = vst [vmem:[#allocation2 + $0x14] sm:$0x1] %v350_v48  ;;  %v411_v10 = vor.u32 %v409_v58, %v408_v0  ;;  %v413_v11 = vrot.slane %v408_v0, 4  ;;  %384 = vst.msk [vmem:[#allocation2 + $0x1c] sm:$0xf] %vm251_vm1, %v376_v8  ;;  %v418_v14 = vsel %vm10446_vm7, %v403_v2, %v417_v63  ;;  %v442_v17 = vshrl.u32 %v8492_v1, 16 }
  0x36   : > { %387 = vst [vmem:[#allocation2 + $0x20] sm:$0x1] %v386_v9  ;;  %v439_v15 = vor.u32 %v437_v60, %v436_v6  ;;  %v440_v16 = vrot.slane %v436_v6, 4  ;;  %419 = vst [vmem:[#allocation2 + $0x24] sm:$0xf] %v418_v14  ;;  %v445_v21 = vshll.u32 %v8492_v1, 16  ;;  %v8494_v27 = vpack.c.bf16 %v7922_v13, %v7922_v13 }
  0x37   : > { %v412_v19 = vsel %vm10453_vm8, %v404_v3, %v411_v10  ;;  %v422_v20 = vsel %vm10461_vm9, %v413_v11, %v421_v4  ;;  %v470_v22 = vshrl.u32 %v8493_v7, 16  ;;  %vm1585_vm10 = vsmask.f32 7424  ;;  %v457_v29 = vld [vmem:[#allocation2 + $0x38] sm:$0x1]  ;;  %v7925_v47 = vld [vmem:[%s10438_s26 + $0x50] sm:$0xff] }
  0x38   : > { %420 = vst.msk [vmem:[#allocation2 + $0x28] sm:$0xf] %vm251_vm1, %v412_v19  ;;  %423 = vst [vmem:[#allocation2 + $0x2c] sm:$0x1] %v422_v20  ;;  %v454_v25 = vsel %vm10446_vm7, %v439_v15, %v453_v12  ;;  %v444_v26 = vrot.slane %v442_v17, 7  ;;  %v473_v37 = vshll.u32 %v8493_v7, 16  ;;  %v8495_v1 = vpack.c.bf16 %v7925_v47, %v7925_v47 }
  0x39   : > { %455 = vst [vmem:[#allocation2 + $0x30] sm:$0xf] %v454_v25  ;;  %v472_v30 = vrot.slane %v470_v22, 7  ;;  %v489_v39 = vld [vmem:[#allocation2 + $0x3c] sm:$0xf]  ;;  %v478_v41 = vshrl.u32 %v8494_v27, 16 }
  0x3a   : > { %v9978_v23 = vld [vmem:[#allocation2 + $0x8] sm:$0xff]   ;;  %v447_v32 = vor.u32 %v445_v21, %v444_v26  ;;  %v449_v35 = vrot.slane %v444_v26, 4  ;;  %v481_v42 = vshll.u32 %v8494_v27, 16  ;;  %v493_v62 = vld [vmem:[#allocation2 + $0x44] sm:$0x1]  ;;  %v7926_v63 = vld [vmem:[%s10438_s26 + $0x58] sm:$0xff] }
  0x3b   : > { %8942 = vmatmul.mubr.msk.bf16.vlgmr.msra.gmra.mrb[0].mxu1 %vm1061_vm3, %v9978_v23  ;;  %v9980_v33 = vld [vmem:[#allocation2 + $0xc] sm:$0xff]   ;;  %v476_v40 = vrot.slane %v472_v30, 4  ;;  %v475_v50 = vor.u32 %v473_v37, %v472_v30  ;;  %v4618_v9 = vsel %vm1134_vm0, %v10427_v5, 0  ;;  %v7929_v15 = vld [vmem:[%s10438_s26 + $0x60] sm:$0xff]  ;;  %v8496_v21 = vpack.c.bf16 %v7926_v63, %v7926_v63  ;;  %s242_s10 = sand.u32 1, %s10257_s22   ;;  %s8549_s12 = sshll.u32 %s10330_s25, 11 }
  0x3c   : > { %v9979_v28 = vld [vmem:[#allocation2 + $0x10] sm:$0xff]   ;;  %8990 = vmatpush3.bf16.msra.mxu1 %v10466_v36  ;;  %v448_v38 = vsel %vm10453_vm8, %v440_v16, %v447_v32  ;;  %v3683_v43 = vshrl.u32 %v9980_v33, 16  ;;  %v3685_v44 = vshll.u32 %v9980_v33, 16  ;;  %v9982_v48 = vld [vmem:[#allocation2 + $0x18] sm:$0xff]   ;;  %v458_v49 = vsel %vm10461_vm9, %v449_v35, %v457_v29  ;;  %v7930_v16 = vld [vmem:[%s10438_s26 + $0x68] sm:$0xff]  ;;  %s11531_s11 = sshll.u32 %s242_s10, 7  ;;  %s11601_s16 = scalar_lea.hbm %s11666_s6, %s8549_s12 }
  0x3d   : > { %8945 = vmatprep.mubr.msk.bf16.mxu1 %vm1061_vm3, %v9979_v28  ;;  %v9981_v34 = vld [vmem:[#allocation2 + $0x14] sm:$0xff]   ;;  %456 = vst.msk [vmem:[#allocation2 + $0x34] sm:$0xf] %vm251_vm1, %v448_v38  ;;  %v480_v36 = vrot.slane %v478_v41, 7  ;;  %v9983_v53 = vld [vmem:[#allocation2 + $0x1c] sm:$0xff]   ;;  %v490_v55 = vsel %vm10446_vm7, %v475_v50, %v489_v39  ;;  %v506_v26 = vshrl.u32 %v8495_v1, 16  ;;  %v8498_v38 = vpack.c.bf16 %v7930_v16, %v7930_v16 }
  0x3e   : > { %v3690_v45 = vshll.u32 %v9981_v34, 16  ;;  %v3694_v46 = vshrl.u32 %v9981_v34, 16  ;;  %v3687_v51 = vrot.slane %v3685_v44, 1  ;;  %v9984_v54 = vld [vmem:[#allocation2 + $0x20] sm:$0xff]   ;;  %459 = vst [vmem:[#allocation2 + $0x38] sm:$0x1] %v458_v49  ;;  %v8497_v34 = vpack.c.bf16 %v7929_v15, %v7929_v15 }
  0x3f   : > { %v483_v56 = vor.u32 %v481_v42, %v480_v36  ;;  %v3698_v59 = vshll.u32 %v9983_v53, 16  ;;  %v9985_v60 = vld [vmem:[#allocation2 + $0x24] sm:$0xff]   ;;  %v3702_v61 = vshrl.u32 %v9983_v53, 16  ;;  %491 = vst [vmem:[#allocation2 + $0x3c] sm:$0xf] %v490_v55  ;;  %v485_v8 = vrot.slane %v480_v36, 4 }
  0x40   : > { %v3692_v52 = vrot.slane %v3690_v45, 1  ;;  %v3688_v57 = vor.u32 %v3687_v51, %v3683_v43  ;;  %v3706_v4 = vshll.u32 %v9985_v60, 16  ;;  %v9987_v6 = vld [vmem:[#allocation2 + $0x2c] sm:$0xff]   ;;  %v3710_v7 = vshrl.u32 %v9985_v60, 16  ;;  %v7934_v28 = vld [vmem:[%s10438_s26 + $0x78] sm:$0xff]  ;;  %v7937_v45 = vld [vmem:[%s10438_s26 + $0x80] sm:$0xff] }
  0x41   : > { %v484_v0 = vsel %vm10453_vm8, %v476_v40, %v483_v56  ;;  %v3700_v3 = vrot.slane %v3698_v59, 1  ;;  %v9986_v13 = vld [vmem:[#allocation2 + $0x28] sm:$0xff]   ;;  %v3714_v14 = vshll.u32 %v9987_v6, 16  ;;  %v3718_v19 = vshrl.u32 %v9987_v6, 16  ;;  %v7933_v27 = vld [vmem:[%s10438_s26 + $0x70] sm:$0xff]  ;;  %s11591_s13 = scalar_lea.vmem [#allocation4], %s11531_s11 }
  0x42   : > { %v3696_v58 = vor.u32 %v3694_v46, %v3692_v52  ;;  %v3693_v2 = vsel %vm1585_vm10, %v3688_v57, %v3692_v52  ;;  %492 = vst.msk [vmem:[#allocation2 + $0x40] sm:$0xf] %vm251_vm1, %v484_v0  ;;  %v3708_v12 = vrot.slane %v3706_v4, 1  ;;  %v494_v20 = vsel %vm10461_vm9, %v485_v8, %v493_v62  ;;  %v7938_v46 = vld [vmem:[%s10438_s26 + $0x88] sm:$0xff]  ;;  %v7941_v47 = vld [vmem:[%s10438_s26 + $0x90] sm:$0xff]  ;;  %s7838_s14 = sshll.u32 %s11591_s13, 4  ;;  %s11603_s14 = int_to_ptr.vmem [resolvable:$true] %s7838_s14 }
  0x43   : > { %8946 = vmatmul.mubr.msk.bf16.gmra.mrb[4].mxu1 %vm1061_vm3, %v9982_v48  ;;  %9141 = vmatprep.mubr.msk.bf16.mxu0 %vm1061_vm3, %v3693_v2  ;;  %v3704_v11 = vor.u32 %v3702_v61, %v3700_v3  ;;  %v3716_v23 = vrot.slane %v3714_v14, 1  ;;  %495 = vst [vmem:[#allocation2 + $0x44] sm:$0x1] %v494_v20  ;;  %v508_v33 = vrot.slane %v506_v26, 7  ;;  %v10528_v39 = vpack.c.bf16 %v7933_v27, %v7933_v27  ;;  %v525_v36 = vld [vmem:[#allocation2 + $0x48] sm:$0xf] }
  0x44   : > { %8949 = vmatprep.mubr.msk.bf16.mxu1 %vm1061_vm3, %v9984_v54  ;;  %v3701_v10 = vsel %vm1585_vm10, %v3696_v58, %v3700_v3  ;;  %v3712_v22 = vor.u32 %v3710_v7, %v3708_v12  ;;  %v9988_v25 = vld [vmem:[#allocation2 + $0x30] sm:$0xff]   ;;  %v10530_v40 = vpack.c.bf16 %v7934_v28, %v7934_v28  ;;  %v509_v42 = vshll.u32 %v8495_v1, 16  ;;  %v597_v20 = vld [vmem:[#allocation2 + $0x60] sm:$0xf]  ;;  %v601_v28 = vld [vmem:[#allocation2 + $0x68] sm:$0x1] }
  0x45   : > { %9142 = vmatmul.mubr.msk.bf16.vlgmr.msra.gmra.mrb[0].mxu0 %vm1061_vm3, %v3701_v10  ;;  %v9989_v17 = vld [vmem:[#allocation2 + $0x34] sm:$0xff]   ;;  %v3709_v5 = vsel %vm1585_vm10, %v3704_v11, %v3708_v12  ;;  %v3720_v30 = vor.u32 %v3718_v19, %v3716_v23  ;;  %v514_v43 = vshrl.u32 %v8496_v21, 16  ;;  %v517_v44 = vshll.u32 %v8496_v21, 16  ;;  %v529_v54 = vld [vmem:[#allocation2 + $0x50] sm:$0x1]  ;;  %s11619_s17 = scalar_lea.sflag [#allocation5], %s242_s10 }
  0x46   : > { %9190 = vmatpush3.bf16.msra.mxu0 %v4618_v9  ;;  %9145 = vmatprep.mubr.msk.bf16.mxu0 %vm1061_vm3, %v3709_v5  ;;  %v3722_v29 = vshll.u32 %v9989_v17, 16  ;;  %v3726_v32 = vshrl.u32 %v9989_v17, 16  ;;  %v3717_v41 = vsel %vm1585_vm10, %v3712_v22, %v3716_v23  ;;  %v512_v51 = vrot.slane %v508_v33, 4  ;;  %v9990_v57 = vld [vmem:[#allocation2 + $0x38] sm:$0xff]   ;;  %v561_v6 = vld [vmem:[#allocation2 + $0x54] sm:$0xf] }
  0x47   : > { %v511_v52 = vor.u32 %v509_v42, %v508_v33  ;;  %v516_v53 = vrot.slane %v514_v43, 7  ;;  %v542_v55 = vshrl.u32 %v8497_v34, 16  ;;  %v545_v56 = vshll.u32 %v8497_v34, 16  ;;  %s10203_s18 = scalar_lea.vmem %s11603_s14, 2048  ;;  %s10271_s19 = smov [#allocation4]  }
  0x48   : > { %v3724_v35 = vrot.slane %v3722_v29, 1  ;;  %v8501_v59 = vpack.c.bf16 %v7937_v45, %v7937_v45  ;;  %v10540_v60 = vpack.c.bf16 %v7938_v46, %v7938_v46  ;;  %v10542_v61 = vpack.c.bf16 %v7941_v47, %v7941_v47  ;;  %p10204_p11 = scmp.ne.s32.totalorder %s11603_s14, %s10203_s18  ;;  %s10207_s20 = sshll.u32 %s10271_s19, 4  ;;  %s10208_s20 = int_to_ptr.vmem [resolvable:$false] %s10207_s20 }
  0x49   : > { %v10526_v37 = vld [vmem:[#allocation2 + $0x3c] sm:$0xff]   ;;  %v526_v63 = vsel %vm10446_vm7, %v511_v52, %v525_v36  ;;  %v519_v0 = vor.u32 %v517_v44, %v516_v53  ;;  %v521_v1 = vrot.slane %v516_v53, 4  ;;  %v544_v2 = vrot.slane %v542_v55, 7  ;;  %p10210_p0 = scmp.lt.s32.totalorder %s11603_s14, %s10208_s20 }
  0x4a   : > { %v3725_v48 = vsel %vm1585_vm10, %v3720_v30, %v3724_v35  ;;  %v3728_v49 = vor.u32 %v3726_v32, %v3724_v35  ;;  %v3730_v50 = vshll.u32 %v10526_v37, 16  ;;  %v9992_v62 = vld [vmem:[#allocation2 + $0x40] sm:$0xff]   ;;  %527 = vst [vmem:[#allocation2 + $0x48] sm:$0xf] %v526_v63  ;;  %v3734_v4 = vshrl.u32 %v10526_v37, 16  ;;  %p10205_p12 = pnand %p10204_p11, %p10347_p5 }
  0x4b   : > { %8950 = vmatmul.mubr.msk.bf16.gmra.mrb[8].mxu1 %vm1061_vm3, %v9986_v13  ;;  %v550_v7 = vshrl.u32 %v8498_v38, 16  ;;  %v553_v8 = vshll.u32 %v8498_v38, 16  ;;  %v520_v9 = vsel %vm10453_vm8, %v512_v51, %v519_v0  ;;  %v530_v10 = vsel %vm10461_vm9, %v521_v1, %v529_v54  ;;  %v565_v13 = vld [vmem:[#allocation2 + $0x5c] sm:$0x1]  ;;  %v633_v30 = vld [vmem:[#allocation2 + $0x6c] sm:$0xf] }
  0x4c   : > { %8953 = vmatprep.mubr.msk.bf16.mxu1 %vm1061_vm3, %v9988_v25  ;;  %v3732_v58 = vrot.slane %v3730_v50, 1  ;;  %v547_v11 = vor.u32 %v545_v56, %v544_v2  ;;  %v548_v12 = vrot.slane %v544_v2, 4  ;;  %528 = vst.msk [vmem:[#allocation2 + $0x4c] sm:$0xf] %vm251_vm1, %v520_v9  ;;  %531 = vst [vmem:[#allocation2 + $0x50] sm:$0x1] %v530_v10  ;;  %p10206_p13 = pneg %p10205_p12 }
  0x4d   : > { %9146 = vmatmul.mubr.msk.bf16.gmra.mrb[4].mxu0 %vm1061_vm3, %v3717_v41  ;;  %v552_v14 = vrot.slane %v550_v7, 7  ;;  %v578_v15 = vshrl.u32 %v10528_v39, 16  ;;  %v581_v16 = vshll.u32 %v10528_v39, 16  ;;  %v586_v17 = vshrl.u32 %v10530_v40, 16  ;;  %v637_v54 = vld [vmem:[#allocation2 + $0x74] sm:$0x1] }
  0x4e   : > { %9149 = vmatprep.mubr.msk.bf16.mxu0 %vm1061_vm3, %v3725_v48  ;;  %v3733_v3 = vsel %vm1585_vm10, %v3728_v49, %v3732_v58  ;;  %v562_v19 = vsel %vm10446_vm7, %v547_v11, %v561_v6  ;;  %v589_v21 = vshll.u32 %v10530_v40, 16  ;;  %v614_v5 = vshrl.u32 %v8501_v59, 16  ;;  %v7942_v49 = vld [vmem:[%s10438_s26 + $0x98] sm:$0xff]  ;;  %v7945_v7 = vld [vmem:[%s10438_s26 + $0xa0] sm:$0xff] }
  0x4f   : > { %v617_v22 = vshll.u32 %v8501_v59, 16  ;;  %563 = vst [vmem:[#allocation2 + $0x54] sm:$0xf] %v562_v19  ;;  %v555_v23 = vor.u32 %v553_v8, %v552_v14  ;;  %v557_v25 = vrot.slane %v552_v14, 4  ;;  %v580_v26 = vrot.slane %v578_v15, 7  ;;  %v7946_v8 = vld [vmem:[%s10438_s26 + $0xa8] sm:$0xff] }
  0x50   : > { %v588_v27 = vrot.slane %v586_v17, 7  ;;  %v616_v29 = vrot.slane %v614_v5, 7  ;;  %v622_v32 = vshrl.u32 %v10540_v60, 16  ;;  %v625_v33 = vshll.u32 %v10540_v60, 16  ;;  %v669_v2 = vld [vmem:[#allocation2 + $0x78] sm:$0xf] }
  0x51   : > { %v650_v34 = vshrl.u32 %v10542_v61, 16  ;;  %v556_v35 = vsel %vm10453_vm8, %v548_v12, %v555_v23  ;;  %v566_v37 = vsel %vm10461_vm9, %v557_v25, %v565_v13  ;;  %v583_v38 = vor.u32 %v581_v16, %v580_v26  ;;  %v9993_v40 = vld [vmem:[#allocation2 + $0x44] sm:$0xff]   ;;  %v7949_v12 = vld [vmem:[%s10438_s26 + $0xb0] sm:$0xff]  ;;  %v7950_v13 = vld [vmem:[%s10438_s26 + $0xb8] sm:$0xff] }
  0x52   : > { %v584_v39 = vrot.slane %v580_v26, 4  ;;  %v3736_v41 = vor.u32 %v3734_v4, %v3732_v58  ;;  %564 = vst.msk [vmem:[#allocation2 + $0x58] sm:$0xf] %vm251_vm1, %v556_v35  ;;  %567 = vst [vmem:[#allocation2 + $0x5c] sm:$0x1] %v566_v37  ;;  %v591_v42 = vor.u32 %v589_v21, %v588_v27  ;;  %v593_v43 = vrot.slane %v588_v27, 4 }
  0x53   : > { %8954 = vmatmul.mubr.msk.bf16.gmra.mrb[12].mxu1 %vm1061_vm3, %v9990_v57  ;;  %v619_v44 = vor.u32 %v617_v22, %v616_v29  ;;  %v598_v45 = vsel %vm10446_vm7, %v583_v38, %v597_v20  ;;  %v620_v46 = vrot.slane %v616_v29, 4  ;;  %v624_v47 = vrot.slane %v622_v32, 7  ;;  %v9994_v36 = vld [vmem:[#allocation2 + $0x48] sm:$0xff]   ;;  %v7953_v14 = vld [vmem:[%s10438_s26 + $0xc0] sm:$0xff]  ;;  %v7957_v27 = vld [vmem:[%s10438_s26 + $0xd0] sm:$0xff] }
  0x54   : > { %8957 = vmatprep.mubr.msk.bf16.mxu1 %vm1061_vm3, %v9992_v62  ;;  %v10573_v48 = vrot.slane %v650_v34, 7  ;;  %v3738_v50 = vshll.u32 %v9993_v40, 16  ;;  %599 = vst [vmem:[#allocation2 + $0x60] sm:$0xf] %v598_v45  ;;  %v592_v51 = vsel %vm10453_vm8, %v584_v39, %v591_v42  ;;  %v602_v52 = vsel %vm10461_vm9, %v593_v43, %v601_v28  ;;  %v9995_v55 = vld [vmem:[#allocation2 + $0x4c] sm:$0xff]  }
  0x55   : > { %9150 = vmatmul.mubr.msk.bf16.gmra.mrb[8].mxu0 %vm1061_vm3, %v3733_v3  ;;  %v634_v53 = vsel %vm10446_vm7, %v619_v44, %v633_v30  ;;  %v3742_v56 = vshrl.u32 %v9993_v40, 16  ;;  %600 = vst.msk [vmem:[#allocation2 + $0x64] sm:$0xf] %vm251_vm1, %v592_v51  ;;  %603 = vst [vmem:[#allocation2 + $0x68] sm:$0x1] %v602_v52  ;;  %v627_v57 = vor.u32 %v625_v33, %v624_v47  ;;  %v3746_v62 = vshll.u32 %v9995_v55, 16 }
  0x56   : > { %635 = vst [vmem:[#allocation2 + $0x6c] sm:$0xf] %v634_v53  ;;  %v3740_v58 = vrot.slane %v3738_v50, 1  ;;  %v9996_v59 = vld [vmem:[#allocation2 + $0x50] sm:$0xff]   ;;  %v10584_v60 = vpack.c.bf16 %v7942_v49, %v7942_v49  ;;  %v3750_v63 = vshrl.u32 %v9995_v55, 16  ;;  %v629_v1 = vrot.slane %v624_v47, 4 }
  0x57   : > { %v628_v0 = vsel %vm10453_vm8, %v620_v46, %v627_v57  ;;  %v653_v6 = vshll.u32 %v10542_v61, 16  ;;  %v3748_v9 = vrot.slane %v3746_v62, 1  ;;  %v7954_v22 = vld [vmem:[%s10438_s26 + $0xc8] sm:$0xff]  ;;  %v8505_v30 = vpack.c.bf16 %v7945_v7, %v7945_v7  ;;  %v673_v35 = vld [vmem:[#allocation2 + $0x80] sm:$0x1] }
  0x58   : > { %v3741_v3 = vsel %vm1585_vm10, %v3736_v41, %v3740_v58  ;;  %v3744_v4 = vor.u32 %v3742_v56, %v3740_v58  ;;  %636 = vst.msk [vmem:[#allocation2 + $0x70] sm:$0xf] %vm251_vm1, %v628_v0  ;;  %v638_v11 = vsel %vm10461_vm9, %v629_v1, %v637_v54  ;;  %v658_v61 = vshrl.u32 %v10584_v60, 16 }
  0x59   : > { %9153 = vmatprep.mubr.msk.bf16.mxu0 %vm1061_vm3, %v3741_v3  ;;  %v9997_v10 = vld [vmem:[#allocation2 + $0x54] sm:$0xff]   ;;  %639 = vst [vmem:[#allocation2 + $0x74] sm:$0x1] %v638_v11  ;;  %v655_v16 = vor.u32 %v653_v6, %v10573_v48  ;;  %v3752_v19 = vor.u32 %v3750_v63, %v3748_v9  ;;  %v8506_v32 = vpack.c.bf16 %v7946_v8, %v7946_v8  ;;  %v656_v43 = vrot.slane %v10573_v48, 4  ;;  %v709_v6 = vld [vmem:[#allocation2 + $0x8c] sm:$0x1] }
  0x5a   : > { %v9998_v15 = vld [vmem:[#allocation2 + $0x58] sm:$0xff]   ;;  %v3749_v17 = vsel %vm1585_vm10, %v3744_v4, %v3748_v9  ;;  %v3754_v20 = vshll.u32 %v9997_v10, 16  ;;  %v3758_v5 = vshrl.u32 %v9997_v10, 16  ;;  %v660_v26 = vrot.slane %v658_v61, 7  ;;  %v705_v4 = vld [vmem:[#allocation2 + $0x84] sm:$0xf] }
  0x5b   : > { %8958 = vmatmul.mubr.msk.bf16.gmra.mrb[16].mxu1 %vm1061_vm3, %v9994_v36  ;;  %v9999_v21 = vld [vmem:[#allocation2 + $0x5c] sm:$0xff]   ;;  %v670_v25 = vsel %vm10446_vm7, %v655_v16, %v669_v2  ;;  %v10609_v37 = vpack.c.bf16 %v7949_v12, %v7949_v12  ;;  %v10611_v38 = vpack.c.bf16 %v7950_v13, %v7950_v13  ;;  %v10613_v39 = vpack.c.bf16 %v7953_v14, %v7953_v14 }
  0x5c   : > { %8961 = vmatprep.mubr.msk.bf16.mxu1 %vm1061_vm3, %v9996_v59  ;;  %v10000_v23 = vld [vmem:[#allocation2 + $0x60] sm:$0xff]   ;;  %v3756_v28 = vrot.slane %v3754_v20, 1  ;;  %v3762_v29 = vshll.u32 %v9999_v21, 16  ;;  %671 = vst [vmem:[#allocation2 + $0x78] sm:$0xf] %v670_v25  ;;  %v3766_v34 = vshrl.u32 %v9999_v21, 16  ;;  %v10620_v49 = vpack.c.bf16 %v7954_v22, %v7954_v22 }
  0x5d   : > { %9154 = vmatmul.mubr.msk.bf16.gmra.mrb[12].mxu0 %vm1061_vm3, %v3749_v17  ;;  %v10001_v33 = vld [vmem:[#allocation2 + $0x64] sm:$0xff]   ;;  %v661_v47 = vshll.u32 %v10584_v60, 16  ;;  %v665_v51 = vrot.slane %v660_v26, 4  ;;  %v10623_v52 = vpack.c.bf16 %v7957_v27, %v7957_v27  ;;  %v686_v59 = vshrl.u32 %v8505_v30, 16  ;;  %v741_v20 = vld [vmem:[#allocation2 + $0x90] sm:$0xf] }
  0x5e   : > { %v3757_v40 = vsel %vm1585_vm10, %v3752_v19, %v3756_v28  ;;  %v3760_v41 = vor.u32 %v3758_v5, %v3756_v28  ;;  %v3764_v42 = vrot.slane %v3762_v29, 1  ;;  %v3770_v44 = vshll.u32 %v10001_v33, 16  ;;  %v10002_v54 = vld [vmem:[#allocation2 + $0x68] sm:$0xff]  }
  0x5f   : > { %9157 = vmatprep.mubr.msk.bf16.mxu0 %vm1061_vm3, %v3757_v40  ;;  %v10003_v45 = vld [vmem:[#allocation2 + $0x6c] sm:$0xff]   ;;  %v3774_v46 = vshrl.u32 %v10001_v33, 16  ;;  %v663_v48 = vor.u32 %v661_v47, %v660_v26  ;;  %v674_v58 = vsel %vm10461_vm9, %v665_v51, %v673_v35  ;;  %v689_v62 = vshll.u32 %v8505_v30, 16  ;;  %v745_v33 = vld [vmem:[#allocation2 + $0x98] sm:$0x1] }
  0x60   : > { %v3765_v50 = vsel %vm1585_vm10, %v3760_v41, %v3764_v42  ;;  %v3768_v36 = vor.u32 %v3766_v34, %v3764_v42  ;;  %v3772_v53 = vrot.slane %v3770_v44, 1  ;;  %v3778_v55 = vshll.u32 %v10003_v45, 16  ;;  %v10004_v57 = vld [vmem:[#allocation2 + $0x70] sm:$0xff]   ;;  %675 = vst [vmem:[#allocation2 + $0x80] sm:$0x1] %v674_v58 }
  0x61   : > { %v3782_v56 = vshrl.u32 %v10003_v45, 16  ;;  %v694_v60 = vshrl.u32 %v8506_v32, 16  ;;  %v664_v3 = vsel %vm10453_vm8, %v656_v43, %v663_v48  ;;  %v688_v7 = vrot.slane %v686_v59, 7  ;;  %v7961_v43 = vld [vmem:[%s10438_s26 + $0xe0] sm:$0xff] }
  0x62   : > { %v3773_v63 = vsel %vm1585_vm10, %v3768_v36, %v3772_v53  ;;  %v3776_v0 = vor.u32 %v3774_v46, %v3772_v53  ;;  %v3780_v1 = vrot.slane %v3778_v55, 1  ;;  %672 = vst.msk [vmem:[#allocation2 + $0x7c] sm:$0xf] %vm251_vm1, %v664_v3  ;;  %v697_v9 = vshll.u32 %v8506_v32, 16  ;;  %v781_v58 = vld [vmem:[#allocation2 + $0xa4] sm:$0x1] }
  0x63   : > { %8962 = vmatmul.mubr.msk.bf16.gmra.mrb[20].mxu1 %vm1061_vm3, %v9998_v15  ;;  %v10005_v2 = vld [vmem:[#allocation2 + $0x74] sm:$0xff]   ;;  %v696_v8 = vrot.slane %v694_v60, 7  ;;  %v722_v10 = vshrl.u32 %v10609_v37, 16  ;;  %v691_v16 = vor.u32 %v689_v62, %v688_v7  ;;  %v692_v61 = vrot.slane %v688_v7, 4 }
  0x64   : > { %8965 = vmatprep.mubr.msk.bf16.mxu1 %vm1061_vm3, %v10000_v23  ;;  %v3781_v11 = vsel %vm1585_vm10, %v3776_v0, %v3780_v1  ;;  %v3784_v12 = vor.u32 %v3782_v56, %v3780_v1  ;;  %v3786_v13 = vshll.u32 %v10005_v2, 16  ;;  %v3790_v14 = vshrl.u32 %v10005_v2, 16  ;;  %v7958_v15 = vld [vmem:[%s10438_s26 + $0xd8] sm:$0xff] }
  0x65   : > { %9158 = vmatmul.mubr.msk.bf16.gmra.mrb[16].mxu0 %vm1061_vm3, %v3765_v50  ;;  %v699_v17 = vor.u32 %v697_v9, %v696_v8  ;;  %v701_v19 = vrot.slane %v696_v8, 4  ;;  %v724_v5 = vrot.slane %v722_v10, 7  ;;  %v725_v22 = vshll.u32 %v10609_v37, 16  ;;  %v777_v50 = vld [vmem:[#allocation2 + $0x9c] sm:$0xf] }
  0x66   : > { %9161 = vmatprep.mubr.msk.bf16.mxu0 %vm1061_vm3, %v3773_v63  ;;  %v3788_v21 = vrot.slane %v3786_v13, 1  ;;  %v730_v23 = vshrl.u32 %v10611_v38, 16  ;;  %v706_v25 = vsel %vm10446_vm7, %v691_v16, %v705_v4  ;;  %v733_v28 = vshll.u32 %v10611_v38, 16  ;;  %v813_v63 = vld [vmem:[#allocation2 + $0xa8] sm:$0xf] }
  0x67   : > { %v700_v26 = vsel %vm10453_vm8, %v692_v61, %v699_v17  ;;  %v710_v27 = vsel %vm10461_vm9, %v701_v19, %v709_v6  ;;  %707 = vst [vmem:[#allocation2 + $0x84] sm:$0xf] %v706_v25  ;;  %v727_v30 = vor.u32 %v725_v22, %v724_v5  ;;  %v728_v32 = vrot.slane %v724_v5, 4  ;;  %v817_v19 = vld [vmem:[#allocation2 + $0xb0] sm:$0x1] }
  0x68   : > { %v3789_v29 = vsel %vm1585_vm10, %v3784_v12, %v3788_v21  ;;  %708 = vst.msk [vmem:[#allocation2 + $0x88] sm:$0xf] %vm251_vm1, %v700_v26  ;;  %711 = vst [vmem:[#allocation2 + $0x8c] sm:$0x1] %v710_v27  ;;  %v10649_v34 = vpack.c.bf16 %v7958_v15, %v7958_v15  ;;  %v732_v35 = vrot.slane %v730_v23, 7  ;;  %v758_v37 = vshrl.u32 %v10613_v39, 16 }
  0x69   : > { %v10006_v40 = vld [vmem:[#allocation2 + $0x78] sm:$0xff]   ;;  %v3792_v41 = vor.u32 %v3790_v14, %v3788_v21  ;;  %v742_v38 = vsel %vm10446_vm7, %v727_v30, %v741_v20  ;;  %v761_v42 = vshll.u32 %v10613_v39, 16  ;;  %v766_v36 = vshrl.u32 %v10620_v49, 16  ;;  %v7965_v23 = vld [vmem:[%s10438_s26 + $0xf0] sm:$0xff] }
  0x6a   : > { %v10007_v44 = vld [vmem:[#allocation2 + $0x7c] sm:$0xff]   ;;  %743 = vst [vmem:[#allocation2 + $0x90] sm:$0xf] %v742_v38  ;;  %v735_v45 = vor.u32 %v733_v28, %v732_v35  ;;  %v737_v46 = vrot.slane %v732_v35, 4  ;;  %v760_v47 = vrot.slane %v758_v37, 7  ;;  %v769_v51 = vshll.u32 %v10620_v49, 16 }
  0x6b   : > { %8966 = vmatmul.mubr.msk.bf16.gmra.mrb[24].mxu1 %vm1061_vm3, %v10002_v54  ;;  %v794_v53 = vshrl.u32 %v10623_v52, 16  ;;  %v797_v39 = vshll.u32 %v10623_v52, 16  ;;  %v802_v54 = vshrl.u32 %v10649_v34, 16  ;;  %v3794_v55 = vshll.u32 %v10007_v44, 16  ;;  %v7962_v52 = vld [vmem:[%s10438_s26 + $0xe8] sm:$0xff] }
  0x6c   : > { %8969 = vmatprep.mubr.msk.bf16.mxu1 %vm1061_vm3, %v10004_v57  ;;  %v3798_v56 = vshrl.u32 %v10007_v44, 16  ;;  %v736_v48 = vsel %vm10453_vm8, %v728_v32, %v735_v45  ;;  %v746_v57 = vsel %vm10461_vm9, %v737_v46, %v745_v33  ;;  %v763_v49 = vor.u32 %v761_v42, %v760_v47 }
  0x6d   : > { %9162 = vmatmul.mubr.msk.bf16.gmra.mrb[20].mxu0 %vm1061_vm3, %v3781_v11  ;;  %744 = vst.msk [vmem:[#allocation2 + $0x94] sm:$0xf] %vm251_vm1, %v736_v48  ;;  %747 = vst [vmem:[#allocation2 + $0x98] sm:$0x1] %v746_v57  ;;  %v764_v59 = vrot.slane %v760_v47, 4  ;;  %v768_v62 = vrot.slane %v766_v36, 7  ;;  %v8513_v2 = vpack.c.bf16 %v7961_v43, %v7961_v43  ;;  %v10674_v13 = vpack.c.bf16 %v7962_v52, %v7962_v52 }
  0x6e   : > { %9165 = vmatprep.mubr.msk.bf16.mxu0 %vm1061_vm3, %v3789_v29  ;;  %v796_v60 = vrot.slane %v794_v53, 7  ;;  %v3796_v0 = vrot.slane %v3794_v55, 1  ;;  %v10008_v1 = vld [vmem:[#allocation2 + $0x80] sm:$0xff]   ;;  %v778_v4 = vsel %vm10446_vm7, %v763_v49, %v777_v50  ;;  %v804_v21 = vrot.slane %v802_v54, 7 }
  0x6f   : > { %v10009_v3 = vld [vmem:[#allocation2 + $0x84] sm:$0xff]   ;;  %v771_v6 = vor.u32 %v769_v51, %v768_v62  ;;  %v773_v7 = vrot.slane %v768_v62, 4  ;;  %779 = vst [vmem:[#allocation2 + $0x9c] sm:$0xf] %v778_v4  ;;  %v805_v5 = vshll.u32 %v10649_v34, 16  ;;  %v830_v22 = vshrl.u32 %v8513_v2, 16 }
  0x70   : > { %v799_v8 = vor.u32 %v797_v39, %v796_v60  ;;  %v3797_v9 = vsel %vm1585_vm10, %v3792_v41, %v3796_v0  ;;  %v3800_v10 = vor.u32 %v3798_v56, %v3796_v0  ;;  %v10010_v11 = vld [vmem:[#allocation2 + $0x88] sm:$0xff]   ;;  %v800_v12 = vrot.slane %v796_v60, 4  ;;  %v849_v41 = vld [vmem:[#allocation2 + $0xb4] sm:$0xf]  ;;  %v853_v56 = vld [vmem:[#allocation2 + $0xbc] sm:$0x1] }
  0x71   : > { %v3802_v14 = vshll.u32 %v10009_v3, 16  ;;  %v10011_v15 = vld [vmem:[#allocation2 + $0x8c] sm:$0xff]   ;;  %v3806_v16 = vshrl.u32 %v10009_v3, 16  ;;  %v772_v61 = vsel %vm10453_vm8, %v764_v59, %v771_v6  ;;  %v782_v17 = vsel %vm10461_vm9, %v773_v7, %v781_v58  ;;  %v10024_v49 = vld [vmem:[#allocation2] sm:$0xff]   ;;  %v7966_v6 = vld [vmem:[%s10438_s26 + $0xf8] sm:$0xff]  ;;  %s10209_s26 = scalar_lea.vmem %s10208_s20, 4096 }
  0x72   : > { %780 = vst.msk [vmem:[#allocation2 + $0xa0] sm:$0xf] %vm251_vm1, %v772_v61  ;;  %783 = vst [vmem:[#allocation2 + $0xa4] sm:$0x1] %v782_v17  ;;  %v814_v20 = vsel %vm10446_vm7, %v799_v8, %v813_v63  ;;  %v3810_v26 = vshll.u32 %v10011_v15, 16  ;;  %v3814_v27 = vshrl.u32 %v10011_v15, 16  ;;  %v807_v30 = vor.u32 %v805_v5, %v804_v21  ;;  %p10211_p1 = scmp.lt.s32.totalorder %s10209_s26, %s10203_s18 }
  0x73   : > { %8970 = vmatmul.mubr.msk.bf16.gmra.mrb[28].mxu1 %vm1061_vm3, %v10006_v40  ;;  %v3804_v25 = vrot.slane %v3802_v14, 1  ;;  %815 = vst [vmem:[#allocation2 + $0xa8] sm:$0xf] %v814_v20  ;;  %v833_v28 = vshll.u32 %v8513_v2, 16  ;;  %v809_v32 = vrot.slane %v804_v21, 4  ;;  %v832_v42 = vrot.slane %v830_v22, 7 }
  0x74   : > { %8973 = vmatprep.mubr.msk.bf16.mxu1 %vm1061_vm3, %v10008_v1  ;;  %v10012_v29 = vld [vmem:[#allocation2 + $0x90] sm:$0xff]   ;;  %v3812_v37 = vrot.slane %v3810_v26, 1  ;;  %v808_v34 = vsel %vm10453_vm8, %v800_v12, %v807_v30  ;;  %v838_v43 = vshrl.u32 %v10674_v13, 16  ;;  %v8515_v50 = vpack.c.bf16 %v7965_v23, %v7965_v23  ;;  %v10703_v0 = vld [vmem:[#allocation2 + $0x8] sm:$0xff]   ;;  %p10212_p2 = por %p10211_p1, %p10210_p0 }
  0x75   : > { %9166 = vmatmul.mubr.msk.bf16.gmra.mrb[24].mxu0 %vm1061_vm3, %v3797_v9  ;;  %v3805_v33 = vsel %vm1585_vm10, %v3800_v10, %v3804_v25  ;;  %v3808_v35 = vor.u32 %v3806_v16, %v3804_v25  ;;  %v10013_v40 = vld [vmem:[#allocation2 + $0x94] sm:$0xff]   ;;  %v818_v38 = vsel %vm10461_vm9, %v809_v32, %v817_v19  ;;  %816 = vst.msk [vmem:[#allocation2 + $0xac] sm:$0xf] %vm251_vm1, %v808_v34  ;;  %v836_v53 = vrot.slane %v832_v42, 4  ;;  %v885_v10 = vld [vmem:[#allocation2 + $0xc0] sm:$0xf] }
  0x76   : > { %9169 = vmatprep.mubr.msk.bf16.mxu0 %vm1061_vm3, %v3805_v33  ;;  %v3816_v45 = vor.u32 %v3814_v27, %v3812_v37  ;;  %v3818_v46 = vshll.u32 %v10013_v40, 16  ;;  %v10014_v47 = vld [vmem:[#allocation2 + $0x98] sm:$0xff]   ;;  %819 = vst [vmem:[#allocation2 + $0xb0] sm:$0x1] %v818_v38  ;;  %v3822_v36 = vshrl.u32 %v10013_v40, 16  ;;  %v835_v51 = vor.u32 %v833_v28, %v832_v42  ;;  %v10027_v26 = vld [vmem:[#allocation2 + $0x10] sm:$0xff]   ;;  %p10213_p3 = pnand %p10212_p2, %p10206_p13 }
  0x77   : > { %v3813_v44 = vsel %vm1585_vm10, %v3808_v35, %v3812_v37  ;;  %v840_v39 = vrot.slane %v838_v43, 7  ;;  %v841_v58 = vshll.u32 %v10674_v13, 16  ;;  %v866_v3 = vshrl.u32 %v8515_v50, 16  ;;  %v889_v38 = vld [vmem:[#allocation2 + $0xc8] sm:$0x1]  ;;  %v10029_v42 = vld [vmem:[#allocation2 + $0x18] sm:$0xff]  }
  0x78   : > { %v3820_v54 = vrot.slane %v3818_v46, 1  ;;  %v850_v57 = vsel %vm10446_vm7, %v835_v51, %v849_v41  ;;  %v869_v4 = vshll.u32 %v8515_v50, 16  ;;  %v8516_v19 = vpack.c.bf16 %v7966_v6, %v7966_v6  ;;  %v10030_v6 = vld [vmem:[#allocation2 + $0xc] sm:$0xfe]  }
  0x79   : > { %v10015_v55 = vld [vmem:[#allocation2 + $0x9c] sm:$0xff]   ;;  %851 = vst [vmem:[#allocation2 + $0xb4] sm:$0xf] %v850_v57  ;;  %v843_v1 = vor.u32 %v841_v58, %v840_v39  ;;  %v845_v2 = vrot.slane %v840_v39, 4  ;;  %v868_v14 = vrot.slane %v866_v3, 7  ;;  %v1587_v21 = vshrl.u32 %v10024_v49, 16 }
  0x7a   : > { %v10016_v48 = vld [vmem:[#allocation2 + $0xa0] sm:$0xff]   ;;  %v3821_v59 = vsel %vm1585_vm10, %v3816_v45, %v3820_v54  ;;  %v3824_v62 = vor.u32 %v3822_v36, %v3820_v54  ;;  %v3826_v60 = vshll.u32 %v10015_v55, 16  ;;  %v3830_v52 = vshrl.u32 %v10015_v55, 16  ;;  %v10028_v55 = vld [vmem:[#allocation2 + $0xcc] ss:$0 sps:$4 sm:$0x11]  }
  0x7b   : > { %8974 = vmatmul.mubr.msk.bf16.gmra.mrb[32].mxu1 %vm1061_vm3, %v10010_v11  ;;  %v10017_v63 = vld [vmem:[#allocation2 + $0xa4] sm:$0xff]   ;;  %v844_v12 = vsel %vm10453_vm8, %v836_v53, %v843_v1  ;;  %v854_v13 = vsel %vm10461_vm9, %v845_v2, %v853_v56  ;;  %v871_v20 = vor.u32 %v869_v4, %v868_v14  ;;  %v1589_v5 = vshll.u32 %v10024_v49, 16 }
  0x7c   : > { %8977 = vmatprep.mubr.msk.bf16.mxu1 %vm1061_vm3, %v10012_v29  ;;  %v3828_v7 = vrot.slane %v3826_v60, 1  ;;  %v3834_v8 = vshll.u32 %v10017_v63, 16  ;;  %v3838_v9 = vshrl.u32 %v10017_v63, 16  ;;  %v10018_v11 = vld [vmem:[#allocation2 + $0xa8] sm:$0xff]   ;;  %852 = vst.msk [vmem:[#allocation2 + $0xb8] sm:$0xf] %vm251_vm1, %v844_v12 }
  0x7d   : > { %9170 = vmatmul.mubr.msk.bf16.gmra.mrb[28].mxu0 %vm1061_vm3, %v3813_v44  ;;  %v10019_v17 = vld [vmem:[#allocation2 + $0xac] sm:$0xff]   ;;  %855 = vst [vmem:[#allocation2 + $0xbc] sm:$0x1] %v854_v13  ;;  %v1594_v22 = vshll.u32 %v10703_v0, 16  ;;  %v886_v29 = vsel %vm10446_vm7, %v871_v20, %v885_v10  ;;  %v1591_v30 = vrot.slane %v1589_v5, 1  ;;  %v1598_v33 = vshrl.u32 %v10703_v0, 16 }
  0x7e   : > { %9173 = vmatprep.mubr.msk.bf16.mxu0 %vm1061_vm3, %v3821_v59  ;;  %v3829_v15 = vsel %vm1585_vm10, %v3824_v62, %v3828_v7  ;;  %v3832_v16 = vor.u32 %v3830_v52, %v3828_v7  ;;  %v3836_v61 = vrot.slane %v3834_v8, 1  ;;  %v3842_v25 = vshll.u32 %v10019_v17, 16  ;;  %887 = vst [vmem:[#allocation2 + $0xc0] sm:$0xf] %v886_v29  ;;  %v10032_v60 = vld [vmem:[#allocation2 + $0x20] sm:$0xff]   ;;  %v10034_v2 = vld [vmem:[#allocation2 + $0x28] sm:$0xff]  }
  0x7f   : > { %v874_v35 = vshrl.u32 %v8516_v19, 16  ;;  %v3846_v37 = vshrl.u32 %v10019_v17, 16  ;;  %v1592_v40 = vor.u32 %v1591_v30, %v1587_v21  ;;  %v1596_v41 = vrot.slane %v1594_v22, 1  ;;  %v10031_v7 = vld [vmem:[#allocation2 + $0x14] sm:$0xff]  }
  0x80   : > { %v3837_v23 = vsel %vm1585_vm10, %v3832_v16, %v3836_v61  ;;  %v3840_v27 = vor.u32 %v3838_v9, %v3836_v61  ;;  %v10020_v28 = vld [vmem:[#allocation2 + $0xb0] sm:$0xff]   ;;  %v3844_v32 = vrot.slane %v3842_v25, 1  ;;  %v877_v34 = vshll.u32 %v8516_v19, 16  ;;  %v10038_v29 = vld [vmem:[#allocation2 + $0x38] sm:$0xff]  }
  0x81   : > { %v872_v43 = vrot.slane %v868_v14, 4  ;;  %v876_v44 = vrot.slane %v874_v35, 7  ;;  %v1602_v46 = vshll.u32 %v10027_v26, 16  ;;  %v1597_v54 = vsel %vm1585_vm10, %v1592_v40, %v1596_v41  ;;  %v10036_v21 = vld [vmem:[#allocation2 + $0x30] sm:$0xff]  }
  0x82   : > { %v3845_v18 = vsel %vm1585_vm10, %v3840_v27, %v3844_v32  ;;  %v3848_v51 = vor.u32 %v3846_v37, %v3844_v32  ;;  %v1606_v57 = vshrl.u32 %v10027_v26, 16  ;;  %v1610_v58 = vshll.u32 %v10029_v42, 16 }
  0x83   : > { %8978 = vmatmul.mubr.msk.bf16.gmra.mrb[36].mxu1 %vm1061_vm3, %v10014_v47  ;;  %v10021_v45 = vld [vmem:[#allocation2 + $0xb4] sm:$0xff]   ;;  %v879_v50 = vor.u32 %v877_v34, %v876_v44  ;;  %v881_v36 = vrot.slane %v876_v44, 4  ;;  %v1604_v62 = vrot.slane %v1602_v46, 1  ;;  %v1600_v24 = vor.u32 %v1598_v33, %v1596_v41  ;;  %v10033_v33 = vld [vmem:[#allocation2 + $0x1c] sm:$0xff]   ;;  %v10035_v41 = vld [vmem:[#allocation2 + $0x24] sm:$0xff]  }
  0x84   : > { %8981 = vmatprep.mubr.msk.bf16.mxu1 %vm1061_vm3, %v10016_v48  ;;  %v10022_v47 = vld [vmem:[#allocation2 + $0xb8] sm:$0xff]   ;;  %v3850_v53 = vshll.u32 %v10021_v45, 16  ;;  %v3854_v39 = vshrl.u32 %v10021_v45, 16  ;;  %v1612_v1 = vrot.slane %v1610_v58, 1  ;;  %v3874_v4 = vshll.u32 %v10028_v55, 16  ;;  %v10040_v46 = vld [vmem:[#allocation2 + $0x40] sm:$0xff]  }
  0x85   : > { %9174 = vmatmul.mubr.msk.bf16.gmra.mrb[32].mxu0 %vm1061_vm3, %v3829_v15  ;;  %v880_v56 = vsel %vm10453_vm8, %v872_v43, %v879_v50  ;;  %v890_v48 = vsel %vm10461_vm9, %v881_v36, %v889_v38  ;;  %v10023_v59 = vld [vmem:[#allocation2 + $0xbc] sm:$0xff]   ;;  %v1608_v31 = vor.u32 %v1606_v57, %v1604_v62  ;;  %v1614_v9 = vshrl.u32 %v10029_v42, 16  ;;  %v10039_v57 = vld [vmem:[#allocation2 + $0x34] sm:$0xff]  }
  0x86   : > { %9177 = vmatprep.mubr.msk.bf16.mxu0 %vm1061_vm3, %v3837_v23  ;;  %v3852_v49 = vrot.slane %v3850_v53, 1  ;;  %888 = vst.msk [vmem:[#allocation2 + $0xc4] sm:$0xf] %vm251_vm1, %v880_v56  ;;  %891 = vst [vmem:[#allocation2 + $0xc8] sm:$0x1] %v890_v48  ;;  %v3858_v0 = vshll.u32 %v10023_v59, 16  ;;  %v1605_v13 = vsel %vm1585_vm10, %v1600_v24, %v1604_v62 }
  0x87   : > { %v3862_v8 = vshrl.u32 %v10023_v59, 16  ;;  %v1618_v10 = vshll.u32 %v10032_v60, 16  ;;  %v1613_v15 = vsel %vm1585_vm10, %v1608_v31, %v1612_v1  ;;  %v1626_v16 = vshll.u32 %v10034_v2, 16  ;;  %v10042_v53 = vld [vmem:[#allocation2 + $0x48] sm:$0xff]  }
  0x88   : > { %v3853_v63 = vsel %vm1585_vm10, %v3848_v51, %v3852_v49  ;;  %v3856_v52 = vor.u32 %v3854_v39, %v3852_v49  ;;  %v3860_v3 = vrot.slane %v3858_v0, 1  ;;  %vm2400_vm11 = vcmask 1046528   ;;  %v8266_v31 = vld [vmem:[%s11662_s2 + $0xc] sm:$0x3] }
  0x89   : > { %v1620_v20 = vrot.slane %v1618_v10, 1  ;;  %v4496_v5 = vrot.slane %v10030_v6, 1  ;;  %v4497_v22 = vrot.slane %v10031_v7, 1  ;;  %v1616_v23 = vor.u32 %v1614_v9, %v1612_v1  ;;  %9929 = vmatprep.subr.msk.bf16.mxu0 %vm1134_vm0, %v8266_v31  ;;  %v10041_v6 = vld [vmem:[#allocation2 + $0x3c] sm:$0xff]   ;;  %v10043_v10 = vld [vmem:[#allocation2 + $0x44] sm:$0xff]  }
  0x8a   : > { %v3861_v12 = vsel %vm1585_vm10, %v3856_v52, %v3860_v3  ;;  %v3864_v61 = vor.u32 %v3862_v8, %v3860_v3  ;;  %v3876_v26 = vrot.slane %v3874_v4, 1  ;;  %v1634_v35 = vshll.u32 %v10036_v21, 16  ;;  %v10044_v52 = vld [vmem:[#allocation2 + $0x50] sm:$0xff]   ;;  %v10046_v3 = vld [vmem:[#allocation2 + $0x58] sm:$0xff]  }
  0x8b   : > { %8982 = vmatmul.mubr.msk.bf16.gmra.mrb[40].mxu1 %vm1061_vm3, %v10018_v11  ;;  %v1622_v11 = vshrl.u32 %v10032_v60, 16  ;;  %v4498_v37 = vsel %vm2400_vm11, %v4496_v5, %v4497_v22  ;;  %v1621_v40 = vsel %vm1585_vm10, %v1616_v23, %v1620_v20  ;;  %v1630_v34 = vshrl.u32 %v10034_v2, 16  ;;  %v10045_v23 = vld [vmem:[#allocation2 + $0x4c] sm:$0xff]  }
  0x8c   : > { %8985 = vmatprep.mubr.msk.bf16.mxu1 %vm1061_vm3, %v10020_v28  ;;  %v1628_v28 = vrot.slane %v1626_v16, 1  ;;  %v1638_v43 = vshrl.u32 %v10036_v21, 16  ;;  %v1642_v44 = vshll.u32 %v10038_v29, 16  ;;  %v1636_v45 = vrot.slane %v1634_v35, 1 }
  0x8d   : > { %9178 = vmatmul.mubr.msk.bf16.gmra.mrb[36].mxu0 %vm1061_vm3, %v3845_v18  ;;  %v10026_v14 = vld [vmem:[#allocation2 + $0xc4] sm:$0xff]   ;;  %v1624_v27 = vor.u32 %v1622_v11, %v1620_v20  ;;  %v4499_v18 = vrot.slane %v10033_v33, 1  ;;  %v1650_v55 = vshll.u32 %v10040_v46, 16  ;;  %v1646_v58 = vshrl.u32 %v10038_v29, 16 }
  0x8e   : > { %9181 = vmatprep.mubr.msk.bf16.mxu0 %vm1061_vm3, %v3853_v63  ;;  %v3866_v17 = vshll.u32 %v10026_v14, 16  ;;  %v3870_v19 = vshrl.u32 %v10026_v14, 16  ;;  %v1632_v50 = vor.u32 %v1630_v34, %v1628_v28  ;;  %v1640_v36 = vor.u32 %v1638_v43, %v1636_v45  ;;  %v10054_v43 = vld [vmem:[#allocation2 + $0x78] sm:$0xff]  }
  0x8f   : > { %v1629_v42 = vsel %vm1585_vm10, %v1624_v27, %v1628_v28  ;;  %v1644_v51 = vrot.slane %v1642_v44, 1  ;;  %v4500_v39 = vsel %vm2400_vm11, %v4497_v22, %v4499_v18  ;;  %v1654_v59 = vshrl.u32 %v10040_v46, 16  ;;  %v10050_v22 = vld [vmem:[#allocation2 + $0x68] sm:$0xff]  }
  0x90   : > { %v3868_v25 = vrot.slane %v3866_v17, 1  ;;  %v1637_v48 = vsel %vm1585_vm10, %v1632_v50, %v1636_v45  ;;  %v1658_v62 = vshll.u32 %v10042_v53, 16  ;;  %v1652_v63 = vrot.slane %v1650_v55, 1 }
  0x91   : > { %v1645_v49 = vsel %vm1585_vm10, %v1640_v36, %v1644_v51  ;;  %v4505_v0 = vrot.slane %v10039_v57, 1  ;;  %v1648_v24 = vor.u32 %v1646_v58, %v1644_v51  ;;  %v1666_v7 = vshll.u32 %v10044_v52, 16  ;;  %v10056_v58 = vld [vmem:[#allocation2 + $0x80] sm:$0xff]  }
  0x92   : > { %v3869_v30 = vsel %vm1585_vm10, %v3864_v61, %v3868_v25  ;;  %v3872_v32 = vor.u32 %v3870_v19, %v3868_v25  ;;  %v1656_v1 = vor.u32 %v1654_v59, %v1652_v63  ;;  %v1660_v2 = vrot.slane %v1658_v62, 1  ;;  %v10048_v61 = vld [vmem:[#allocation2 + $0x60] sm:$0xff]  }
  0x93   : > { %8986 = vmatmul.mubr.msk.bf16.gmra.mrb[44].mxu1 %vm1061_vm3, %v10022_v47  ;;  %v4501_v47 = vrot.slane %v10035_v41, 1  ;;  %v1653_v9 = vsel %vm1585_vm10, %v1648_v24, %v1652_v63  ;;  %v1662_v11 = vshrl.u32 %v10042_v53, 16  ;;  %v1674_v14 = vshll.u32 %v10046_v3, 16  ;;  %v10051_v53 = vld [vmem:[#allocation2 + $0x64] sm:$0xff]  }
  0x94   : > { %8991 = vmatprep.mubr.msk.bf16.mxu1 %vm1061_vm3, %v1597_v54  ;;  %v3877_v38 = vsel %vm1585_vm10, %v3872_v32, %v3876_v26  ;;  %v10037_v54 = vld [vmem:[#allocation2 + $0x2c] sm:$0xff]   ;;  %v1668_v16 = vrot.slane %v1666_v7, 1  ;;  %v4509_v17 = vrot.slane %v10043_v10, 1  ;;  %v5232_v20 = vsel %vm1134_vm0, %v8266_v31, 0  ;;  %v10047_v26 = vld [vmem:[#allocation2 + $0x54] sm:$0xff]  }
  0x95   : > { %9182 = vmatmul.mubr.msk.bf16.gmra.mrb[40].mxu0 %vm1061_vm3, %v3861_v12  ;;  %v4502_v56 = vsel %vm2400_vm11, %v4499_v18, %v4501_v47  ;;  %v4503_v60 = vrot.slane %v10037_v54, 1  ;;  %v1661_v12 = vsel %vm1585_vm10, %v1656_v1, %v1660_v2  ;;  %v1664_v19 = vor.u32 %v1662_v11, %v1660_v2  ;;  %v10049_v18 = vld [vmem:[#allocation2 + $0x5c] sm:$0xff]   ;;  %v10058_v63 = vld [vmem:[#allocation2 + $0x88] sm:$0xff]   ;;  %v10055_v2 = vld [vmem:[#allocation2 + $0x74] sm:$0xff]  }
  0x96   : > { %9185 = vmatprep.mubr.msk.bf16.mxu0 %vm1061_vm3, %v3869_v30  ;;  %v1676_v5 = vrot.slane %v1674_v14, 1  ;;  %v1682_v27 = vshll.u32 %v10048_v61, 16  ;;  %v1678_v30 = vshrl.u32 %v10046_v3, 16  ;;  %v1686_v33 = vshrl.u32 %v10048_v61, 16 }
  0x97   : > { %v4504_v4 = vsel %vm2400_vm11, %v4501_v47, %v4503_v60  ;;  %v4506_v8 = vsel %vm2400_vm11, %v4503_v60, %v4505_v0  ;;  %v1669_v29 = vsel %vm1585_vm10, %v1664_v19, %v1668_v16  ;;  %v1690_v35 = vshll.u32 %v10050_v22, 16 }
  0x98   : > { %v4513_v41 = vrot.slane %v10047_v26, 1  ;;  %v1684_v34 = vrot.slane %v1682_v27, 1  ;;  %v1706_v55 = vshll.u32 %v10054_v43, 16  ;;  %v1714_v24 = vshll.u32 %v10056_v58, 16 }
  0x99   : > { %v1692_v46 = vrot.slane %v1690_v35, 1  ;;  %v1710_v3 = vshrl.u32 %v10054_v43, 16  ;;  %v1722_v7 = vshll.u32 %v10058_v63, 16  ;;  %v4521_v11 = vrot.slane %v10055_v2, 1  ;;  %v10066_v35 = vld [vmem:[#allocation2 + $0xa8] sm:$0xff]  }
  0x9a   : > { %v1688_v45 = vor.u32 %v1686_v33, %v1684_v34  ;;  %v1708_v60 = vrot.slane %v1706_v55, 1  ;;  %v1716_v10 = vrot.slane %v1714_v24, 1  ;;  %vm10269_vm12 = vmmov 0  }
  0x9b   : > { %8992 = vmatmul.mubr.msk.bf16.vlgmr.msra.gmra.mrb[0].mxu1 %vm1061_vm3, %v1605_v13  ;;  %v1670_v13 = vshrl.u32 %v10044_v52, 16  ;;  %v1724_v14 = vrot.slane %v1722_v7, 1  ;;  %v10071_v7 = vld [vmem:[#allocation2 + $0xb4] sm:$0xff]  }
  0x9c   : > { %8995 = vmatprep.mubr.msk.bf16.mxu1 %vm1061_vm3, %v1613_v15  ;;  %v4507_v15 = vrot.slane %v10041_v6, 1  ;;  %v1718_v6 = vshrl.u32 %v10056_v58, 16 }
  0x9d   : > { %9186 = vmatmul.mubr.msk.bf16.gmra.mrb[44].mxu0 %vm1061_vm3, %v3877_v38  ;;  %v1672_v21 = vor.u32 %v1670_v13, %v1668_v16  ;;  %v8067_v38 = vld [vmem:[%s11662_s2 + $0x4] sm:$0x3]  ;;  %v10057_v16 = vld [vmem:[#allocation2 + $0x7c] sm:$0xff]  }
  0x9e   : > { %9191 = vmatprep.mubr.msk.bf16.mxu0 %vm1061_vm3, %v4498_v37  ;;  %v4508_v25 = vsel %vm2400_vm11, %v4505_v0, %v4507_v15  ;;  %v4510_v28 = vsel %vm2400_vm11, %v4507_v15, %v4509_v17  ;;  %v10052_v37 = vld [vmem:[#allocation2 + $0x70] sm:$0xff]   ;;  %9925 = vmatprep.subr.msk.bf16.mxu1 %vm1134_vm0, %v8067_v38  ;;  %v2523_v44 = vsel %vm1134_vm0, %v8067_v38, 0  ;;  %v1720_v13 = vor.u32 %v1718_v6, %v1716_v10  ;;  %v10062_v15 = vld [vmem:[#allocation2 + $0x98] sm:$0xff]  }
  0x9f   : > { %v1677_v32 = vsel %vm1585_vm10, %v1672_v21, %v1676_v5  ;;  %v1698_v47 = vshll.u32 %v10052_v37, 16  ;;  %9040 = vmatpush3.bf16.msra.mxu1 %v2523_v44  ;;  %v1702_v54 = vshrl.u32 %v10052_v37, 16  ;;  %v10053_v0 = vld [vmem:[#allocation2 + $0x6c] sm:$0xff]   ;;  %v10059_v21 = vld [vmem:[#allocation2 + $0x84] sm:$0xff]   ;;  %v4523_v26 = vrot.slane %v10057_v16, 1 }
  0xa0   : > { %v10061_v37 = vld [vmem:[#allocation2 + $0x8c] sm:$0xff]   ;;  %v1742_v43 = vshrl.u32 %v10062_v15, 16 }
  0xa1   : > { %v1700_v57 = vrot.slane %v1698_v47, 1 }
  0xa3   : > { %8996 = vmatmul.mubr.msk.bf16.gmra.mrb[4].mxu1 %vm1061_vm3, %v1621_v40  ;;  %v4511_v40 = vrot.slane %v10045_v23, 1  ;;  %v1704_v62 = vor.u32 %v1702_v54, %v1700_v57  ;;  %v10070_v54 = vld [vmem:[#allocation2 + $0xb8] sm:$0xff]  }
  0xa4   : > { %8999 = vmatprep.mubr.msk.bf16.mxu1 %vm1061_vm3, %v1629_v42  ;;  %v1680_v42 = vor.u32 %v1678_v30, %v1676_v5  ;;  %v1726_v5 = vshrl.u32 %v10058_v63, 16  ;;  %v1770_v63 = vshll.u32 %v10070_v54, 16 }
  0xa5   : > { %9192 = vmatmul.mubr.msk.bf16.vlgmr.msra.gmra.mrb[0].mxu0 %vm1061_vm3, %v4500_v39  ;;  %v4512_v50 = vsel %vm2400_vm11, %v4509_v17, %v4511_v40  ;;  %v4514_v36 = vsel %vm2400_vm11, %v4511_v40, %v4513_v41  ;;  %v1694_v39 = vshrl.u32 %v10050_v22, 16  ;;  %v1725_v22 = vsel %vm1585_vm10, %v1720_v13, %v1724_v14 }
  0xa6   : > { %9195 = vmatprep.mubr.msk.bf16.mxu0 %vm1061_vm3, %v4502_v56  ;;  %9240 = vmatpush3.bf16.msra.mxu0 %v5232_v20  ;;  %v1685_v51 = vsel %vm1585_vm10, %v1680_v42, %v1684_v34  ;;  %v1693_v56 = vsel %vm1585_vm10, %v1688_v45, %v1692_v46  ;;  %v1728_v30 = vor.u32 %v1726_v5, %v1724_v14  ;;  %v10063_v42 = vld [vmem:[#allocation2 + $0x94] sm:$0xff]   ;;  %v1754_v45 = vshll.u32 %v10066_v35, 16 }
  0xa7   : > { %v1696_v59 = vor.u32 %v1694_v39, %v1692_v46  ;;  %v4524_v40 = vsel %vm2400_vm11, %v4521_v11, %v4523_v26  ;;  %v4527_v46 = vrot.slane %v10061_v37, 1  ;;  %v1772_v6 = vrot.slane %v1770_v63, 1 }
  0xa8   : > { %v1756_v39 = vrot.slane %v1754_v45, 1 }
  0xa9   : > { %v1701_v1 = vsel %vm1585_vm10, %v1696_v59, %v1700_v57  ;;  %v1758_v59 = vshrl.u32 %v10066_v35, 16 }
  0xab   : > { %9000 = vmatmul.mubr.msk.bf16.gmra.mrb[8].mxu1 %vm1061_vm3, %v1637_v48  ;;  %v4515_v48 = vrot.slane %v10049_v18, 1  ;;  %v1760_v2 = vor.u32 %v1758_v59, %v1756_v39  ;;  %v10091_v59 = vld [vmem:[#allocation2 + $0x48] sm:$0xff]  }
  0xac   : > { %9003 = vmatprep.mubr.msk.bf16.mxu1 %vm1061_vm3, %v1645_v49  ;;  %v4517_v49 = vrot.slane %v10051_v53, 1 }
  0xad   : > { %9196 = vmatmul.mubr.msk.bf16.gmra.mrb[4].mxu0 %vm1061_vm3, %v4504_v4  ;;  %v4516_v52 = vsel %vm2400_vm11, %v4513_v41, %v4515_v48  ;;  %v1709_v4 = vsel %vm1585_vm10, %v1704_v62, %v1708_v60 }
  0xae   : > { %9199 = vmatprep.mubr.msk.bf16.mxu0 %vm1061_vm3, %v4506_v8  ;;  %v4518_v31 = vsel %vm2400_vm11, %v4515_v48, %v4517_v49  ;;  %v10060_v8 = vld [vmem:[#allocation2 + $0x90] sm:$0xff]  }
  0xaf   : > { %v1730_v17 = vshll.u32 %v10060_v8, 16  ;;  %v1734_v23 = vshrl.u32 %v10060_v8, 16 }
  0xb1   : > { %v1732_v27 = vrot.slane %v1730_v17, 1 }
  0xb3   : > { %9004 = vmatmul.mubr.msk.bf16.gmra.mrb[12].mxu1 %vm1061_vm3, %v1653_v9  ;;  %v4519_v9 = vrot.slane %v10053_v0, 1  ;;  %v1733_v38 = vsel %vm1585_vm10, %v1728_v30, %v1732_v27  ;;  %v10825_v0 = vld [vmem:[%s11662_s2 + $0xe] sm:$0x3]  ;;  %v10079_v30 = vld [vmem:[#allocation2 + $0x18] sm:$0xff]  }
  0xb4   : > { %9007 = vmatprep.mubr.msk.bf16.mxu1 %vm1061_vm3, %v1661_v12  ;;  %v1712_v12 = vor.u32 %v1710_v3, %v1708_v60  ;;  %9930 = vmatprep.subr.msk.bf16.mxu0 %vm1134_vm0, %v10825_v0  ;;  %v10069_v3 = vld [vmem:[#allocation2 + $0xac] sm:$0xff]   ;;  %v2406_v37 = vrot.slane %v10079_v30, 1 }
  0xb5   : > { %9200 = vmatmul.mubr.msk.bf16.gmra.mrb[8].mxu0 %vm1061_vm3, %v4508_v25  ;;  %v4520_v61 = vsel %vm2400_vm11, %v4517_v49, %v4519_v9  ;;  %v4522_v19 = vsel %vm2400_vm11, %v4519_v9, %v4521_v11  ;;  %v1738_v25 = vshll.u32 %v10062_v15, 16  ;;  %v10067_v49 = vld [vmem:[#allocation2 + $0xa4] sm:$0xff]   ;;  %v4535_v16 = vrot.slane %v10069_v3, 1  ;;  %v10095_v3 = vld [vmem:[#allocation2 + $0x58] sm:$0xff]  }
  0xb6   : > { %9203 = vmatprep.mubr.msk.bf16.mxu0 %vm1061_vm3, %v4510_v28  ;;  %v1717_v20 = vsel %vm1585_vm10, %v1712_v12, %v1716_v10  ;;  %v10064_v28 = vld [vmem:[#allocation2 + $0xa0] sm:$0xff]   ;;  %v10075_v9 = vld [vmem:[#allocation2 + $0x8] sm:$0xff]   ;;  %v1774_v12 = vshrl.u32 %v10070_v54, 16  ;;  %v10087_v54 = vld [vmem:[#allocation2 + $0x38] sm:$0xff]  }
  0xb7   : > { %v1740_v33 = vrot.slane %v1738_v25, 1  ;;  %v1746_v41 = vshll.u32 %v10064_v28, 16  ;;  %v1750_v18 = vshrl.u32 %v10064_v28, 16  ;;  %v10074_v15 = vld [vmem:[#allocation2] sm:$0xfe]   ;;  %v2402_v5 = vrot.slane %v10075_v9, 1 }
  0xb8   : > { %v1776_v17 = vor.u32 %v1774_v12, %v1772_v6  ;;  %v10076_v25 = vld [vmem:[#allocation2 + $0xc4] sm:$0xff]   ;;  %v10077_v28 = vld [vmem:[#allocation2 + $0x10] sm:$0xff]  }
  0xb9   : > { %v1748_v47 = vrot.slane %v1746_v41, 1  ;;  %v2404_v35 = vrot.slane %v10077_v28, 1  ;;  %v10078_v41 = vld [vmem:[#allocation2 + $0xcc] ss:$0 sps:$4 sm:$0x11]   ;;  %v10097_v9 = vld [vmem:[#allocation2 + $0x60] sm:$0xff]  }
  0xba   : > { %v4543_v45 = vrot.slane %v10078_v41, 1  ;;  %v10099_v12 = vld [vmem:[#allocation2 + $0x68] sm:$0xff]  }
  0xbb   : > { %9008 = vmatmul.mubr.msk.bf16.gmra.mrb[16].mxu1 %vm1061_vm3, %v1669_v29  ;;  %v4525_v29 = vrot.slane %v10059_v21, 1  ;;  %v1752_v53 = vor.u32 %v1750_v18, %v1748_v47  ;;  %v2401_v21 = vrot.slane %v10074_v15, 1  ;;  %v10096_v15 = vld [vmem:[#allocation2 + $0x58] sm:$0xff]  }
  0xbc   : > { %9011 = vmatprep.mubr.msk.bf16.mxu1 %vm1061_vm3, %v1677_v32  ;;  %v1736_v32 = vor.u32 %v1734_v23, %v1732_v27 }
  0xbd   : > { %9204 = vmatmul.mubr.msk.bf16.gmra.mrb[12].mxu0 %vm1061_vm3, %v4512_v50  ;;  %v4526_v34 = vsel %vm2400_vm11, %v4523_v26, %v4525_v29  ;;  %v10068_v50 = vld [vmem:[#allocation2 + $0xb0] sm:$0xff]   ;;  %v4528_v55 = vsel %vm2400_vm11, %v4525_v29, %v4527_v46  ;;  %v1757_v62 = vsel %vm1585_vm10, %v1752_v53, %v1756_v39  ;;  %v2403_v29 = vsel %vm2400_vm11, %v2401_v21, %v2402_v5 }
  0xbe   : > { %9207 = vmatprep.mubr.msk.bf16.mxu0 %vm1061_vm3, %v4514_v36  ;;  %v1741_v44 = vsel %vm1585_vm10, %v1736_v32, %v1740_v33  ;;  %v4529_v36 = vrot.slane %v10063_v42, 1  ;;  %v1762_v48 = vshll.u32 %v10068_v50, 16  ;;  %v1766_v60 = vshrl.u32 %v10068_v50, 16  ;;  %v10081_v42 = vld [vmem:[#allocation2 + $0x20] sm:$0xff]   ;;  %v10085_v53 = vld [vmem:[#allocation2 + $0x30] sm:$0xff]  }
  0xc0   : > { %v4530_v57 = vsel %vm2400_vm11, %v4527_v46, %v4529_v36  ;;  %v2408_v46 = vrot.slane %v10081_v42, 1  ;;  %v10106_v42 = vld [vmem:[#allocation2 + $0x80] sm:$0xff]  }
  0xc3   : > { %9012 = vmatmul.mubr.msk.bf16.gmra.mrb[20].mxu1 %vm1061_vm3, %v1685_v51  ;;  %v1744_v51 = vor.u32 %v1742_v43, %v1740_v33  ;;  %v4541_v33 = vrot.slane %v10076_v25, 1  ;;  %v2407_v43 = vsel %vm2400_vm11, %v2404_v35, %v2406_v37 }
  0xc4   : > { %9015 = vmatprep.mubr.msk.bf16.mxu1 %vm1061_vm3, %v1693_v56  ;;  %v10065_v56 = vld [vmem:[#allocation2 + $0x9c] sm:$0xff]  }
  0xc5   : > { %9208 = vmatmul.mubr.msk.bf16.gmra.mrb[16].mxu0 %vm1061_vm3, %v4516_v52  ;;  %v1749_v58 = vsel %vm1585_vm10, %v1744_v51, %v1748_v47  ;;  %v10072_v52 = vld [vmem:[#allocation2 + $0xc0] ss:$0 sps:$4 sm:$0x11]   ;;  %v4531_v24 = vrot.slane %v10065_v56, 1  ;;  %v4544_v50 = vsel %vm2400_vm11, %v4541_v33, %v4543_v45  ;;  %v2409_v51 = vsel %vm2400_vm11, %v2406_v37, %v2408_v46  ;;  %v10109_v37 = vld [vmem:[#allocation2 + $0x90] sm:$0xff]  }
  0xc6   : > { %9211 = vmatprep.mubr.msk.bf16.mxu0 %vm1061_vm3, %v4518_v31  ;;  %v1764_v31 = vrot.slane %v1762_v48, 1  ;;  %v1778_v13 = vshll.u32 %v10072_v52, 16  ;;  %v2414_v56 = vrot.slane %v10087_v54, 1  ;;  %v10082_v48 = vld [vmem:[#allocation2 + $0x20] sm:$0xff]   ;;  %v10086_v52 = vld [vmem:[#allocation2 + $0x30] sm:$0xff]  }
  0xc7   : > { %v4532_v8 = vsel %vm2400_vm11, %v4529_v36, %v4531_v24  ;;  %v10080_v36 = vld [vmem:[#allocation2 + $0x18] sm:$0xff]   ;;  %v10113_v45 = vld [vmem:[#allocation2 + $0xa0] sm:$0xff]   ;;  %v10117_v54 = vld [vmem:[#allocation2 + $0xb0] sm:$0xff]  }
  0xc8   : > { %v1765_v11 = vsel %vm1585_vm10, %v1760_v2, %v1764_v31 }
  0xcb   : > { %9016 = vmatmul.mubr.msk.bf16.gmra.mrb[24].mxu1 %vm1061_vm3, %v1701_v1  ;;  %v4533_v1 = vrot.slane %v10067_v49, 1  ;;  %v10089_v49 = vld [vmem:[#allocation2 + $0x40] sm:$0xff]  }
  0xcc   : > { %9019 = vmatprep.mubr.msk.bf16.mxu1 %vm1061_vm3, %v1709_v4  ;;  %v1768_v4 = vor.u32 %v1766_v60, %v1764_v31  ;;  %v2416_v63 = vrot.slane %v10089_v49, 1  ;;  %v10088_v31 = vld [vmem:[#allocation2 + $0x38] sm:$0xff]   ;;  %v10116_v49 = vld [vmem:[#allocation2 + $0xa8] sm:$0xff]  }
  0xcd   : > { %9212 = vmatmul.mubr.msk.bf16.gmra.mrb[20].mxu0 %vm1061_vm3, %v4520_v61  ;;  %v4534_v10 = vsel %vm2400_vm11, %v4531_v24, %v4533_v1  ;;  %v4537_v61 = vrot.slane %v10071_v7, 1  ;;  %v4536_v23 = vsel %vm2400_vm11, %v4533_v1, %v4535_v16  ;;  %v2418_v24 = vrot.slane %v10091_v59, 1  ;;  %v10093_v1 = vld [vmem:[#allocation2 + $0x50] sm:$0xff]   ;;  %v10092_v7 = vld [vmem:[#allocation2 + $0x48] sm:$0xff]  }
  0xce   : > { %9215 = vmatprep.mubr.msk.bf16.mxu0 %vm1061_vm3, %v4522_v19  ;;  %v1773_v14 = vsel %vm1585_vm10, %v1768_v4, %v1772_v6  ;;  %v1780_v19 = vrot.slane %v1778_v13, 1  ;;  %v2417_v2 = vsel %vm2400_vm11, %v2414_v56, %v2416_v63  ;;  %v2420_v4 = vrot.slane %v10093_v1, 1  ;;  %v10090_v6 = vld [vmem:[#allocation2 + $0x40] sm:$0xff]   ;;  %v10123_v1 = vld [vmem:[#allocation2 + $0xc] sm:$0xff]  }
  0xcf   : > { %v4538_v26 = vsel %vm2400_vm11, %v4535_v16, %v4537_v61  ;;  %v2424_v13 = vrot.slane %v10097_v9, 1  ;;  %v2426_v16 = vrot.slane %v10099_v12, 1  ;;  %v10131_v12 = vld [vmem:[#allocation2 + $0x28] sm:$0xff]  }
  0xd0   : > { %v1781_v27 = vsel %vm1585_vm10, %v1776_v17, %v1780_v19 }
  0xd1   : > { %v2427_v19 = vsel %vm2400_vm11, %v2424_v13, %v2426_v16 }
  0xd3   : > { %9020 = vmatmul.mubr.msk.bf16.gmra.mrb[28].mxu1 %vm1061_vm3, %v1717_v20  ;;  %v8117_v20 = vld [vmem:[%s11662_s2 + $0x6] sm:$0x3] }
  0xd4   : > { %9023 = vmatprep.mubr.msk.bf16.mxu1 %vm1061_vm3, %v1725_v22  ;;  %9926 = vmatprep.subr.msk.bf16.mxu1 %vm1134_vm0, %v8117_v20  ;;  %v10073_v22 = vld [vmem:[#allocation2 + $0xbc] sm:$0xff]   ;;  %v3137_v18 = vsel %vm1134_vm0, %v8117_v20, 0 }
  0xd5   : > { %9216 = vmatmul.mubr.msk.bf16.gmra.mrb[24].mxu0 %vm1061_vm3, %v4524_v40  ;;  %v4539_v32 = vrot.slane %v10073_v22, 1  ;;  %v10103_v20 = vld [vmem:[#allocation2 + $0x78] sm:$0xff]   ;;  %v10098_v22 = vld [vmem:[#allocation2 + $0x60] sm:$0xff]  }
  0xd6   : > { %9219 = vmatprep.mubr.msk.bf16.mxu0 %vm1061_vm3, %v4526_v34  ;;  %v2430_v25 = vrot.slane %v10103_v20, 1 }
  0xd7   : > { %v4540_v40 = vsel %vm2400_vm11, %v4537_v61, %v4539_v32  ;;  %v4542_v34 = vsel %vm2400_vm11, %v4539_v32, %v4541_v33  ;;  %v10101_v61 = vld [vmem:[#allocation2 + $0x70] sm:$0xff]   ;;  %v10104_v33 = vld [vmem:[#allocation2 + $0x78] sm:$0xff]  }
  0xd8   : > { %v2428_v21 = vrot.slane %v10101_v61, 1  ;;  %v10102_v32 = vld [vmem:[#allocation2 + $0x70] sm:$0xff]   ;;  %v5793_v61 = vshll.u32 %v10131_v12, 16 }
  0xda   : > { %v2431_v28 = vsel %vm2400_vm11, %v2428_v21, %v2430_v25 }
  0xdb   : > { %9024 = vmatmul.mubr.msk.bf16.gmra.mrb[32].mxu1 %vm1061_vm3, %v1733_v38  ;;  %v2405_v38 = vsel %vm2400_vm11, %v2402_v5, %v2404_v35  ;;  %v10896_v5 = vld [vmem:[%s11662_s2 + $0x10] sm:$0x3] }
  0xdc   : > { %9027 = vmatprep.mubr.msk.bf16.mxu1 %vm1061_vm3, %v1741_v44  ;;  %v10083_v44 = vld [vmem:[#allocation2 + $0x28] sm:$0xff]  }
  0xdd   : > { %9220 = vmatmul.mubr.msk.bf16.gmra.mrb[28].mxu0 %vm1061_vm3, %v4528_v55  ;;  %v2410_v47 = vrot.slane %v10083_v44, 1  ;;  %v2412_v55 = vrot.slane %v10085_v53, 1  ;;  %v10108_v44 = vld [vmem:[#allocation2 + $0x88] sm:$0xff]   ;;  %v10112_v53 = vld [vmem:[#allocation2 + $0x98] sm:$0xff]  }
  0xde   : > { %9223 = vmatprep.mubr.msk.bf16.mxu0 %vm1061_vm3, %v4530_v57  ;;  %v10084_v57 = vld [vmem:[#allocation2 + $0x28] sm:$0xff]  }
  0xdf   : > { %v2411_v39 = vsel %vm2400_vm11, %v2408_v46, %v2410_v47  ;;  %v2415_v60 = vsel %vm2400_vm11, %v2412_v55, %v2414_v56  ;;  %v10119_v56 = vld [vmem:[#allocation2 + $0xb8] sm:$0xff]  }
  0xe3   : > { %9028 = vmatmul.mubr.msk.bf16.gmra.mrb[36].mxu1 %vm1061_vm3, %v1749_v58  ;;  %v2413_v58 = vsel %vm2400_vm11, %v2410_v47, %v2412_v55  ;;  %v10115_v47 = vld [vmem:[#allocation2 + $0xa8] sm:$0xff]  }
  0xe4   : > { %9031 = vmatprep.mubr.msk.bf16.mxu1 %vm1061_vm3, %v1757_v62  ;;  %v6046_v62 = vsel %vm1134_vm0, %v10825_v0, 0  ;;  %v2419_v0 = vsel %vm2400_vm11, %v2416_v63, %v2418_v24 }
  0xe5   : > { %9224 = vmatmul.mubr.msk.bf16.gmra.mrb[32].mxu0 %vm1061_vm3, %v4532_v8  ;;  %v2422_v8 = vrot.slane %v10095_v3, 1 }
  0xe6   : > { %9227 = vmatprep.mubr.msk.bf16.mxu0 %vm1061_vm3, %v4534_v10  ;;  %v2421_v10 = vsel %vm2400_vm11, %v2418_v24, %v2420_v4  ;;  %v10120_v24 = vld [vmem:[#allocation2 + $0xb8] sm:$0xff]  }
  0xe7   : > { %v2425_v17 = vsel %vm2400_vm11, %v2422_v8, %v2424_v13 }
  0xeb   : > { %9032 = vmatmul.mubr.msk.bf16.gmra.mrb[40].mxu1 %vm1061_vm3, %v1765_v11  ;;  %v2423_v11 = vsel %vm2400_vm11, %v2420_v4, %v2422_v8  ;;  %v10122_v4 = vld [vmem:[#allocation2 + $0xc0] sm:$0xff]  }
  0xec   : > { %9035 = vmatprep.mubr.msk.bf16.mxu1 %vm1061_vm3, %v1773_v14  ;;  %v10094_v14 = vld [vmem:[#allocation2 + $0x50] sm:$0xff]   ;;  %v10127_v8 = vld [vmem:[#allocation2 + $0x1c] sm:$0xff]  }
  0xed   : > { %9228 = vmatmul.mubr.msk.bf16.gmra.mrb[36].mxu0 %vm1061_vm3, %v4536_v23  ;;  %v10100_v23 = vld [vmem:[#allocation2 + $0x68] sm:$0xff]  }
  0xee   : > { %9231 = vmatprep.mubr.msk.bf16.mxu0 %vm1061_vm3, %v4538_v26  ;;  %v10105_v26 = vld [vmem:[#allocation2 + $0x80] sm:$0xff]  }
  0xef   : > { %v2432_v30 = vrot.slane %v10105_v26, 1  ;;  %v10135_v26 = vld [vmem:[#allocation2 + $0x38] sm:$0xff]  }
  0xf3   : > { %9036 = vmatmul.mubr.msk.bf16.gmra.mrb[44].mxu1 %vm1061_vm3, %v1781_v27  ;;  %v2429_v27 = vsel %vm2400_vm11, %v2426_v16, %v2428_v21  ;;  %v10126_v16 = vld [vmem:[#allocation2 + $0xd0] sm:$0xff]  }
  0xf4   : > { %9041 = vmatprep.mubr.msk.bf16.mxu1 %vm1061_vm3, %v2403_v29  ;;  %v10107_v29 = vld [vmem:[#allocation2 + $0x88] sm:$0xff]  }
  0xf5   : > { %9232 = vmatmul.mubr.msk.bf16.gmra.mrb[40].mxu0 %vm1061_vm3, %v4540_v40  ;;  %v2434_v35 = vrot.slane %v10107_v29, 1  ;;  %v2433_v40 = vsel %vm2400_vm11, %v2430_v25, %v2432_v30  ;;  %v10132_v21 = vld [vmem:[#allocation2 + $0x2c] sm:$0xff]   ;;  %v5795_v25 = vrot.slane %v5793_v61, 1 }
  0xf6   : > { %9235 = vmatprep.mubr.msk.bf16.mxu0 %vm1061_vm3, %v4542_v34  ;;  %v10111_v34 = vld [vmem:[#allocation2 + $0x98] sm:$0xff]  }
  0xf7   : > { %v2435_v41 = vsel %vm2400_vm11, %v2432_v30, %v2434_v35  ;;  %v10137_v30 = vld [vmem:[#allocation2 + $0x40] sm:$0xff]  }
  0xfb   : > { %9042 = vmatmul.mubr.msk.bf16.vlgmr.msra.gmra.mrb[0].mxu1 %vm1061_vm3, %v2405_v38  ;;  %v2436_v38 = vrot.slane %v10109_v37, 1 }
  0xfc   : > { %9045 = vmatprep.mubr.msk.bf16.mxu1 %vm1061_vm3, %v2407_v43  ;;  %9090 = vmatpush3.bf16.msra.mxu1 %v3137_v18  ;;  %v2438_v43 = vrot.slane %v10111_v34, 1  ;;  %v5813_v34 = vshrl.u32 %v10135_v26, 16 }
  0xfd   : > { %9236 = vmatmul.mubr.msk.bf16.gmra.mrb[44].mxu0 %vm1061_vm3, %v4544_v50  ;;  %v2437_v18 = vsel %vm2400_vm11, %v2434_v35, %v2436_v38  ;;  %v2440_v50 = vrot.slane %v10113_v45, 1  ;;  %v10134_v35 = vld [vmem:[#allocation2 + $0x34] sm:$0xff]  }
  0xfe   : > { %9241 = vmatprep.mubr.msk.bf16.mxu0 %vm1061_vm3, %v10080_v36  ;;  %v2439_v46 = vsel %vm2400_vm11, %v2436_v38, %v2438_v43  ;;  %v2442_v36 = vrot.slane %v10115_v47, 1  ;;  %v5817_v38 = vshll.u32 %v10137_v30, 16  ;;  %v10141_v47 = vld [vmem:[#allocation2 + $0x50] sm:$0xff]  }
 0x100   : > { %v2443_v55 = vsel %vm2400_vm11, %v2440_v50, %v2442_v36 }
 0x103   : > { %9046 = vmatmul.mubr.msk.bf16.gmra.mrb[4].mxu1 %vm1061_vm3, %v2409_v51  ;;  %v10110_v51 = vld [vmem:[#allocation2 + $0x90] sm:$0xff]  }
 0x104   : > { %9049 = vmatprep.mubr.msk.bf16.mxu1 %vm1061_vm3, %v2411_v39  ;;  %v2441_v39 = vsel %vm2400_vm11, %v2438_v43, %v2440_v50 }
 0x105   : > { %9242 = vmatmul.mubr.msk.bf16.vlgmr.msra.gmra.mrb[0].mxu0 %vm1061_vm3, %v10082_v48  ;;  %v2444_v48 = vrot.slane %v10117_v54, 1 }
 0x106   : > { %9245 = vmatprep.mubr.msk.bf16.mxu0 %vm1061_vm3, %v10084_v57  ;;  %9290 = vmatpush3.bf16.msra.mxu0 %v6046_v62  ;;  %v2446_v57 = vrot.slane %v10119_v56, 1  ;;  %v10121_v62 = vld [vmem:[#allocation2 + $0xc0] ss:$0 sps:$4 sm:$0x11]  }
 0x107   : > { %9931 = vmatprep.subr.msk.bf16.mxu0 %vm1134_vm0, %v10896_v5  ;;  %v2445_v59 = vsel %vm2400_vm11, %v2442_v36, %v2444_v48  ;;  %v2448_v63 = vrot.slane %v10121_v62, 1 }
 0x10b   : > { %9050 = vmatmul.mubr.msk.bf16.gmra.mrb[8].mxu1 %vm1061_vm3, %v2413_v58  ;;  %v10114_v58 = vld [vmem:[#allocation2 + $0xa0] sm:$0xff]  }
 0x10c   : > { %9053 = vmatprep.mubr.msk.bf16.mxu1 %vm1061_vm3, %v2415_v60  ;;  %v2447_v60 = vsel %vm2400_vm11, %v2444_v48, %v2446_v57  ;;  %v10143_v48 = vld [vmem:[#allocation2 + $0x58] sm:$0xff]  }
 0x10d   : > { %9246 = vmatmul.mubr.msk.bf16.gmra.mrb[4].mxu0 %vm1061_vm3, %v10086_v52  ;;  %v10118_v52 = vld [vmem:[#allocation2 + $0xb0] sm:$0xff]   ;;  %v5841_v62 = vshll.u32 %v10143_v48, 16 }
 0x10e   : > { %9249 = vmatprep.mubr.msk.bf16.mxu0 %vm1061_vm3, %v10088_v31  ;;  %v2449_v31 = vsel %vm2400_vm11, %v2446_v57, %v2448_v63  ;;  %v10142_v63 = vld [vmem:[#allocation2 + $0x54] sm:$0xff]  }
 0x113   : > { %9054 = vmatmul.mubr.msk.bf16.gmra.mrb[12].mxu1 %vm1061_vm3, %v2417_v2  ;;  %v10128_v2 = vld [vmem:[#allocation2 + $0x18] sm:$0xff]  }
 0x114   : > { %9057 = vmatprep.mubr.msk.bf16.mxu1 %vm1061_vm3, %v2419_v0  ;;  %v10129_v0 = vld [vmem:[#allocation2 + $0x20] sm:$0xff]   ;;  %v5780_v3 = vshll.u32 %v10128_v2, 16  ;;  %v5778_v9 = vshrl.u32 %v10128_v2, 16 }
 0x115   : > { %9250 = vmatmul.mubr.msk.bf16.gmra.mrb[8].mxu0 %vm1061_vm3, %v10090_v6  ;;  %v10124_v6 = vld [vmem:[#allocation2 + $0xc8] sm:$0xff]  }
 0x116   : > { %9253 = vmatprep.mubr.msk.bf16.mxu0 %vm1061_vm3, %v10092_v7  ;;  %v10125_v7 = vld [vmem:[#allocation2 + $0x14] sm:$0xff]  }
 0x11b   : > { %9058 = vmatmul.mubr.msk.bf16.gmra.mrb[16].mxu1 %vm1061_vm3, %v2421_v10  ;;  %v5782_v10 = vrot.slane %v5780_v3, 1  ;;  %v10147_v3 = vld [vmem:[#allocation2 + $0x68] sm:$0xff]  }
 0x11c   : > { %9061 = vmatprep.mubr.msk.bf16.mxu1 %vm1061_vm3, %v2423_v11  ;;  %v5785_v11 = vshll.u32 %v10129_v0, 16 }
 0x11d   : > { %9254 = vmatmul.mubr.msk.bf16.gmra.mrb[12].mxu0 %vm1061_vm3, %v10094_v14  ;;  %v5783_v13 = vor.u32 %v5782_v10, %v5778_v9  ;;  %v5857_v9 = vshll.u32 %v10147_v3, 16 }
 0x11e   : > { %9257 = vmatprep.mubr.msk.bf16.mxu0 %vm1061_vm3, %v10096_v15  ;;  %v5787_v14 = vrot.slane %v5785_v11, 1  ;;  %v10133_v15 = vld [vmem:[#allocation2 + $0x30] sm:$0xff]   ;;  %v10146_v11 = vld [vmem:[#allocation2 + $0x64] sm:$0xff]  }
 0x11f   : > { %v5805_v37 = vshrl.u32 %v10133_v15, 16  ;;  %v5859_v61 = vrot.slane %v5857_v9, 1 }
 0x120   : > { %v5788_v20 = vsel %vm1585_vm10, %v5783_v13, %v5787_v14 }
 0x123   : > { %9062 = vmatmul.mubr.msk.bf16.gmra.mrb[20].mxu1 %vm1061_vm3, %v2425_v17  ;;  %v5789_v17 = vshrl.u32 %v10129_v0, 16  ;;  %v5843_v0 = vrot.slane %v5841_v62, 1 }
 0x124   : > { %9065 = vmatprep.mubr.msk.bf16.mxu1 %vm1061_vm3, %v2427_v19  ;;  %v10130_v19 = vld [vmem:[#allocation2 + $0x24] sm:$0xff]  }
 0x125   : > { %9258 = vmatmul.mubr.msk.bf16.gmra.mrb[16].mxu0 %vm1061_vm3, %v10098_v22  ;;  %v5797_v22 = vshrl.u32 %v10131_v12, 16 }
 0x126   : > { %9261 = vmatprep.mubr.msk.bf16.mxu0 %vm1061_vm3, %v10100_v23  ;;  %v5801_v23 = vshll.u32 %v10133_v15, 16  ;;  %v5861_v15 = vshrl.u32 %v10147_v3, 16 }
 0x128   : > { %v5803_v29 = vrot.slane %v5801_v23, 1 }
 0x12b   : > { %9066 = vmatmul.mubr.msk.bf16.gmra.mrb[24].mxu1 %vm1061_vm3, %v2429_v27  ;;  %v5791_v27 = vor.u32 %v5789_v17, %v5787_v14  ;;  %v10148_v14 = vld [vmem:[#allocation2 + $0x6c] sm:$0xff]   ;;  %v10151_v17 = vld [vmem:[#allocation2 + $0x78] sm:$0xff]  }
 0x12c   : > { %9069 = vmatprep.mubr.msk.bf16.mxu1 %vm1061_vm3, %v2431_v28  ;;  %v5799_v28 = vor.u32 %v5797_v22, %v5795_v25  ;;  %v10153_v22 = vld [vmem:[#allocation2 + $0x80] sm:$0xff]   ;;  %v5873_v23 = vshll.u32 %v10151_v17, 16 }
 0x12d   : > { %9262 = vmatmul.mubr.msk.bf16.gmra.mrb[20].mxu0 %vm1061_vm3, %v10102_v32  ;;  %v5809_v32 = vshll.u32 %v10135_v26, 16  ;;  %v10150_v26 = vld [vmem:[#allocation2 + $0x74] sm:$0xff]  }
 0x12e   : > { %9265 = vmatprep.mubr.msk.bf16.mxu0 %vm1061_vm3, %v10104_v33  ;;  %v5796_v33 = vsel %vm1585_vm10, %v5791_v27, %v5795_v25 }
 0x12f   : > { %v5811_v43 = vrot.slane %v5809_v32, 1  ;;  %v5881_v32 = vshll.u32 %v10153_v22, 16 }
 0x131   : > { %v5815_v45 = vor.u32 %v5813_v34, %v5811_v43  ;;  %v10157_v34 = vld [vmem:[#allocation2 + $0x90] sm:$0xff]  }
 0x133   : > { %9070 = vmatmul.mubr.msk.bf16.gmra.mrb[28].mxu1 %vm1061_vm3, %v2433_v40  ;;  %v5804_v40 = vsel %vm1585_vm10, %v5799_v28, %v5803_v29 }
 0x134   : > { %9073 = vmatprep.mubr.msk.bf16.mxu1 %vm1061_vm3, %v2435_v41  ;;  %v10136_v41 = vld [vmem:[#allocation2 + $0x3c] sm:$0xff]  }
 0x135   : > { %9266 = vmatmul.mubr.msk.bf16.gmra.mrb[24].mxu0 %vm1061_vm3, %v10106_v42  ;;  %v6713_v42 = vsel %vm1134_vm0, %v10896_v5, 0  ;;  %v5821_v5 = vshrl.u32 %v10137_v30, 16  ;;  %v5877_v30 = vshrl.u32 %v10151_v17, 16 }
 0x136   : > { %9269 = vmatprep.mubr.msk.bf16.mxu0 %vm1061_vm3, %v10108_v44  ;;  %v10139_v44 = vld [vmem:[#allocation2 + $0x48] sm:$0xff]  }
 0x137   : > { %v5825_v50 = vshll.u32 %v10139_v44, 16  ;;  %v5829_v54 = vshrl.u32 %v10139_v44, 16  ;;  %v5885_v44 = vshrl.u32 %v10153_v22, 16 }
 0x139   : > { %v5827_v56 = vrot.slane %v5825_v50, 1 }
 0x13b   : > { %9074 = vmatmul.mubr.msk.bf16.gmra.mrb[32].mxu1 %vm1061_vm3, %v2437_v18  ;;  %v5807_v18 = vor.u32 %v5805_v37, %v5803_v29  ;;  %v10152_v29 = vld [vmem:[#allocation2 + $0x7c] sm:$0xff]  }
 0x13c   : > { %9077 = vmatprep.mubr.msk.bf16.mxu1 %vm1061_vm3, %v2439_v46  ;;  %v5819_v46 = vrot.slane %v5817_v38, 1 }
 0x13d   : > { %9270 = vmatmul.mubr.msk.bf16.gmra.mrb[28].mxu0 %vm1061_vm3, %v10110_v51  ;;  %v5812_v36 = vsel %vm1585_vm10, %v5807_v18, %v5811_v43  ;;  %v10138_v51 = vld [vmem:[#allocation2 + $0x44] sm:$0xff]  }
 0x13e   : > { %9273 = vmatprep.mubr.msk.bf16.mxu0 %vm1061_vm3, %v10112_v53  ;;  %v5820_v53 = vsel %vm1585_vm10, %v5815_v45, %v5819_v46  ;;  %v5823_v57 = vor.u32 %v5821_v5, %v5819_v46  ;;  %v10154_v43 = vld [vmem:[#allocation2 + $0x84] sm:$0xff]   ;;  %v10156_v45 = vld [vmem:[#allocation2 + $0x8c] sm:$0xff]  }
 0x143   : > { %9078 = vmatmul.mubr.msk.bf16.gmra.mrb[36].mxu1 %vm1061_vm3, %v2441_v39  ;;  %v10140_v39 = vld [vmem:[#allocation2 + $0x4c] sm:$0xff]  }
 0x144   : > { %9081 = vmatprep.mubr.msk.bf16.mxu1 %vm1061_vm3, %v2443_v55  ;;  %v5833_v55 = vshll.u32 %v10141_v47, 16 }
 0x145   : > { %9274 = vmatmul.mubr.msk.bf16.gmra.mrb[32].mxu0 %vm1061_vm3, %v10114_v58  ;;  %v5831_v58 = vor.u32 %v5829_v54, %v5827_v56 }
 0x146   : > { %9277 = vmatprep.mubr.msk.bf16.mxu0 %vm1061_vm3, %v10116_v49  ;;  %v5835_v49 = vrot.slane %v5833_v55, 1 }
 0x14b   : > { %9082 = vmatmul.mubr.msk.bf16.gmra.mrb[40].mxu1 %vm1061_vm3, %v2445_v59  ;;  %v10145_v59 = vld [vmem:[#allocation2 + $0x60] sm:$0xff]  }
 0x14c   : > { %9085 = vmatprep.mubr.msk.bf16.mxu1 %vm1061_vm3, %v2447_v60  ;;  %v5828_v60 = vsel %vm1585_vm10, %v5823_v57, %v5827_v56  ;;  %v5849_v2 = vshll.u32 %v10145_v59, 16  ;;  %v5853_v12 = vshrl.u32 %v10145_v59, 16  ;;  %v10158_v56 = vld [vmem:[#allocation2 + $0x94] sm:$0xff]  }
 0x14d   : > { %9278 = vmatmul.mubr.msk.bf16.gmra.mrb[36].mxu0 %vm1061_vm3, %v10118_v52  ;;  %v5837_v52 = vshrl.u32 %v10141_v47, 16  ;;  %v5897_v47 = vshll.u32 %v10157_v34, 16 }
 0x14e   : > { %9281 = vmatprep.mubr.msk.bf16.mxu0 %vm1061_vm3, %v10120_v24  ;;  %v5836_v24 = vsel %vm1585_vm10, %v5831_v58, %v5835_v49  ;;  %v10160_v58 = vld [vmem:[#allocation2 + $0x9c] sm:$0xff]  }
 0x153   : > { %9086 = vmatmul.mubr.msk.bf16.gmra.mrb[44].mxu1 %vm1061_vm3, %v2449_v31  ;;  %v10144_v31 = vld [vmem:[#allocation2 + $0x5c] sm:$0xff]  }
 0x154   : > { %9091 = vmatprep.mubr.msk.bf16.mxu1 %vm1061_vm3, %v10123_v1  ;;  %v5845_v1 = vshrl.u32 %v10143_v48, 16  ;;  %v5901_v48 = vshrl.u32 %v10157_v34, 16 }
 0x155   : > { %9282 = vmatmul.mubr.msk.bf16.gmra.mrb[40].mxu0 %vm1061_vm3, %v10122_v4  ;;  %v5839_v4 = vor.u32 %v5837_v52, %v5835_v49 }
 0x156   : > { %9285 = vmatprep.mubr.msk.bf16.mxu0 %vm1061_vm3, %v10124_v6  ;;  %v5847_v6 = vor.u32 %v5845_v1, %v5843_v0 }
 0x157   : > { %v5844_v10 = vsel %vm1585_vm10, %v5839_v4, %v5843_v0  ;;  %v10162_v0 = vld [vmem:[#allocation2 + $0xa4] sm:$0xff]  }
 0x15b   : > { %9092 = vmatmul.mubr.msk.bf16.vlgmr.msra.gmra.mrb[0].mxu1 %vm1061_vm3, %v10125_v7  ;;  %v5851_v7 = vrot.slane %v5849_v2, 1 }
 0x15c   : > { %9095 = vmatprep.mubr.msk.bf16.mxu1 %vm1061_vm3, %v10127_v8  ;;  %v10149_v8 = vld [vmem:[#allocation2 + $0x70] sm:$0xff]  }
 0x15d   : > { %9286 = vmatmul.mubr.msk.bf16.gmra.mrb[44].mxu0 %vm1061_vm3, %v10126_v16  ;;  %v5852_v13 = vsel %vm1585_vm10, %v5847_v6, %v5851_v7  ;;  %v5865_v16 = vshll.u32 %v10149_v8, 16  ;;  %v5869_v27 = vshrl.u32 %v10149_v8, 16  ;;  %v10164_v6 = vld [vmem:[#allocation2 + $0xac] sm:$0xff]  }
 0x15e   : > { %9291 = vmatprep.mubr.msk.bf16.mxu0 %vm1061_vm3, %v5788_v20  ;;  %v5863_v20 = vor.u32 %v5861_v15, %v5859_v61 }
 0x163   : > { %9096 = vmatmul.mubr.msk.bf16.gmra.mrb[4].mxu1 %vm1061_vm3, %v10130_v19  ;;  %v5855_v19 = vor.u32 %v5853_v12, %v5851_v7 }
 0x164   : > { %9099 = vmatprep.mubr.msk.bf16.mxu1 %vm1061_vm3, %v10132_v21  ;;  %v5867_v21 = vrot.slane %v5865_v16, 1 }
 0x165   : > { %9292 = vmatmul.mubr.msk.bf16.vlgmr.msra.gmra.mrb[0].mxu0 %vm1061_vm3, %v5796_v33  ;;  %v5860_v25 = vsel %vm1585_vm10, %v5855_v19, %v5859_v61  ;;  %v5875_v33 = vrot.slane %v5873_v23, 1  ;;  %v10166_v61 = vld [vmem:[#allocation2 + $0xb4] sm:$0xff]  }
 0x166   : > { %9295 = vmatprep.mubr.msk.bf16.mxu0 %vm1061_vm3, %v5804_v40  ;;  %9340 = vmatpush3.bf16.msra.mxu0 %v6713_v42  ;;  %v5868_v28 = vsel %vm1585_vm10, %v5863_v20, %v5867_v21  ;;  %v5871_v37 = vor.u32 %v5869_v27, %v5867_v21  ;;  %v10168_v20 = vld [vmem:[#allocation2 + $0xbc] sm:$0xff]  }
 0x167   : > { %v5879_v40 = vor.u32 %v5877_v30, %v5875_v33 }
 0x168   : > { %v5876_v42 = vsel %vm1585_vm10, %v5871_v37, %v5875_v33  ;;  %v10170_v33 = vld [vmem:[#allocation2 + $0xc4] sm:$0xff]  }
 0x16b   : > { %9100 = vmatmul.mubr.msk.bf16.gmra.mrb[8].mxu1 %vm1061_vm3, %v10134_v35  ;;  %v10155_v35 = vld [vmem:[#allocation2 + $0x88] sm:$0xff]  }
 0x16c   : > { %9103 = vmatprep.mubr.msk.bf16.mxu1 %vm1061_vm3, %v10136_v41  ;;  %v5883_v41 = vrot.slane %v5881_v32, 1  ;;  %v5889_v38 = vshll.u32 %v10155_v35, 16  ;;  %v5893_v46 = vshrl.u32 %v10155_v35, 16 }
 0x16d   : > { %9296 = vmatmul.mubr.msk.bf16.gmra.mrb[4].mxu0 %vm1061_vm3, %v5812_v36  ;;  %v10159_v36 = vld [vmem:[#allocation2 + $0x98] sm:$0xff]  }
 0x16e   : > { %9299 = vmatprep.mubr.msk.bf16.mxu0 %vm1061_vm3, %v5820_v53  ;;  %v5884_v18 = vsel %vm1585_vm10, %v5879_v40, %v5883_v41  ;;  %v5891_v50 = vrot.slane %v5889_v38, 1  ;;  %v5899_v53 = vrot.slane %v5897_v47, 1  ;;  %v5905_v54 = vshll.u32 %v10159_v36, 16 }
 0x16f   : > { %v5909_v49 = vshrl.u32 %v10159_v36, 16  ;;  %v10175_v36 = vld [vmem:[#allocation2 + $0x20] sm:$0xff]  }
 0x170   : > { %v5895_v5 = vor.u32 %v5893_v46, %v5891_v50  ;;  %v5907_v62 = vrot.slane %v5905_v54, 1 }
 0x172   : > { %v5900_v57 = vsel %vm1585_vm10, %v5895_v5, %v5899_v53  ;;  %v5911_v52 = vor.u32 %v5909_v49, %v5907_v62 }
 0x173   : > { %9104 = vmatmul.mubr.msk.bf16.gmra.mrb[12].mxu1 %vm1061_vm3, %v10138_v51  ;;  %v5887_v51 = vor.u32 %v5885_v44, %v5883_v41 }
 0x174   : > { %9107 = vmatprep.mubr.msk.bf16.mxu1 %vm1061_vm3, %v10140_v39  ;;  %v10161_v39 = vld [vmem:[#allocation2 + $0xa0] sm:$0xff]  }
 0x175   : > { %9300 = vmatmul.mubr.msk.bf16.gmra.mrb[8].mxu0 %vm1061_vm3, %v5828_v60  ;;  %v5892_v55 = vsel %vm1585_vm10, %v5887_v51, %v5891_v50  ;;  %v5913_v59 = vshll.u32 %v10161_v39, 16  ;;  %v10163_v60 = vld [vmem:[#allocation2 + $0xa8] sm:$0xff]   ;;  %v5917_v3 = vshrl.u32 %v10161_v39, 16  ;;  %v10174_v50 = vld [vmem:[#allocation2 + $0x18] sm:$0xfe]   ;;  %v6592_v39 = vrot.slane %v10175_v36, 1 }
 0x176   : > { %9303 = vmatprep.mubr.msk.bf16.mxu0 %vm1061_vm3, %v5836_v24  ;;  %v5921_v1 = vshll.u32 %v10163_v60, 16  ;;  %v5925_v7 = vshrl.u32 %v10163_v60, 16  ;;  %v10179_v60 = vld [vmem:[#allocation2 + $0x40] sm:$0xff]  }
 0x177   : > { %v5915_v24 = vrot.slane %v5913_v59, 1  ;;  %v10178_v59 = vld [vmem:[#allocation2 + $0x38] sm:$0xff]  }
 0x178   : > { %v5923_v9 = vrot.slane %v5921_v1, 1 }
 0x179   : > { %v5916_v4 = vsel %vm1585_vm10, %v5911_v52, %v5915_v24  ;;  %v6600_v52 = vrot.slane %v10179_v60, 1 }
 0x17a   : > { %v5927_v12 = vor.u32 %v5925_v7, %v5923_v9 }
 0x17b   : > { %9108 = vmatmul.mubr.msk.bf16.gmra.mrb[16].mxu1 %vm1061_vm3, %v10142_v63  ;;  %v5903_v63 = vor.u32 %v5901_v48, %v5899_v53  ;;  %v6591_v53 = vrot.slane %v10174_v50, 1  ;;  %v10177_v48 = vld [vmem:[#allocation2 + $0x30] sm:$0xff]  }
 0x17c   : > { %9111 = vmatprep.mubr.msk.bf16.mxu1 %vm1061_vm3, %v10144_v31  ;;  %v10165_v31 = vld [vmem:[#allocation2 + $0xb0] sm:$0xff]  }
 0x17d   : > { %9304 = vmatmul.mubr.msk.bf16.gmra.mrb[12].mxu0 %vm1061_vm3, %v5844_v10  ;;  %v5908_v2 = vsel %vm1585_vm10, %v5903_v63, %v5907_v62  ;;  %v5929_v8 = vshll.u32 %v10165_v31, 16  ;;  %v10167_v10 = vld [vmem:[#allocation2 + $0xb8] sm:$0xff]   ;;  %v5933_v17 = vshrl.u32 %v10165_v31, 16  ;;  %v6598_v63 = vrot.slane %v10178_v59, 1  ;;  %v10180_v31 = vld [vmem:[#allocation2 + $0x48] sm:$0xff]  }
 0x17e   : > { %9307 = vmatprep.mubr.msk.bf16.mxu0 %vm1061_vm3, %v5852_v13  ;;  %v5937_v15 = vshll.u32 %v10167_v10, 16  ;;  %v5941_v21 = vshrl.u32 %v10167_v10, 16 }
 0x17f   : > { %v5931_v13 = vrot.slane %v5929_v8, 1  ;;  %v6601_v1 = vsel %vm2400_vm11, %v6598_v63, %v6600_v52  ;;  %v10183_v8 = vld [vmem:[#allocation2 + $0x60] sm:$0xff]  }
 0x180   : > { %v5939_v23 = vrot.slane %v5937_v15, 1  ;;  %v6608_v10 = vrot.slane %v10183_v8, 1 }
 0x181   : > { %v5932_v19 = vsel %vm1585_vm10, %v5927_v12, %v5931_v13  ;;  %v10184_v12 = vld [vmem:[#allocation2 + $0x68] sm:$0xff]  }
 0x182   : > { %v5943_v27 = vor.u32 %v5941_v21, %v5939_v23  ;;  %v6610_v15 = vrot.slane %v10184_v12, 1 }
 0x183   : > { %9112 = vmatmul.mubr.msk.bf16.gmra.mrb[20].mxu1 %vm1061_vm3, %v10146_v11  ;;  %v5919_v11 = vor.u32 %v5917_v3, %v5915_v24 }
 0x184   : > { %9115 = vmatprep.mubr.msk.bf16.mxu1 %vm1061_vm3, %v10148_v14  ;;  %v10169_v14 = vld [vmem:[#allocation2 + $0xc0] sm:$0xff]  }
 0x185   : > { %9308 = vmatmul.mubr.msk.bf16.gmra.mrb[16].mxu0 %vm1061_vm3, %v5860_v25  ;;  %v5924_v16 = vsel %vm1585_vm10, %v5919_v11, %v5923_v9  ;;  %v5945_v22 = vshll.u32 %v10169_v14, 16  ;;  %v10171_v25 = vld [vmem:[#allocation2 + $0xc8] sm:$0xff]   ;;  %v5949_v35 = vshrl.u32 %v10169_v14, 16  ;;  %v10185_v14 = vld [vmem:[#allocation2 + $0x70] sm:$0xff]  }
 0x186   : > { %9311 = vmatprep.mubr.msk.bf16.mxu0 %vm1061_vm3, %v5868_v28  ;;  %v5953_v30 = vshll.u32 %v10171_v25, 16  ;;  %v5957_v40 = vshrl.u32 %v10171_v25, 16  ;;  %v10188_v25 = vld [vmem:[#allocation2 + $0x88] sm:$0xff]  }
 0x187   : > { %v5947_v28 = vrot.slane %v5945_v22, 1 }
 0x188   : > { %v5955_v34 = vrot.slane %v5953_v30, 1 }
 0x189   : > { %v5948_v37 = vsel %vm1585_vm10, %v5943_v27, %v5947_v28  ;;  %v5951_v38 = vor.u32 %v5949_v35, %v5947_v28  ;;  %v10189_v27 = vld [vmem:[#allocation2 + $0x90] sm:$0xff]   ;;  %v6618_v28 = vrot.slane %v10188_v25, 1  ;;  %v10191_v35 = vld [vmem:[#allocation2 + $0xa0] sm:$0xff]  }
 0x18b   : > { %9116 = vmatmul.mubr.msk.bf16.gmra.mrb[24].mxu1 %vm1061_vm3, %v10150_v26  ;;  %v5935_v26 = vor.u32 %v5933_v17, %v5931_v13  ;;  %v10186_v17 = vld [vmem:[#allocation2 + $0x78] sm:$0xff]  }
 0x18c   : > { %9119 = vmatprep.mubr.msk.bf16.mxu1 %vm1061_vm3, %v10152_v29  ;;  %v10172_v29 = vld [vmem:[#allocation2 + $0xd0] sm:$0xff]   ;;  %v6614_v21 = vrot.slane %v10186_v17, 1 }
 0x18d   : > { %9312 = vmatmul.mubr.msk.bf16.gmra.mrb[20].mxu0 %vm1061_vm3, %v5876_v42  ;;  %v5940_v32 = vsel %vm1585_vm10, %v5935_v26, %v5939_v23  ;;  %v5961_v41 = vshll.u32 %v10172_v29, 16  ;;  %v10173_v42 = vld [vmem:[#allocation2 + $0xd8] ss:$0 sps:$4 sm:$0x11]  }
 0x18e   : > { %9315 = vmatprep.mubr.msk.bf16.mxu0 %vm1061_vm3, %v5884_v18  ;;  %v5956_v18 = vsel %vm1585_vm10, %v5951_v38, %v5955_v34  ;;  %v5969_v46 = vshll.u32 %v10173_v42, 16  ;;  %v10193_v42 = vld [vmem:[#allocation2 + $0xb0] sm:$0xff]  }
 0x18f   : > { %v5963_v44 = vrot.slane %v5961_v41, 1 }
 0x190   : > { %v5971_v5 = vrot.slane %v5969_v46, 1 }
 0x193   : > { %9120 = vmatmul.mubr.msk.bf16.gmra.mrb[28].mxu1 %vm1061_vm3, %v10154_v43  ;;  %v5959_v43 = vor.u32 %v5957_v40, %v5955_v34  ;;  %v6624_v40 = vrot.slane %v10191_v35, 1  ;;  %v10192_v34 = vld [vmem:[#allocation2 + $0xa8] sm:$0xff]  }
 0x194   : > { %9123 = vmatprep.mubr.msk.bf16.mxu1 %vm1061_vm3, %v10156_v45  ;;  %v5965_v45 = vshrl.u32 %v10172_v29, 16  ;;  %v6620_v29 = vrot.slane %v10189_v27, 1 }
 0x195   : > { %9316 = vmatmul.mubr.msk.bf16.gmra.mrb[24].mxu0 %vm1061_vm3, %v5892_v55  ;;  %v5964_v47 = vsel %vm1585_vm10, %v5959_v43, %v5963_v44  ;;  %v10176_v55 = vld [vmem:[#allocation2 + $0x28] sm:$0xff]   ;;  %v6626_v43 = vrot.slane %v10192_v34, 1 }
 0x196   : > { %9319 = vmatprep.mubr.msk.bf16.mxu0 %vm1061_vm3, %v5900_v57  ;;  %v5967_v51 = vor.u32 %v5965_v45, %v5963_v44  ;;  %v6594_v57 = vrot.slane %v10176_v55, 1  ;;  %v6628_v44 = vrot.slane %v10193_v42, 1  ;;  %v10194_v45 = vld [vmem:[#allocation2 + $0xb8] sm:$0xff]  }
 0x197   : > { %v6630_v50 = vrot.slane %v10194_v45, 1 }
 0x198   : > { %v5972_v54 = vsel %vm1585_vm10, %v5967_v51, %v5971_v5  ;;  %v6595_v49 = vsel %vm2400_vm11, %v6592_v39, %v6594_v57  ;;  %v6629_v46 = vsel %vm2400_vm11, %v6626_v43, %v6628_v44  ;;  %v10196_v5 = vld [vmem:[#allocation2 + $0xc8] sm:$0xff]  }
 0x199   : > { %v6631_v51 = vsel %vm2400_vm11, %v6628_v44, %v6630_v50 }
 0x19b   : > { %9124 = vmatmul.mubr.msk.bf16.gmra.mrb[32].mxu1 %vm1061_vm3, %v10158_v56  ;;  %v6593_v56 = vsel %vm2400_vm11, %v6591_v53, %v6592_v39  ;;  %v10197_v39 = vld [vmem:[#allocation2 + $0xd0] sm:$0xff]  }
 0x19c   : > { %9127 = vmatprep.mubr.msk.bf16.mxu1 %vm1061_vm3, %v10160_v58  ;;  %v6596_v58 = vrot.slane %v10177_v48, 1  ;;  %v6636_v55 = vrot.slane %v10197_v39, 1  ;;  %v10198_v48 = vld [vmem:[#allocation2 + $0xd8] ss:$0 sps:$4 sm:$0x11]  }
 0x19d   : > { %9320 = vmatmul.mubr.msk.bf16.gmra.mrb[28].mxu0 %vm1061_vm3, %v5908_v2  ;;  %v10181_v2 = vld [vmem:[#allocation2 + $0x50] sm:$0xff]  }
 0x19e   : > { %9323 = vmatprep.mubr.msk.bf16.mxu0 %vm1061_vm3, %v5916_v4  ;;  %v6597_v62 = vsel %vm2400_vm11, %v6594_v57, %v6596_v58  ;;  %v6599_v24 = vsel %vm2400_vm11, %v6596_v58, %v6598_v63  ;;  %v6604_v3 = vrot.slane %v10181_v2, 1  ;;  %v6638_v58 = vrot.slane %v10198_v48, 1 }
 0x1a3   : > { %9128 = vmatmul.mubr.msk.bf16.gmra.mrb[36].mxu1 %vm1061_vm3, %v10162_v0  ;;  %v6602_v0 = vrot.slane %v10180_v31, 1 }
 0x1a4   : > { %9131 = vmatprep.mubr.msk.bf16.mxu1 %vm1061_vm3, %v10164_v6  ;;  %v10182_v6 = vld [vmem:[#allocation2 + $0x58] sm:$0xff]  }
 0x1a5   : > { %9324 = vmatmul.mubr.msk.bf16.gmra.mrb[32].mxu0 %vm1061_vm3, %v5924_v16  ;;  %v6603_v4 = vsel %vm2400_vm11, %v6600_v52, %v6602_v0  ;;  %v6605_v7 = vsel %vm2400_vm11, %v6602_v0, %v6604_v3  ;;  %v6606_v9 = vrot.slane %v10182_v6, 1  ;;  %v6612_v16 = vrot.slane %v10185_v14, 1 }
 0x1a6   : > { %9327 = vmatprep.mubr.msk.bf16.mxu0 %vm1061_vm3, %v5932_v19 }
 0x1a7   : > { %v6607_v11 = vsel %vm2400_vm11, %v6604_v3, %v6606_v9  ;;  %v6609_v13 = vsel %vm2400_vm11, %v6606_v9, %v6608_v10  ;;  %v6613_v19 = vsel %vm2400_vm11, %v6610_v15, %v6612_v16  ;;  %v6615_v23 = vsel %vm2400_vm11, %v6612_v16, %v6614_v21 }
 0x1ab   : > { %9132 = vmatmul.mubr.msk.bf16.gmra.mrb[40].mxu1 %vm1061_vm3, %v10166_v61  ;;  %v6611_v61 = vsel %vm2400_vm11, %v6608_v10, %v6610_v15 }
 0x1ac   : > { %9135 = vmatprep.mubr.msk.bf16.mxu1 %vm1061_vm3, %v10168_v20  ;;  %v10187_v20 = vld [vmem:[#allocation2 + $0x80] sm:$0xff]  }
 0x1ad   : > { %9328 = vmatmul.mubr.msk.bf16.gmra.mrb[36].mxu0 %vm1061_vm3, %v5940_v32  ;;  %v6616_v22 = vrot.slane %v10187_v20, 1  ;;  %v10190_v32 = vld [vmem:[#allocation2 + $0x98] sm:$0xff]  }
 0x1ae   : > { %9331 = vmatprep.mubr.msk.bf16.mxu0 %vm1061_vm3, %v5948_v37  ;;  %v6622_v37 = vrot.slane %v10190_v32, 1 }
 0x1af   : > { %v6617_v26 = vsel %vm2400_vm11, %v6614_v21, %v6616_v22  ;;  %v6619_v30 = vsel %vm2400_vm11, %v6616_v22, %v6618_v28  ;;  %v7333_v21 = vlaneseq }
 0x1b0   : > { %v6623_v41 = vsel %vm2400_vm11, %v6620_v29, %v6622_v37  ;;  %v6625_v38 = vsel %vm2400_vm11, %v6622_v37, %v6624_v40 }
 0x1b3   : > { %9136 = vmatmul.mubr.msk.bf16.gmra.mrb[44].mxu1 %vm1061_vm3, %v10170_v33  ;;  %v6621_v33 = vsel %vm2400_vm11, %v6618_v28, %v6620_v29 }
 0x1b5   : > { %9332 = vmatmul.mubr.msk.bf16.gmra.mrb[40].mxu0 %vm1061_vm3, %v5956_v18  ;;  %v6627_v18 = vsel %vm2400_vm11, %v6624_v40, %v6626_v43 }
 0x1b6   : > { %9335 = vmatprep.mubr.msk.bf16.mxu0 %vm1061_vm3, %v5964_v47  ;;  %v10195_v47 = vld [vmem:[#allocation2 + $0xc0] sm:$0xff]  }
 0x1b7   : > { %v6632_v36 = vrot.slane %v10195_v47, 1 }
 0x1b9   : > { %v6633_v53 = vsel %vm2400_vm11, %v6630_v50, %v6632_v36 }
 0x1bd   : > { %9336 = vmatmul.mubr.msk.bf16.gmra.mrb[44].mxu0 %vm1061_vm3, %v5972_v54  ;;  %v6634_v54 = vrot.slane %v10196_v5, 1 }
 0x1be   : > { %9341 = vmatprep.mubr.msk.bf16.mxu0 %vm1061_vm3, %v6593_v56 }
 0x1bf   : > { %v6635_v56 = vsel %vm2400_vm11, %v6632_v36, %v6634_v54  ;;  %v6637_v57 = vsel %vm2400_vm11, %v6634_v54, %v6636_v55 }
 0x1c5   : > { %9342 = vmatmul.mubr.msk.bf16.vlgmr.msra.gmra.mrb[0].mxu0 %vm1061_vm3, %v6595_v49  ;;  %v6639_v49 = vsel %vm2400_vm11, %v6636_v55, %v6638_v58 }
 0x1c6   : > { %9345 = vmatprep.mubr.msk.bf16.mxu0 %vm1061_vm3, %v6597_v62 }
 0x1cd   : > { %9346 = vmatmul.mubr.msk.bf16.gmra.mrb[4].mxu0 %vm1061_vm3, %v6599_v24 }
 0x1ce   : > { %9349 = vmatprep.mubr.msk.bf16.mxu0 %vm1061_vm3, %v6601_v1 }
 0x1d5   : > { %9350 = vmatmul.mubr.msk.bf16.gmra.mrb[8].mxu0 %vm1061_vm3, %v6603_v4 }
 0x1d6   : > { %9353 = vmatprep.mubr.msk.bf16.mxu0 %vm1061_vm3, %v6605_v7 }
 0x1dd   : > { %9354 = vmatmul.mubr.msk.bf16.gmra.mrb[12].mxu0 %vm1061_vm3, %v6607_v11 }
 0x1de   : > { %9357 = vmatprep.mubr.msk.bf16.mxu0 %vm1061_vm3, %v6609_v13 }
 0x1e5   : > { %9358 = vmatmul.mubr.msk.bf16.gmra.mrb[16].mxu0 %vm1061_vm3, %v6611_v61 }
 0x1e6   : > { %9361 = vmatprep.mubr.msk.bf16.mxu0 %vm1061_vm3, %v6613_v19 }
 0x1ed   : > { %9362 = vmatmul.mubr.msk.bf16.gmra.mrb[20].mxu0 %vm1061_vm3, %v6615_v23  ;;  %v11104_v23 = vshrl.u32 %v7333_v21, 7 }
 0x1ee   : > { %9365 = vmatprep.mubr.msk.bf16.mxu0 %vm1061_vm3, %v6617_v26  ;;  %v11110_v26 = vld [vmem:[%s11661_s1] sm:$0x7] }
 0x1ef   : > { %v7339_v25 = vsub.s32 1, %v11104_v23 }
 0x1f1   : > { %v7340_v28 = vrot.slane %v11110_v26, %v7339_v25 }
 0x1f3   : > { %7412 = vmatprep.mubr.f32.mxu1 %v7340_v28 }
 0x1f5   : > { %9366 = vmatmul.mubr.msk.bf16.gmra.mrb[24].mxu0 %vm1061_vm3, %v6619_v30 }
 0x1f6   : > { %9369 = vmatprep.mubr.msk.bf16.mxu0 %vm1061_vm3, %v6621_v33 }
 0x1fd   : > { %9370 = vmatmul.mubr.msk.bf16.gmra.mrb[28].mxu0 %vm1061_vm3, %v6623_v41 }
 0x1fe   : > { %9373 = vmatprep.mubr.msk.bf16.mxu0 %vm1061_vm3, %v6625_v38 }
 0x205   : > { %9374 = vmatmul.mubr.msk.bf16.gmra.mrb[32].mxu0 %vm1061_vm3, %v6627_v18 }
 0x206   : > { %9377 = vmatprep.mubr.msk.bf16.mxu0 %vm1061_vm3, %v6629_v46  ;;  %v7343_v46 = vsub.s32 2, %v11104_v23 }
 0x208   : > { %v11151_v36 = vrot.slane %v11110_v26, %v7343_v46 }
 0x20a   : > { %11692 = vst [vmem:[#allocation8_spill] sm:$0xff] %v11151_v36 }
 0x20d   : > { %9378 = vmatmul.mubr.msk.bf16.gmra.mrb[36].mxu0 %vm1061_vm3, %v6631_v51 }
 0x20e   : > { %9381 = vmatprep.mubr.msk.bf16.mxu0 %vm1061_vm3, %v6633_v53 }
 0x215   : > { %9382 = vmatmul.mubr.msk.bf16.gmra.mrb[40].mxu0 %vm1061_vm3, %v6635_v56 }
 0x216   : > { %9385 = vmatprep.mubr.msk.bf16.mxu0 %vm1061_vm3, %v6637_v57 }
 0x21d   : > { %9386 = vmatmul.mubr.msk.bf16.gmra.mrb[44].mxu0 %vm1061_vm3, %v6639_v49 }
 0x22e   : > { %v9093_v59 = vpop.f32.mrb[0].mxu1 }
 0x22f   : > { %v3173_v62 = vpop.f32.mrb[1].mxu1 }
 0x230   : > { %v9094_v60 = vpop.f32.mrb[2].mxu1 }
 0x231   : > { %v3176_v63 = vpop.f32.mrb[3].mxu1 }
 0x236   : > { %v9097_v52 = vpop.f32.mrb[4].mxu1 }
 0x237   : > { %v3189_v24 = vpop.f32.mrb[5].mxu1 }
 0x238   : > { %v11060_v31 = vpop.f32.mrb[6].mxu1 }
 0x239   : > { %v11062_v1 = vpop.f32.mrb[7].mxu1 }
 0x23e   : > { %v11064_v2 = vpop.f32.mrb[8].mxu1 }
 0x23f   : > { %v11066_v0 = vpop.f32.mrb[9].mxu1 }
 0x240   : > { %v11068_v3 = vpop.f32.mrb[10].mxu1 }
 0x241   : > { %v11070_v4 = vpop.f32.mrb[11].mxu1 }
 0x246   : > { %v11072_v6 = vpop.f32.mrb[12].mxu1 }
 0x247   : > { %v11074_v7 = vpop.f32.mrb[13].mxu1 }
 0x248   : > { %v11076_v8 = vpop.f32.mrb[14].mxu1 }
 0x249   : > { %v11078_v9 = vpop.f32.mrb[15].mxu1 }
 0x24e   : > { %v11080_v10 = vpop.f32.mrb[16].mxu1 }
 0x24f   : > { %v11082_v11 = vpop.f32.mrb[17].mxu1 }
 0x250   : > { %v11084_v12 = vpop.f32.mrb[18].mxu1 }
 0x251   : > { %v11086_v13 = vpop.f32.mrb[19].mxu1 }
 0x256   : > { %v11088_v14 = vpop.f32.mrb[20].mxu1 }
 0x257   : > { %v11090_v15 = vpop.f32.mrb[21].mxu1 }
 0x258   : > { %v11092_v16 = vpop.f32.mrb[22].mxu1 }
 0x259   : > { %v11094_v61 = vpop.f32.mrb[23].mxu1 }
 0x25e   : > { %v11096_v17 = vpop.f32.mrb[24].mxu1 }
 0x25f   : > { %v11098_v19 = vpop.f32.mrb[25].mxu1 }
 0x260   : > { %v11100_v20 = vpop.f32.mrb[26].mxu1 }
 0x261   : > { %v11102_v22 = vpop.f32.mrb[27].mxu1 }
 0x266   : > { %v11112_v27 = vpop.f32.mrb[28].mxu1 }
 0x267   : > { %v11115_v29 = vpop.f32.mrb[29].mxu1 }
 0x268   : > { %v11117_v30 = vpop.f32.mrb[30].mxu1 }
 0x269   : > { %v11119_v32 = vpop.f32.mrb[31].mxu1 }
 0x26e   : > { %v11121_v33 = vpop.f32.mrb[32].mxu1 }
 0x26f   : > { %v11123_v35 = vpop.f32.mrb[33].mxu1 }
 0x270   : > { %v11125_v37 = vpop.f32.mrb[34].mxu1 }
 0x271   : > { %v11127_v40 = vpop.f32.mrb[35].mxu1 }
 0x276   : > { %v11129_v41 = vpop.f32.mrb[36].mxu1 }
 0x277   : > { %v11131_v34 = vpop.f32.mrb[37].mxu1 }
 0x278   : > { %v11133_v38 = vpop.f32.mrb[38].mxu1 }
 0x279   : > { %v11135_v42 = vpop.f32.mrb[39].mxu1 }
 0x27e   : > { %v11137_v43 = vpop.f32.mrb[40].mxu1 }
 0x27f   : > { %v11139_v44 = vpop.f32.mrb[41].mxu1 }
 0x280   : > { %v11141_v18 = vpop.f32.mrb[42].mxu1 }
 0x281   : > { %v11143_v45 = vpop.f32.mrb[43].mxu1 }
 0x286   : > { %v11146_v47 = vpop.f32.mrb[44].mxu1 }
 0x287   : > { %v11148_v50 = vpop.f32.mrb[45].mxu1 }
 0x288   : > { %11691 = vst [vmem:[#allocation7_spill] sm:$0xff] %v11148_v50  ;;  %v11153_v51 = vpop.f32.mrb[46].mxu1 }
 0x289   : > { %11693 = vst [vmem:[#allocation9_spill] sm:$0xff] %v11153_v51  ;;  %v11155_v5 = vpop.f32.mrb[47].mxu1 }
 0x28a   : > { %11694 = vst [vmem:[#allocation10_spill] sm:$0xff] %v11155_v5 }
 0x298   : > { %v9343_v53 = vpop.f32.mrb[0].mxu0 }
 0x299   : > { %v9539_v39 = vadd.f32 %v9343_v53, %v9093_v59  ;;  %v6749_v54 = vpop.f32.mrb[1].mxu0 }
 0x29a   : > { %v9540_v55 = vadd.f32 %v6749_v54, %v3173_v62  ;;  %v9344_v56 = vpop.f32.mrb[2].mxu0 }
 0x29b   : > { %v9541_v48 = vadd.f32 %v9344_v56, %v9094_v60  ;;  %v6752_v57 = vpop.f32.mrb[3].mxu0 }
 0x29c   : > { %v9542_v58 = vadd.f32 %v6752_v57, %v3176_v63 }
 0x2a0   : > { %v9347_v49 = vpop.f32.mrb[4].mxu0 }
 0x2a1   : > { %v11157_v21 = vadd.f32 %v9347_v49, %v9097_v52  ;;  %v6765_v25 = vpop.f32.mrb[5].mxu0 }
 0x2a2   : > { %v9544_v28 = vadd.f32 %v6765_v25, %v3189_v24  ;;  %v9348_v50 = vpop.f32.mrb[6].mxu0 }
 0x2a3   : > { %v11160_v46 = vadd.f32 %v9348_v50, %v11060_v31  ;;  %v6768_v36 = vpop.f32.mrb[7].mxu0 }
 0x2a4   : > { %v9546_v5 = vadd.f32 %v6768_v36, %v11062_v1 }
 0x2a8   : > { %v9351_v51 = vpop.f32.mrb[8].mxu0 }
 0x2a9   : > { %v11164_v59 = vadd.f32 %v9351_v51, %v11064_v2  ;;  %v6781_v62 = vpop.f32.mrb[9].mxu0 }
 0x2aa   : > { %v11167_v60 = vadd.f32 %v6781_v62, %v11066_v0  ;;  %v9352_v63 = vpop.f32.mrb[10].mxu0 }
 0x2ab   : > { %v11170_v52 = vadd.f32 %v9352_v63, %v11068_v3  ;;  %v6784_v24 = vpop.f32.mrb[11].mxu0 }
 0x2ac   : > { %v11173_v53 = vadd.f32 %v6784_v24, %v11070_v4 }
 0x2b0   : > { %v9355_v31 = vpop.f32.mrb[12].mxu0 }
 0x2b1   : > { %v11176_v50 = vadd.f32 %v9355_v31, %v11072_v6  ;;  %v6797_v1 = vpop.f32.mrb[13].mxu0  ;;  %v11191_v6 = vld [vmem:[%s11663_s3] ss:$0 sm:$0xff] }
 0x2b2   : > { %v11179_v2 = vadd.f32 %v6797_v1, %v11074_v7  ;;  %v9356_v36 = vpop.f32.mrb[14].mxu0  ;;  %v11195_v49 = vadd.f32 %v9542_v58, %v11191_v6  ;;  %v11203_v62 = vadd.f32 %v9540_v55, %v11191_v6  ;;  %v11213_v24 = vadd.f32 %v9541_v48, %v11191_v6 }
 0x2b3   : > { %v11182_v0 = vadd.f32 %v9356_v36, %v11076_v8  ;;  %v6800_v51 = vpop.f32.mrb[15].mxu0  ;;  %v7141_v36 = vadd.f32 %v9539_v39, %v11191_v6 }
 0x2b4   : > { %v11185_v3 = vadd.f32 %v6800_v51, %v11078_v9  ;;  %v7187_v51 = vmax.f32 %v11203_v62, 0.0 }
 0x2b8   : > { %v9359_v54 = vpop.f32.mrb[16].mxu0 }
 0x2b9   : > { %v9555_v4 = vadd.f32 %v9359_v54, %v11080_v10  ;;  %v6813_v56 = vpop.f32.mrb[17].mxu0 }
 0x2ba   : > { %v9556_v7 = vadd.f32 %v6813_v56, %v11082_v11  ;;  %v9360_v57 = vpop.f32.mrb[18].mxu0 }
 0x2bb   : > { %v9557_v8 = vadd.f32 %v9360_v57, %v11084_v12  ;;  %v6816_v25 = vpop.f32.mrb[19].mxu0  ;;  %v11209_v11 = vadd.f32 %v9555_v4, %v11191_v6  ;;  %v7188_v12 = vmax.f32 %v11195_v49, 0.0 }
 0x2bc   : > { %v11199_v9 = vadd.f32 %v9556_v7, %v11191_v6  ;;  %v9558_v10 = vadd.f32 %v6816_v25, %v11086_v13  ;;  %v7144_v25 = vadd.f32 %v9546_v5, %v11191_v6 }
 0x2bd   : > { %v11206_v63 = vadd.f32 %v9557_v8, %v11191_v6  ;;  %v11671_v56 = vmax.f32 %v11209_v11, 0.0  ;;  %v7190_v8 = vmax.f32 %v11213_v24, 0.0  ;;  %v9461_v39 = vpack.c.bf16 %v7188_v12, %v7187_v51 }
 0x2be   : > { %v7156_v58 = vadd.f32 %v9558_v10, %v11191_v6  ;;  %v11667_v31 = vmax.f32 %v11199_v9, 0.0 }
 0x2bf   : > { %v11670_v13 = vmax.f32 %v11206_v63, 0.0 }
 0x2c0   : > { %v7204_v1 = vmax.f32 %v7156_v58, 0.0  ;;  %v9363_v55 = vpop.f32.mrb[20].mxu0 }
 0x2c1   : > { %v9559_v54 = vadd.f32 %v9363_v55, %v11088_v14  ;;  %v6829_v4 = vpop.f32.mrb[21].mxu0  ;;  %v7189_v55 = vmax.f32 %v7141_v36, 0.0  ;;  %v7192_v36 = vmax.f32 %v7144_v25, 0.0 }
 0x2c2   : > { %v9560_v48 = vadd.f32 %v6829_v4, %v11090_v15  ;;  %v9364_v7 = vpop.f32.mrb[22].mxu0  ;;  %v9459_v57 = vpack.c.bf16 %v7204_v1, %v11667_v31  ;;  %v9463_v1 = vpack.c.bf16 %v11670_v13, %v11671_v56  ;;  %v11239_v4 = vadd.f32 %v9544_v28, %v11191_v6 }
 0x2c3   : > { %v9561_v14 = vadd.f32 %v9364_v7, %v11092_v16  ;;  %v6832_v10 = vpop.f32.mrb[23].mxu0  ;;  %v11243_v16 = vadd.f32 %v9559_v54, %v11191_v6  ;;  %v11257_v54 = vadd.f32 %v11157_v21, %v11191_v6 }
 0x2c4   : > { %v7159_v58 = vadd.f32 %v9560_v48, %v11191_v6  ;;  %v9562_v15 = vadd.f32 %v6832_v10, %v11094_v61  ;;  %9460 = vmatprep.subr.bf16.mxu1 %v9459_v57  ;;  %v9465_v61 = vpack.c.bf16 %v7190_v8, %v7189_v55  ;;  %v11252_v48 = vadd.f32 %v11160_v46, %v11191_v6 }
 0x2c5   : > { %v7162_v31 = vadd.f32 %v9561_v14, %v11191_v6  ;;  %9462 = vmatpush3.bf16.msra.mxu1 %v9461_v39  ;;  %v7191_v14 = vmax.f32 %v11239_v4, 0.0  ;;  %v11270_v55 = vadd.f32 %v11173_v53, %v11191_v6 }
 0x2c6   : > { %v11246_v5 = vadd.f32 %v9562_v15, %v11191_v6  ;;  %9464 = vmatprep.subr.bf16.mxu1 %v9463_v1  ;;  %v7207_v28 = vmax.f32 %v7159_v58, 0.0  ;;  %v11668_v1 = vmax.f32 %v11243_v16, 0.0  ;;  %v11672_v58 = vmax.f32 %v11252_v48, 0.0 }
 0x2c7   : > { %v7210_v7 = vmax.f32 %v7162_v31, 0.0  ;;  %v9469_v21 = vpack.c.bf16 %v7192_v36, %v7191_v14  ;;  %v7147_v36 = vadd.f32 %v11167_v60, %v11191_v6  ;;  %v7196_v60 = vmax.f32 %v11270_v55, 0.0 }
 0x2c8   : > { %v11669_v57 = vmax.f32 %v11246_v5, 0.0  ;;  %v9367_v39 = vpop.f32.mrb[24].mxu0 }
 0x2c9   : > { %v9563_v10 = vadd.f32 %v9367_v39, %v11096_v17  ;;  %v6845_v15 = vpop.f32.mrb[25].mxu0  ;;  %9466 = vmatpush3.bf16.msra.mxu1 %v9465_v61 }
 0x2ca   : > { %v9564_v46 = vadd.f32 %v6845_v15, %v11098_v19  ;;  %v9368_v25 = vpop.f32.mrb[26].mxu0  ;;  %v9467_v31 = vpack.c.bf16 %v11669_v57, %v7207_v28  ;;  %v9471_v28 = vpack.c.bf16 %v7210_v7, %v11668_v1  ;;  %v7193_v15 = vmax.f32 %v11257_v54, 0.0 }
 0x2cb   : > { %v9565_v17 = vadd.f32 %v9368_v25, %v11100_v20  ;;  %v6848_v61 = vpop.f32.mrb[27].mxu0  ;;  %v7165_v20 = vadd.f32 %v9563_v10, %v11191_v6  ;;  %v7150_v7 = vadd.f32 %v11170_v52, %v11191_v6 }
 0x2cc   : > { %v11274_v39 = vadd.f32 %v9564_v46, %v11191_v6  ;;  %v9566_v19 = vadd.f32 %v6848_v61, %v11102_v22  ;;  %9468 = vmatprep.subr.bf16.mxu1 %v9467_v31  ;;  %v9473_v22 = vpack.c.bf16 %v11672_v58, %v7193_v15  ;;  %v7195_v61 = vmax.f32 %v7147_v36, 0.0 }
 0x2cd   : > { %v11283_v53 = vadd.f32 %v9565_v17, %v11191_v6  ;;  %9470 = vmatpush3.bf16.msra.mxu1 %v9469_v21  ;;  %v11301_v17 = vadd.f32 %v11164_v59, %v11191_v6  ;;  %v7213_v1 = vmax.f32 %v7165_v20, 0.0  ;;  %v7198_v56 = vmax.f32 %v7150_v7, 0.0 }
 0x2ce   : > { %v11287_v46 = vadd.f32 %v9566_v19, %v11191_v6  ;;  %9472 = vmatprep.subr.bf16.mxu1 %v9471_v28  ;;  %v7211_v25 = vmax.f32 %v11274_v39, 0.0  ;;  %v9477_v58 = vpack.c.bf16 %v7196_v60, %v7195_v61  ;;  %v11313_v59 = vadd.f32 %v11185_v3, %v11191_v6 }
 0x2cf   : > { %v11673_v31 = vmax.f32 %v11283_v53, 0.0  ;;  %v7197_v7 = vmax.f32 %v11301_v17, 0.0  ;;  %v11704_v17 = vmax.f32 %v11243_v16, 0.0 }
 0x2d0   : > { %v11682_v10 = vmax.f32 %v11287_v46, 0.0  ;;  %v9371_v21 = vpop.f32.mrb[28].mxu0 }
 0x2d1   : > { %v9567_v19 = vadd.f32 %v9371_v21, %v11112_v27  ;;  %v6861_v28 = vpop.f32.mrb[29].mxu0  ;;  %9474 = vmatpush3.bf16.msra.mxu1 %v9473_v22  ;;  %v9479_v22 = vpack.c.bf16 %v11673_v31, %v7213_v1  ;;  %v11325_v21 = vadd.f32 %v11179_v2, %v11191_v6  ;;  %v7200_v2 = vmax.f32 %v11313_v59, 0.0 }
 0x2d2   : > { %v9568_v52 = vadd.f32 %v6861_v28, %v11115_v29  ;;  %v9372_v57 = vpop.f32.mrb[30].mxu0  ;;  %v9475_v13 = vpack.c.bf16 %v11682_v10, %v7211_v25 }
 0x2d3   : > { %v9569_v27 = vadd.f32 %v9372_v57, %v11117_v30  ;;  %v6864_v36 = vpop.f32.mrb[31].mxu0  ;;  %v11331_v30 = vadd.f32 %v9567_v19, %v11191_v6  ;;  %v7153_v19 = vadd.f32 %v11176_v50, %v11191_v6 }
 0x2d4   : > { %v11317_v20 = vadd.f32 %v9568_v52, %v11191_v6  ;;  %v9570_v29 = vadd.f32 %v6864_v36, %v11119_v32  ;;  %9476 = vmatprep.subr.bf16.mxu1 %v9475_v13  ;;  %v9481_v32 = vpack.c.bf16 %v7198_v56, %v7197_v7  ;;  %v11338_v13 = vadd.f32 %v11182_v0, %v11191_v6 }
 0x2d5   : > { %v11328_v3 = vadd.f32 %v9569_v27, %v11191_v6  ;;  %9478 = vmatpush3.bf16.msra.mxu1 %v9477_v58  ;;  %v7199_v52 = vmax.f32 %v11325_v21, 0.0  ;;  %v11676_v0 = vmax.f32 %v11331_v30, 0.0  ;;  %v11705_v21 = vmax.f32 %v11287_v46, 0.0 }
 0x2d6   : > { %v7168_v57 = vadd.f32 %v9570_v29, %v11191_v6  ;;  %9480 = vmatprep.subr.bf16.mxu1 %v9479_v22  ;;  %v11674_v1 = vmax.f32 %v11317_v20, 0.0 }
 0x2d7   : > { %v11675_v61 = vmax.f32 %v11328_v3, 0.0  ;;  %v9485_v50 = vpack.c.bf16 %v7200_v2, %v7199_v52  ;;  %v11709_v16 = vmax.f32 %v11328_v3, 0.0 }
 0x2d8   : > { %v7216_v58 = vmax.f32 %v7168_v57, 0.0  ;;  %v9375_v28 = vpop.f32.mrb[32].mxu0  ;;  %v7202_v57 = vmax.f32 %v11338_v13, 0.0  ;;  %v11706_v13 = vmax.f32 %v11283_v53, 0.0 }
 0x2d9   : > { %v9571_v27 = vadd.f32 %v9375_v28, %v11121_v33  ;;  %v6877_v56 = vpop.f32.mrb[33].mxu0  ;;  %9482 = vmatpush3.bf16.msra.mxu1 %v9481_v32 }
 0x2da   : > { %v9572_v36 = vadd.f32 %v6877_v56, %v11123_v35  ;;  %v9376_v29 = vpop.f32.mrb[34].mxu0  ;;  %v9483_v22 = vpack.c.bf16 %v7216_v58, %v11674_v1  ;;  %v9487_v35 = vpack.c.bf16 %v11675_v61, %v11676_v0  ;;  %v7335_v58 = vsub.s32 0, %v11104_v23 }
 0x2db   : > { %v9573_v31 = vadd.f32 %v9376_v29, %v11125_v37  ;;  %v6880_v33 = vpop.f32.mrb[35].mxu0  ;;  %v7201_v56 = vmax.f32 %v7153_v19, 0.0  ;;  %v11375_v19 = vadd.f32 %v9571_v27, %v11191_v6  ;;  %v11699_v23 = vmax.f32 %v11252_v48, 0.0 }
 0x2dc   : > { %v7171_v32 = vadd.f32 %v9572_v36, %v11191_v6  ;;  %v9574_v28 = vadd.f32 %v6880_v33, %v11127_v40  ;;  %9484 = vmatprep.subr.bf16.mxu1 %v9483_v22  ;;  %v7336_v33 = vrot.slane %v11110_v26, %v7335_v58  ;;  %v11701_v48 = vmax.f32 %v11209_v11, 0.0 }
 0x2dd   : > { %9486 = vmatpush3.bf16.msra.mxu1 %v9485_v50  ;;  %v9489_v37 = vpack.c.bf16 %v7202_v57, %v7201_v56  ;;  %v7174_v36 = vadd.f32 %v9573_v31, %v11191_v6  ;;  %v10268_v56 = vmov 0.0|0.0   ;;  %v11711_v46 = vmax.f32 %v11375_v19, 0.0 }
 0x2de   : > { %v11365_v1 = vadd.f32 %v9574_v28, %v11191_v6  ;;  %9488 = vmatprep.subr.bf16.mxu1 %v9487_v35  ;;  %v7219_v40 = vmax.f32 %v7171_v32, 0.0 }
 0x2df   : > { %v7222_v61 = vmax.f32 %v7174_v36, 0.0 }
 0x2e0   : > { %v11681_v29 = vmax.f32 %v11365_v1, 0.0  ;;  %v9379_v22 = vpop.f32.mrb[36].mxu0  ;;  %v11710_v39 = vmax.f32 %v11365_v1, 0.0 }
 0x2e1   : > { %v9575_v50 = vadd.f32 %v9379_v22, %v11129_v41  ;;  %v6893_v28 = vpop.f32.mrb[37].mxu0  ;;  %9490 = vmatpush3.bf16.msra.mxu1 %v9489_v37  ;;  %v11677_v37 = vmax.f32 %v11375_v19, 0.0 }
 0x2e2   : > { %v9492_v35 = vpack.c.bf16 %v11681_v29, %v7219_v40  ;;  %v9576_v31 = vadd.f32 %v6893_v28, %v11131_v34  ;;  %v9380_v32 = vpop.f32.mrb[38].mxu0  ;;  %9491 = vmatprep.subr.bf16.mxu1 %v10268_v56  ;;  %v10270_v40 = vmov 0.0   ;;  %v11697_v29 = vld [vmem:[#allocation10_spill] sm:$0xff] }
 0x2e3   : > { %v9577_v0 = vadd.f32 %v9380_v32, %v11133_v38  ;;  %v6896_v26 = vpop.f32.mrb[39].mxu0  ;;  %v9495_v38 = vpack.c.bf16 %v7222_v61, %v11677_v37  ;;  %v7177_v28 = vadd.f32 %v9575_v50, %v11191_v6 }
 0x2e4   : > { %v11384_v27 = vadd.f32 %v9576_v31, %v11191_v6  ;;  %v9578_v41 = vadd.f32 %v6896_v26, %v11135_v42  ;;  %7413 = vmatmul.mubr.f32.vlgmr.msra.gmra.mrb[48].mxu1 %v7336_v33 }
 0x2e5   : > { %9493 = vmatpush3.bf16.msra.mxu1 %v9492_v35  ;;  %9421 = vmatprep.mubr.msk.f32.mxu1 %vm10269_vm12, %v10270_v40  ;;  %v11397_v36 = vadd.f32 %v9577_v0, %v11191_v6 }
 0x2e6   : > { %v11391_v34 = vadd.f32 %v9578_v41, %v11191_v6  ;;  %9494 = vmatprep.subr.bf16.mxu1 %v10268_v56  ;;  %v11680_v42 = vmax.f32 %v11384_v27, 0.0 }
 0x2e7   : > { %v11679_v26 = vmax.f32 %v11397_v36, 0.0 }
 0x2e8   : > { %v11678_v22 = vmax.f32 %v11391_v34, 0.0  ;;  %v9383_v33 = vpop.f32.mrb[40].mxu0 }
 0x2e9   : > { %v9579_v35 = vadd.f32 %v9383_v33, %v11137_v43  ;;  %v6909_v31 = vpop.f32.mrb[41].mxu0  ;;  %9496 = vmatpush3.bf16.msra.mxu1 %v9495_v38  ;;  %v7225_v38 = vmax.f32 %v7177_v28, 0.0 }
 0x2ea   : > { %v9498_v32 = vpack.c.bf16 %v11678_v22, %v11680_v42  ;;  %v9580_v61 = vadd.f32 %v6909_v31, %v11139_v44  ;;  %v9384_v0 = vpop.f32.mrb[42].mxu0  ;;  %9497 = vmatprep.subr.bf16.mxu1 %v10268_v56 }
 0x2eb   : > { %v9581_v41 = vadd.f32 %v9384_v0, %v11141_v18  ;;  %v6912_v37 = vpop.f32.mrb[43].mxu0  ;;  %v9501_v44 = vpack.c.bf16 %v11679_v26, %v7225_v38  ;;  %v11696_v26 = vld [vmem:[#allocation9_spill] sm:$0xff] }
 0x2ec   : > { %v11412_v50 = vadd.f32 %v9580_v61, %v11191_v6  ;;  %v9582_v43 = vadd.f32 %v6912_v37, %v11143_v45  ;;  %v11424_v61 = vadd.f32 %v9579_v35, %v11191_v6 }
 0x2ed   : > { %9499 = vmatpush3.bf16.msra.mxu1 %v9498_v32  ;;  %v11420_v31 = vadd.f32 %v9581_v41, %v11191_v6  ;;  %v11695_v32 = vld [vmem:[#allocation7_spill] sm:$0xff] }
 0x2ee   : > { %v7180_v33 = vadd.f32 %v9582_v43, %v11191_v6  ;;  %9500 = vmatprep.subr.bf16.mxu1 %v10268_v56  ;;  %v7227_v18 = vmax.f32 %v11412_v50, 0.0 }
 0x2ef   : > { %v7230_v41 = vmax.f32 %v11420_v31, 0.0 }
 0x2f0   : > { %v7228_v0 = vmax.f32 %v7180_v33, 0.0  ;;  %v9387_v22 = vpop.f32.mrb[44].mxu0 }
 0x2f1   : > { %v9583_v45 = vadd.f32 %v9387_v22, %v11146_v47  ;;  %v6925_v37 = vpop.f32.mrb[45].mxu0  ;;  %9502 = vmatpush3.bf16.msra.mxu1 %v9501_v44  ;;  %v7229_v47 = vmax.f32 %v11424_v61, 0.0 }
 0x2f2   : > { %v9504_v28 = vpack.c.bf16 %v7228_v0, %v7227_v18  ;;  %v9584_v43 = vadd.f32 %v6925_v37, %v11695_v32  ;;  %v9388_v38 = vpop.f32.mrb[46].mxu0  ;;  %9503 = vmatprep.subr.bf16.mxu1 %v10268_v56  ;;  %v7488_v32 = vld [vmem:[%s11664_s4] sm:$0xff] }
 0x2f3   : > { %v9585_v33 = vadd.f32 %v9388_v38, %v11696_v26  ;;  %v6928_v42 = vpop.f32.mrb[47].mxu0  ;;  %v9507_v44 = vpack.c.bf16 %v7230_v41, %v7229_v47  ;;  %v7490_v38 = vld [vmem:[%s11664_s4 + $0x10] sm:$0xff] }
 0x2f4   : > { %v7183_v35 = vadd.f32 %v9584_v43, %v11191_v6  ;;  %v9586_v10 = vadd.f32 %v6928_v42, %v11697_v29  ;;  %v11447_v29 = vadd.f32 %v9583_v45, %v11191_v6 }
 0x2f5   : > { %9505 = vmatpush3.bf16.msra.mxu1 %v9504_v28  ;;  %v7186_v26 = vadd.f32 %v9585_v33, %v11191_v6  ;;  %v7491_v33 = vld [vmem:[%s11664_s4 + $0x18] sm:$0xff] }
 0x2f6   : > { %v11437_v22 = vadd.f32 %v9586_v10, %v11191_v6  ;;  %9506 = vmatprep.subr.bf16.mxu1 %v10268_v56  ;;  %v7231_v0 = vmax.f32 %v7183_v35, 0.0  ;;  %v7233_v28 = vmax.f32 %v11447_v29, 0.0  ;;  %v7489_v6 = vld [vmem:[%s11664_s4 + $0x8] sm:$0xff] }
 0x2f7   : > { %v7234_v42 = vmax.f32 %v7186_v26, 0.0  ;;  %v9516_v43 = vpack.c.bf16 %v7489_v6, %v7488_v32  ;;  %v11698_v35 = vld [vmem:[#allocation8_spill] sm:$0xff]  ;;  %v7492_v26 = vld [vmem:[%s11664_s4 + $0x20] sm:$0xff] }
 0x2f8   : > { %v7232_v37 = vmax.f32 %v11437_v22, 0.0  ;;  %v7496_v6 = vld [vmem:[%s11664_s4 + $0x40] sm:$0xff] }
 0x2f9   : > { %9508 = vmatpush3.bf16.msra.mxu1 %v9507_v44  ;;  %v9513_v45 = vpack.c.bf16 %v7234_v42, %v7233_v28  ;;  %v9519_v44 = vpack.c.bf16 %v7491_v33, %v7490_v38  ;;  %v7494_v42 = vld [vmem:[%s11664_s4 + $0x30] sm:$0xff]  ;;  %v7499_v33 = vld [vmem:[%s11664_s4 + $0x58] sm:$0xff] }
 0x2fa   : > { %v9510_v10 = vpack.c.bf16 %v7232_v37, %v7231_v0  ;;  %9509 = vmatprep.subr.bf16.mxu1 %v10268_v56  ;;  %v7493_v0 = vld [vmem:[%s11664_s4 + $0x28] sm:$0xff]  ;;  %v7498_v38 = vld [vmem:[%s11664_s4 + $0x50] sm:$0xff] }
 0x2fd   : > { %9511 = vmatpush3.bf16.msra.mxu1 %v9510_v10  ;;  %v9522_v10 = vpack.c.bf16 %v7493_v0, %v7492_v26  ;;  %v7501_v26 = vld [vmem:[%s11664_s4 + $0x68] sm:$0xff] }
 0x2fe   : > { %9512 = vmatprep.subr.bf16.mxu1 %v10268_v56 }
 0x301   : > { %9514 = vmatpush3.bf16.msra.mxu1 %v9513_v45  ;;  %v7497_v45 = vld [vmem:[%s11664_s4 + $0x48] sm:$0xff] }
 0x302   : > { %9515 = vmatprep.subr.bf16.mxu1 %v10268_v56 }
 0x304   : > { %9422 = vmatmul.mubr.f32.vlgmr.msra.gmra.mrb[50].mxu1 %v11698_v35  ;;  %v9531_v35 = vpack.c.bf16 %v7499_v33, %v7498_v38 }
 0x305   : > { %9517 = vmatpush3.bf16.msra.mxu1 %v9516_v43  ;;  %9456 = vmatprep.mubr.msk.f32.mxu1 %vm10269_vm12, %v10270_v40  ;;  %v7495_v40 = vld [vmem:[%s11664_s4 + $0x38] sm:$0xff]  ;;  %v9528_v43 = vpack.c.bf16 %v7497_v45, %v7496_v6 }
 0x306   : > { %9518 = vmatprep.subr.bf16.mxu1 %v10268_v56  ;;  %v9525_v32 = vpack.c.bf16 %v7495_v40, %v7494_v42  ;;  %v7503_v42 = vld [vmem:[%s11664_s4 + $0x78] sm:$0xff] }
 0x309   : > { %9520 = vmatpush3.bf16.msra.mxu1 %v9519_v44  ;;  %v7500_v44 = vld [vmem:[%s11664_s4 + $0x60] sm:$0xff] }
 0x30a   : > { %9521 = vmatprep.subr.bf16.mxu1 %v10268_v56  ;;  %v9534_v0 = vpack.c.bf16 %v7501_v26, %v7500_v44 }
 0x30d   : > { %9523 = vmatpush3.bf16.msra.mxu1 %v9522_v10  ;;  %v7502_v10 = vld [vmem:[%s11664_s4 + $0x70] sm:$0xff] }
 0x30e   : > { %9524 = vmatprep.subr.bf16.mxu1 %v10268_v56  ;;  %v9537_v40 = vpack.c.bf16 %v7503_v42, %v7502_v10 }
 0x311   : > { %9526 = vmatpush3.bf16.msra.mxu1 %v9525_v32 }
 0x312   : > { %9527 = vmatprep.subr.bf16.mxu1 %v10268_v56 }
 0x315   : > { %9529 = vmatpush3.bf16.msra.mxu1 %v9528_v43 }
 0x316   : > { %9530 = vmatprep.subr.bf16.mxu1 %v10268_v56 }
 0x319   : > { %9532 = vmatpush3.bf16.msra.mxu1 %v9531_v35 }
 0x31a   : > { %9533 = vmatprep.subr.bf16.mxu1 %v10268_v56 }
 0x31d   : > { %9535 = vmatpush3.bf16.msra.mxu1 %v9534_v0 }
 0x31e   : > { %9536 = vmatprep.subr.bf16.mxu1 %v10268_v56  ;;  %v7504_v56 = vld [vmem:[%s11665_s5] sm:$0x1] }
 0x321   : > { %9538 = vmatpush3.bf16.msra.mxu1 %v9537_v40 }
 0x3b7   : > { %v8902_v32 = vpop.f32.mrb[48].mxu1 }
 0x3b8   : > { %v8903_v6 = vpop.f32.mrb[49].mxu1 }
 0x3b9   : > { %v8904_v45 = vadd.f32 %v8903_v6, %v8902_v32 }
 0x3d7   : > { %v7484_v43 = vpop.f32.mrb[50].mxu1 }
 0x3d8   : > { %v7485_v38 = vadd.f32 %v8904_v45, %v7484_v43  ;;  %v9423_v33 = vpop.f32.mrb[51].mxu1 }
 0x3da   : > { %9457 = vmatmul.mubr.f32.vlgmr.msra.gmra.mrb[52].mxu1 %v7485_v38 }
 0x4ad   : > { %v7571_v35 = vpop.f32.mrb[52].mxu1 }
 0x4ae   : > { %v7572_v44 = vadd.f32 %v7571_v35, %v7504_v56  ;;  %v9458_v26 = vpop.f32.mrb[53].mxu1  ;;  %v11712_v35 = vmax.f32 %v11384_v27, 0.0 }
 0x4b0   : > { %v8416_v0 = vmul.f32 -1.442695, %v7572_v44  ;;  %v11713_v44 = vmax.f32 %v11391_v34, 0.0 }
 0x4b2   : > { %10199 = vpow2.f32 %v8416_v0 }
 0x4bc   : > { %v10200_v10 = vpop.eup %10199 }
 0x4bd   : > { %v7578_v42 = vadd.f32 1.0, %v10200_v10 }
 0x4bf   : > { %10201 = vrcp.f32 %v7578_v42 }
 0x4c9   : > { %v10202_v40 = vpop.eup %10201 }
 0x4ca   : > { %v7586_v32 = vrot.slane %v10202_v40, %v7335_v58 }
 0x4cc   : > { %v7587_v6 = vmul.f32 %v7586_v32, %v7187_v51  ;;  %v7588_v45 = vmul.f32 %v7586_v32, %v7188_v12  ;;  %v7601_v43 = vmul.f32 %v7586_v32, %v7190_v8  ;;  %v7602_v38 = vmul.f32 %v7586_v32, %v7191_v14 }
 0x4cd   : > { %v7616_v33 = vmul.f32 %v7586_v32, %v7193_v15  ;;  %v7617_v58 = vmul.f32 %v7586_v32, %v11699_v23  ;;  %v7631_v62 = vmul.f32 %v7586_v32, %v7196_v60  ;;  %v7632_v49 = vmul.f32 %v7586_v32, %v7197_v7 }
 0x4ce   : > { %v7646_v24 = vmul.f32 %v7586_v32, %v7199_v52  ;;  %v7647_v12 = vmul.f32 %v7586_v32, %v7200_v2  ;;  %v7661_v51 = vmul.f32 %v7586_v32, %v7202_v57  ;;  %v11700_v8 = vmax.f32 %v11199_v9, 0.0 }
 0x4cf   : > { %v7676_v54 = vmul.f32 %v7586_v32, %v11701_v48  ;;  %v11702_v14 = vmax.f32 %v11206_v63, 0.0  ;;  %v11703_v15 = vmax.f32 %v11246_v5, 0.0  ;;  %v7692_v7 = vmul.f32 %v7586_v32, %v11704_v17 }
 0x4d0   : > { %v7662_v4 = vmul.f32 %v7586_v32, %v11700_v8  ;;  %v7706_v59 = vmul.f32 %v7586_v32, %v7211_v25  ;;  %v7707_v9 = vmul.f32 %v7586_v32, %v11705_v21  ;;  %v7721_v11 = vmul.f32 %v7586_v32, %v11706_v13 }
 0x4d1   : > { %v7677_v55 = vmul.f32 %v7586_v32, %v11702_v14  ;;  %v7691_v60 = vmul.f32 %v7586_v32, %v11703_v15  ;;  %v11707_v63 = vmax.f32 %v11317_v20, 0.0  ;;  %v11708_v5 = vmax.f32 %v11331_v30, 0.0 }
 0x4d2   : > { %v7737_v57 = vmul.f32 %v7586_v32, %v11709_v16  ;;  %v7751_v25 = vmul.f32 %v7586_v32, %v11710_v39  ;;  %v7752_v56 = vmul.f32 %v7586_v32, %v11711_v46  ;;  %v7766_v53 = vmul.f32 %v7586_v32, %v11712_v35 }
 0x4d3   : > { %v7722_v2 = vmul.f32 %v7586_v32, %v11707_v63  ;;  %v7736_v52 = vmul.f32 %v7586_v32, %v11708_v5  ;;  %v7767_v26 = vmul.f32 %v7586_v32, %v11713_v44  ;;  %v11714_v20 = vmax.f32 %v11397_v36, 0.0 }
 0x4d4   : > { %v7782_v30 = vmul.f32 %v7586_v32, %v7227_v18  ;;  %v7796_v3 = vmul.f32 %v7586_v32, %v7229_v47  ;;  %v7797_v1 = vmul.f32 %v7586_v32, %v7230_v41  ;;  %v7811_v19 = vmul.f32 %v7586_v32, %v7232_v37 }
 0x4d5   : > { %v7781_v0 = vmul.f32 %v7586_v32, %v11714_v20  ;;  %v7812_v27 = vmul.f32 %v7586_v32, %v7233_v28  ;;  %v8553_v34 = vpack.c.bf16 %v7588_v45, %v7587_v6  ;;  %v8558_v36 = vpack.c.bf16 %v7602_v38, %v7601_v43 }
 0x4d6   : > { %v8563_v50 = vpack.c.bf16 %v7617_v58, %v7616_v33  ;;  %v8568_v31 = vpack.c.bf16 %v7632_v49, %v7631_v62  ;;  %v8573_v18 = vpack.c.bf16 %v7647_v12, %v7646_v24  ;;  %v8578_v61 = vpack.c.bf16 %v7662_v4, %v7661_v51 }
 0x4d7   : > { %v8583_v41 = vpack.c.bf16 %v7677_v55, %v7676_v54  ;;  %v8588_v47 = vpack.c.bf16 %v7692_v7, %v7691_v60  ;;  %v8593_v22 = vpack.c.bf16 %v7707_v9, %v7706_v59  ;;  %v8598_v37 = vpack.c.bf16 %v7722_v2, %v7721_v11  ;;  %8554 = vst [vmem:[%s11591_s13] sm:$0xff] %v8553_v34  }
 0x4d8   : > { %v8603_v29 = vpack.c.bf16 %v7737_v57, %v7736_v52  ;;  %v8608_v28 = vpack.c.bf16 %v7752_v56, %v7751_v25  ;;  %8630 = vst [vmem:[%s11591_s13 + $0x8] sm:$0xff] %v8558_v36   ;;  %8631 = vst [vmem:[%s11591_s13 + $0x10] sm:$0xff] %v8563_v50   ;;  %v8613_v10 = vpack.c.bf16 %v7767_v26, %v7766_v53 }
 0x4d9   : > { %8632 = vst [vmem:[%s11591_s13 + $0x18] sm:$0xff] %v8568_v31   ;;  %v8618_v42 = vpack.c.bf16 %v7782_v30, %v7781_v0  ;;  %v8623_v40 = vpack.c.bf16 %v7797_v1, %v7796_v3  ;;  %v8628_v32 = vpack.c.bf16 %v7812_v27, %v7811_v19  ;;  %8633 = vst [vmem:[%s11591_s13 + $0x20] sm:$0xff] %v8573_v18  }
 0x4da   : > { %8634 = vst [vmem:[%s11591_s13 + $0x28] sm:$0xff] %v8578_v61   ;;  %8635 = vst [vmem:[%s11591_s13 + $0x30] sm:$0xff] %v8583_v41  }
 0x4db   : > { %8636 = vst [vmem:[%s11591_s13 + $0x38] sm:$0xff] %v8588_v47   ;;  %8637 = vst [vmem:[%s11591_s13 + $0x40] sm:$0xff] %v8593_v22  }
 0x4dc   : > { %8638 = vst [vmem:[%s11591_s13 + $0x48] sm:$0xff] %v8598_v37   ;;  %8639 = vst [vmem:[%s11591_s13 + $0x50] sm:$0xff] %v8603_v29  }
 0x4dd   : > { %8640 = vst [vmem:[%s11591_s13 + $0x58] sm:$0xff] %v8608_v28   ;;  %8641 = vst [vmem:[%s11591_s13 + $0x60] sm:$0xff] %v8613_v10  }
 0x4de   : > { %8642 = vst [vmem:[%s11591_s13 + $0x68] sm:$0xff] %v8618_v42   ;;  %8643 = vst [vmem:[%s11591_s13 + $0x70] sm:$0xff] %v8623_v40  }
 0x4df   : > { %8644 = vst [vmem:[%s11591_s13 + $0x78] sm:$0xff] %v8628_v32  }
 0x4e0   : > { %10216 = shalt.err (!%p10213_p3)
}
 0x4e1   : > { %s10217_s28 = scalar_lea.hbm %s11601_s16, 2048  ;;  %s10221_s10 = scalar_lea.hbm %s11666_s6, 4096 }
 0x4e2   : > { %p10218_p4 = scmp.ne.s32.totalorder %s11601_s16, %s10217_s28  ;;  %p10222_p9 = scmp.lt.u32.totalorder %s11601_s16, %s11666_s6 }
 0x4e3   : > { %p10223_p10 = scmp.lt.u32.totalorder %s10221_s10, %s10217_s28  ;;  %p10225_p12 = scmp.lt.u32.totalorder %s10217_s28, %s11601_s16 }
 0x4e4   : > { %p10219_p7 = pnand %p10218_p4, %p10347_p5 }
 0x4e5   : > { %p10224_p11 = por %p10223_p10, %p10222_p9 }
 0x4e6   : > { %p10220_p8 = pneg %p10219_p7 }
 0x4e7   : > { %p10226_p13 = por %p10225_p12, %p10224_p11 }
 0x4e9   : > { %p10227_p0 = pnand %p10226_p13, %p10220_p8 }
 0x4eb   : > { %10230 = shalt.err (!%p10227_p0)
}
 0x4ec   : > { %s10272_s13 = smov 64   ;;  %s10273_s25 = smov 4  }
 0x4ed   : > { %9932 = dma.vmem_to_hbm [thread:$0]  (%p10347_p5), %s11603_s14, 2048, %s11601_s16, %s11619_s17, %s10272_s13, %s10272_s13, %s10273_s25  }
 0x4ee PF: > { %p9938_p1 = scmp.ge.s32.totalorder %s10265_s24, 2  ;;  %s7853_s15 = sand.u32 1, %s10253_s21  }
 0x4ef   : > { %s7854_s18 = scalar_lea.sflag [#allocation5], %s7853_s15 }
 0x4f0   : > { %p9935_p2 = pnand %p9938_p1, %p10351_p6 }
 0x4f2   : > { %10248 = dma.done.wait (!%p9935_p2), %s7854_s18, 2048  }
 0x4f3   : > { %10250 = vsyncadd (!%p9935_p2), %s7854_s18, 4294965248  ;;  %p16_p3 = scmp.ge.s32.totalorder %s10334_s27, 4   ;;  %s11715_s21 = smov %s10257_s22 }
 0x4f4   : > { %s11716_s22 = smov %s10261_s23  ;;  %s11717_s23 = smov %s10345_s30 }
 0x4f5   : > { %s11718_s24 = smov %s10334_s27  ;;  %18 = sbr.rel (!%p16_p3) target bundleno = 3 (0x3), region = 117 }
 0x4fc   :  { %7859 = vsyncpa [#allocation5], 1 }
 0x4fd   :  { %7861 = vsyncpa [#allocation5 + $0x1], 1 }

</bundles_post_ra>
